<compile_context>
chip_gen: v6e
topology: v6e:2x2x1
jax: 0.10.0
libtpu: 0.0.40
codegen_flags: <defaults>
</compile_context>

<pallas_src>
import functools

import jax
import jax.numpy as jnp
from jax import lax
from jax.experimental import pallas as pl
from jax.experimental.pallas import tpu as pltpu
import numpy as np


def _round_up(x, m):
    return ((x + m - 1) // m) * m


def _pad_to(x, shape):
    pads = [(0, s - d) for d, s in zip(x.shape, shape)]
    return jnp.pad(x, pads)


# ---------------------------------------------------------------------------
# Pallas kernel: full bidirectional LSTM over time + output projection.
# ---------------------------------------------------------------------------
def _bilstm_kernel(emb_ref,       # (T, Bp, E)   bf16  time-major embeddings
                   len_ref,       # (Bp, 1)      i32   sequence lengths (0 = pad row)
                   wih_f_ref,     # (E, 4Hp)     bf16  (pre-transposed, gate-padded)
                   whh_f_ref,     # (Hp, 4Hp)    bf16
                   b_f_ref,       # (1, 4Hp)     f32   (b_ih + b_hh, forward)
                   wih_b_ref,     # (E, 4Hp)     bf16
                   whh_b_ref,     # (Hp, 4Hp)    bf16
                   b_b_ref,       # (1, 4Hp)     f32
                   wlin_f_ref,    # (Hp, Op)     bf16  linear weight, fwd half
                   wlin_b_ref,    # (Hp, Op)     bf16  linear weight, bwd half
                   blin_ref,      # (1, Op)      f32
                   out_ref,       # (T, Bp, Op)  f32
                   h_f, c_f, h_b, c_b,   # (Bp, Hp) f32 recurrent state
                   gx_f, gx_b,           # (T, Bp, 4Hp) f32 precomputed input gates
                   fwd_o, bwd_o):        # (T, Bp, Hp)  f32 per-direction hidden seq
    T, Bp, _ = emb_ref.shape
    Hp = h_f.shape[1]

    h_f[...] = jnp.zeros_like(h_f)
    c_f[...] = jnp.zeros_like(c_f)
    h_b[...] = jnp.zeros_like(h_b)
    c_b[...] = jnp.zeros_like(c_b)

    lens = len_ref[...]                    # (Bp, 1) int32
    emb = emb_ref[...]                     # (T, Bp, E) bf16

    # ---- hoisted input projection: one big GEMM per direction, bias folded --
    dn = (((2,), (0,)), ((), ()))
    gx_f[...] = lax.dot_general(emb, wih_f_ref[...], dn,
                                preferred_element_type=jnp.float32) + b_f_ref[...]
    gx_b[...] = lax.dot_general(emb, wih_b_ref[...], dn,
                                preferred_element_type=jnp.float32) + b_b_ref[...]

    whh_f = whh_f_ref[...]                 # (Hp, 4Hp) bf16, loaded once
    whh_b = whh_b_ref[...]

    def gates_to_hc(g, c_prev):
        # PyTorch gate order: i, f, g, o  (each slice is a full 128-lane block)
        i = jax.nn.sigmoid(g[:, 0 * Hp:1 * Hp])
        f = jax.nn.sigmoid(g[:, 1 * Hp:2 * Hp])
        gg = jnp.tanh(g[:, 2 * Hp:3 * Hp])
        o = jax.nn.sigmoid(g[:, 3 * Hp:4 * Hp])
        c_new = f * c_prev + i * gg
        h_new = o * jnp.tanh(c_new)
        return h_new, c_new

    # ---- fused fwd/bwd recurrence: both directions every iteration ---------
    def step(s, carry):
        tf = s              # forward time index
        tb = T - 1 - s      # backward time index

        # forward direction
        h_prev = h_f[...]
        c_prev = c_f[...]
        g = gx_f[tf] + jnp.dot(h_prev.astype(jnp.bfloat16), whh_f,
                               preferred_element_type=jnp.float32)
        hn, cn = gates_to_hc(g, c_prev)
        m = tf < lens                                   # (Bp, 1)
        h_f[...] = jnp.where(m, hn, h_prev)
        c_f[...] = jnp.where(m, cn, c_prev)
        fwd_o[tf] = jnp.where(m, hn, 0.0)

        # backward direction
        h_prev_b = h_b[...]
        c_prev_b = c_b[...]
        gb = gx_b[tb] + jnp.dot(h_prev_b.astype(jnp.bfloat16), whh_b,
                                preferred_element_type=jnp.float32)
        hnb, cnb = gates_to_hc(gb, c_prev_b)
        mb = tb < lens
        h_b[...] = jnp.where(mb, hnb, h_prev_b)
        c_b[...] = jnp.where(mb, cnb, c_prev_b)
        bwd_o[tb] = jnp.where(mb, hnb, 0.0)
        return carry

    lax.fori_loop(0, T, step, 0, unroll=True)

    # ---- output projection: two GEMMs (no concat), single bias add ---------
    fo = fwd_o[...].astype(jnp.bfloat16)
    bo = bwd_o[...].astype(jnp.bfloat16)
    scores = (lax.dot_general(fo, wlin_f_ref[...], dn,
                              preferred_element_type=jnp.float32)
              + lax.dot_general(bo, wlin_b_ref[...], dn,
                                preferred_element_type=jnp.float32)
              + blin_ref[...])
    out_ref[...] = scores


@jax.jit
def bilstm_pallas(emb_btE, lengths, params):
    """emb_btE: (B, T, E) float32 embeddings; lengths: (B,) int lengths."""
    B, T, E = emb_btE.shape
    H = params["whh_f"].shape[1]
    O = params["wlin"].shape[0]

    Hp = _round_up(H, 128)      # lane-dense gate slices
    Op = _round_up(O, 128)      # lane-dense output stores
    Bp = _round_up(B, 8)        # full sublane tiles

    # --- repack weights once in the wrapper: transpose + per-gate zero-pad --
    def pack_ih(w):             # (4H, E) -> (E, 4Hp) bf16
        w4 = _pad_to(w.reshape(4, H, E), (4, Hp, E))
        return jnp.transpose(w4, (2, 0, 1)).reshape(E, 4 * Hp).astype(jnp.bfloat16)

    def pack_hh(w):             # (4H, H) -> (Hp, 4Hp) bf16
        w4 = _pad_to(w.reshape(4, H, H), (4, Hp, Hp))
        return jnp.transpose(w4, (2, 0, 1)).reshape(Hp, 4 * Hp).astype(jnp.bfloat16)

    def pack_bias(b):           # (1, 4H) -> (1, 4Hp) f32
        b4 = _pad_to(b.reshape(4, H), (4, Hp))
        return b4.reshape(1, 4 * Hp).astype(jnp.float32)

    wlin = params["wlin"]       # (O, 2H): first H cols = fwd, last H = bwd
    wlin_f = _pad_to(wlin[:, :H].T, (Hp, Op)).astype(jnp.bfloat16)
    wlin_b = _pad_to(wlin[:, H:].T, (Hp, Op)).astype(jnp.bfloat16)
    blin = _pad_to(params["blin"].reshape(1, O), (1, Op)).astype(jnp.float32)

    # time-major, batch-padded, bf16 embeddings (halves the emb DMA)
    emb_tbe = _pad_to(jnp.transpose(emb_btE, (1, 0, 2)), (T, Bp, E)).astype(jnp.bfloat16)
    lens = _pad_to(lengths.astype(jnp.int32).reshape(B, 1), (Bp, 1))

    vmem = functools.partial(pl.BlockSpec, memory_space=pltpu.MemorySpace.VMEM)

    out = pl.pallas_call(
        _bilstm_kernel,
        out_shape=jax.ShapeDtypeStruct((T, Bp, Op), jnp.float32),
        in_specs=[vmem() for _ in range(11)],
        out_specs=vmem(),
        scratch_shapes=[
            pltpu.VMEM((Bp, Hp), jnp.float32),        # h_f
            pltpu.VMEM((Bp, Hp), jnp.float32),        # c_f
            pltpu.VMEM((Bp, Hp), jnp.float32),        # h_b
            pltpu.VMEM((Bp, Hp), jnp.float32),        # c_b
            pltpu.VMEM((T, Bp, 4 * Hp), jnp.float32),  # precomputed fwd input gates
            pltpu.VMEM((T, Bp, 4 * Hp), jnp.float32),  # precomputed bwd input gates
            pltpu.VMEM((T, Bp, Hp), jnp.float32),     # fwd hidden sequence
            pltpu.VMEM((T, Bp, Hp), jnp.float32),     # bwd hidden sequence
        ],
        compiler_params=pltpu.CompilerParams(
            # sized for v7x's 64 MiB per-TensorCore VMEM; plenty of headroom here
            vmem_limit_bytes=48 * 1024 * 1024),
    )(emb_tbe, lens,
      pack_ih(params["wih_f"]), pack_hh(params["whh_f"]), pack_bias(params["b_f"]),
      pack_ih(params["wih_b"]), pack_hh(params["whh_b"]), pack_bias(params["b_b"]),
      wlin_f, wlin_b, blin)

    # strip padding, back to batch_first (B, T, O)
    return jnp.transpose(out[:, :B, :O], (1, 0, 2))

# TODO(synk): for long sequences, grid over T with (1, Bp, *) BlockSpecs and a
# per-timestep projection so VMEM stays O(B*(E+H)) instead of O(T*B*H); at the
# toy sizes here everything fits comfortably resident.


# ---------------------------------------------------------------------------
# Pure-JAX f32 reference (PyTorch-equivalent math) for correctness checking.
# ---------------------------------------------------------------------------
def bilstm_reference(emb_btE, lengths, params):
    B, T, E = emb_btE.shape
    H = params["whh_f"].shape[1]
    emb = jnp.transpose(emb_btE, (1, 0, 2))              # (T, B, E)
    lens = lengths.astype(jnp.int32).reshape(B, 1)

    def run_dir(wih, whh, bias, reverse):
        h = jnp.zeros((B, H), jnp.float32)
        c = jnp.zeros((B, H), jnp.float32)
        out = jnp.zeros((T, B, H), jnp.float32)
        order = range(T - 1, -1, -1) if reverse else range(T)
        for t in order:
            x = emb[t]
            gates = x @ wih.T + h @ whh.T + bias
            i = jax.nn.sigmoid(gates[:, 0 * H:1 * H])
            f = jax.nn.sigmoid(gates[:, 1 * H:2 * H])
            g = jnp.tanh(gates[:, 2 * H:3 * H])
            o = jax.nn.sigmoid(gates[:, 3 * H:4 * H])
            cn = f * c + i * g
            hn = o * jnp.tanh(cn)
            mask = t < lens
            h = jnp.where(mask, hn, h)
            c = jnp.where(mask, cn, c)
            out = out.at[t].set(jnp.where(mask, h, 0.0))
        return out

    fwd = run_dir(params["wih_f"], params["whh_f"], params["b_f"], False)
    bwd = run_dir(params["wih_b"], params["whh_b"], params["b_b"], True)
    rnn = jnp.concatenate([fwd, bwd], axis=-1)            # (T, B, 2H)
    scores = jnp.einsum("tbh,oh->tbo", rnn, params["wlin"]) + params["blin"]
    return jnp.transpose(scores, (1, 0, 2))


# ---------------------------------------------------------------------------
if __name__ == "__main__":
    # Small, deterministic config.
    vocab_size, emb_size, hidden_size, out_size = 50, 16, 32, 8
    B, T = 2, 8

    key = jax.random.PRNGKey(0)
    ks = jax.random.split(key, 12)
    s = 0.1

    embedding_table = jax.random.normal(ks[0], (vocab_size, emb_size), jnp.float32) * s

    params = {
        "wih_f": jax.random.normal(ks[1], (4 * hidden_size, emb_size), jnp.float32) * s,
        "whh_f": jax.random.normal(ks[2], (4 * hidden_size, hidden_size), jnp.float32) * s,
        "b_f": (jax.random.normal(ks[3], (1, 4 * hidden_size), jnp.float32) * s
                + jax.random.normal(ks[4], (1, 4 * hidden_size), jnp.float32) * s),
        "wih_b": jax.random.normal(ks[5], (4 * hidden_size, emb_size), jnp.float32) * s,
        "whh_b": jax.random.normal(ks[6], (4 * hidden_size, hidden_size), jnp.float32) * s,
        "b_b": (jax.random.normal(ks[7], (1, 4 * hidden_size), jnp.float32) * s
                + jax.random.normal(ks[8], (1, 4 * hidden_size), jnp.float32) * s),
        "wlin": jax.random.normal(ks[9], (out_size, 2 * hidden_size), jnp.float32) * s,
        "blin": jax.random.normal(ks[10], (1, out_size), jnp.float32) * s,
    }

    sents_tensor = jax.random.randint(ks[11], (B, T), 0, vocab_size, jnp.int32)
    lengths = jnp.array([T, T - 3], dtype=jnp.int32)   # sorted descending (packed)

    # Embedding lookup (gather) done as plain-JAX glue.
    emb = jnp.take(embedding_table, sents_tensor, axis=0)   # (B, T, E)

    scores = bilstm_pallas(emb, lengths, params)
    scores = jax.block_until_ready(scores)

    ref = jax.block_until_ready(bilstm_reference(emb, lengths, params))
    # bf16 matmul inputs with f32 accumulation -> loosened tolerance vs f32 ref.
    np.testing.assert_allclose(np.asarray(scores), np.asarray(ref),
                               rtol=5e-2, atol=5e-3)
    assert scores.shape == (B, T, out_size)

    print("KERNEL_OK")
</pallas_src>

<mosaic_0001>
module attributes {stable_mosaic.version = 11 : i64} {
  func.func @_bilstm_kernel(%arg0: memref<8x8x16xbf16, #tpu.memory_space<vmem>>, %arg1: memref<8x1xi32, #tpu.memory_space<vmem>>, %arg2: memref<16x512xbf16, #tpu.memory_space<vmem>>, %arg3: memref<128x512xbf16, #tpu.memory_space<vmem>>, %arg4: memref<1x512xf32, #tpu.memory_space<vmem>>, %arg5: memref<16x512xbf16, #tpu.memory_space<vmem>>, %arg6: memref<128x512xbf16, #tpu.memory_space<vmem>>, %arg7: memref<1x512xf32, #tpu.memory_space<vmem>>, %arg8: memref<128x128xbf16, #tpu.memory_space<vmem>>, %arg9: memref<128x128xbf16, #tpu.memory_space<vmem>>, %arg10: memref<1x128xf32, #tpu.memory_space<vmem>>, %arg11: memref<8x8x128xf32, #tpu.memory_space<vmem>>, %arg12: memref<8x128xf32, #tpu.memory_space<vmem>>, %arg13: memref<8x128xf32, #tpu.memory_space<vmem>>, %arg14: memref<8x128xf32, #tpu.memory_space<vmem>>, %arg15: memref<8x128xf32, #tpu.memory_space<vmem>>, %arg16: memref<8x8x512xf32, #tpu.memory_space<vmem>>, %arg17: memref<8x8x512xf32, #tpu.memory_space<vmem>>, %arg18: memref<8x8x128xf32, #tpu.memory_space<vmem>>, %arg19: memref<8x8x128xf32, #tpu.memory_space<vmem>>) attributes {dimension_semantics = [], scalar_prefetch = 0 : i64, scratch_operands = 8 : i64, tpu.core_type = #tpu.core_type<tc>} {
    %cst = arith.constant 0.000000e+00 : f32
    %0 = vector.broadcast %cst : f32 to vector<8x128xf32>
    %c0 = arith.constant 0 : index
    %c0_0 = arith.constant 0 : index
    %1 = vector.load %arg12[%c0, %c0_0] : memref<8x128xf32, #tpu.memory_space<vmem>>, vector<8x128xf32>
    tpu.vector_store %arg12[%c0, %c0_0], %0 {strides = array<i32>} : memref<8x128xf32, #tpu.memory_space<vmem>>, vector<8x128xf32>,
    %cst_1 = arith.constant 0.000000e+00 : f32
    %2 = vector.broadcast %cst_1 : f32 to vector<8x128xf32>
    %c0_2 = arith.constant 0 : index
    %c0_3 = arith.constant 0 : index
    %3 = vector.load %arg13[%c0_2, %c0_3] : memref<8x128xf32, #tpu.memory_space<vmem>>, vector<8x128xf32>
    tpu.vector_store %arg13[%c0_2, %c0_3], %2 {strides = array<i32>} : memref<8x128xf32, #tpu.memory_space<vmem>>, vector<8x128xf32>,
    %cst_4 = arith.constant 0.000000e+00 : f32
    %4 = vector.broadcast %cst_4 : f32 to vector<8x128xf32>
    %c0_5 = arith.constant 0 : index
    %c0_6 = arith.constant 0 : index
    %5 = vector.load %arg14[%c0_5, %c0_6] : memref<8x128xf32, #tpu.memory_space<vmem>>, vector<8x128xf32>
    tpu.vector_store %arg14[%c0_5, %c0_6], %4 {strides = array<i32>} : memref<8x128xf32, #tpu.memory_space<vmem>>, vector<8x128xf32>,
    %cst_7 = arith.constant 0.000000e+00 : f32
    %6 = vector.broadcast %cst_7 : f32 to vector<8x128xf32>
    %c0_8 = arith.constant 0 : index
    %c0_9 = arith.constant 0 : index
    %7 = vector.load %arg15[%c0_8, %c0_9] : memref<8x128xf32, #tpu.memory_space<vmem>>, vector<8x128xf32>
    tpu.vector_store %arg15[%c0_8, %c0_9], %6 {strides = array<i32>} : memref<8x128xf32, #tpu.memory_space<vmem>>, vector<8x128xf32>,
    %c0_10 = arith.constant 0 : index
    %c0_11 = arith.constant 0 : index
    %8 = vector.load %arg1[%c0_10, %c0_11] : memref<8x1xi32, #tpu.memory_space<vmem>>, vector<8x1xi32>
    %c0_12 = arith.constant 0 : index
    %c0_13 = arith.constant 0 : index
    %c0_14 = arith.constant 0 : index
    %9 = vector.load %arg0[%c0_12, %c0_13, %c0_14] : memref<8x8x16xbf16, #tpu.memory_space<vmem>>, vector<8x8x16xbf16>
    %c0_15 = arith.constant 0 : index
    %c0_16 = arith.constant 0 : index
    %10 = vector.load %arg2[%c0_15, %c0_16] : memref<16x512xbf16, #tpu.memory_space<vmem>>, vector<16x512xbf16>
    %cst_17 = arith.constant dense<0.000000e+00> : vector<8x8x512xf32>
    %11 = tpu.matmul %9, %10, %cst_17 {dimension_numbers = #tpu.dot_dimension_numbers<[2], [0], [0, 1], [1], [0, 0, 0, 1, 1, 1], [], []>} : vector<8x8x16xbf16>, vector<16x512xbf16>, vector<8x8x512xf32> -> vector<8x8x512xf32>
    %c0_18 = arith.constant 0 : index
    %c0_19 = arith.constant 0 : index
    %12 = vector.load %arg4[%c0_18, %c0_19] : memref<1x512xf32, #tpu.memory_space<vmem>>, vector<1x512xf32>
    %13 = vector.shape_cast %12 : vector<1x512xf32> to vector<1x1x512xf32>
    %14 = vector.broadcast %13 : vector<1x1x512xf32> to vector<8x8x512xf32>
    %15 = arith.addf %11, %14 : vector<8x8x512xf32>
    %c0_20 = arith.constant 0 : index
    %c0_21 = arith.constant 0 : index
    %c0_22 = arith.constant 0 : index
    %16 = vector.load %arg16[%c0_20, %c0_21, %c0_22] : memref<8x8x512xf32, #tpu.memory_space<vmem>>, vector<8x8x512xf32>
    tpu.vector_store %arg16[%c0_20, %c0_21, %c0_22], %15 {strides = array<i32>} : memref<8x8x512xf32, #tpu.memory_space<vmem>>, vector<8x8x512xf32>,
    %c0_23 = arith.constant 0 : index
    %c0_24 = arith.constant 0 : index
    %17 = vector.load %arg5[%c0_23, %c0_24] : memref<16x512xbf16, #tpu.memory_space<vmem>>, vector<16x512xbf16>
    %cst_25 = arith.constant dense<0.000000e+00> : vector<8x8x512xf32>
    %18 = tpu.matmul %9, %17, %cst_25 {dimension_numbers = #tpu.dot_dimension_numbers<[2], [0], [0, 1], [1], [0, 0, 0, 1, 1, 1], [], []>} : vector<8x8x16xbf16>, vector<16x512xbf16>, vector<8x8x512xf32> -> vector<8x8x512xf32>
    %c0_26 = arith.constant 0 : index
    %c0_27 = arith.constant 0 : index
    %19 = vector.load %arg7[%c0_26, %c0_27] : memref<1x512xf32, #tpu.memory_space<vmem>>, vector<1x512xf32>
    %20 = vector.shape_cast %19 : vector<1x512xf32> to vector<1x1x512xf32>
    %21 = vector.broadcast %20 : vector<1x1x512xf32> to vector<8x8x512xf32>
    %22 = arith.addf %18, %21 : vector<8x8x512xf32>
    %c0_28 = arith.constant 0 : index
    %c0_29 = arith.constant 0 : index
    %c0_30 = arith.constant 0 : index
    %23 = vector.load %arg17[%c0_28, %c0_29, %c0_30] : memref<8x8x512xf32, #tpu.memory_space<vmem>>, vector<8x8x512xf32>
    tpu.vector_store %arg17[%c0_28, %c0_29, %c0_30], %22 {strides = array<i32>} : memref<8x8x512xf32, #tpu.memory_space<vmem>>, vector<8x8x512xf32>,
    %c0_31 = arith.constant 0 : index
    %c0_32 = arith.constant 0 : index
    %24 = vector.load %arg3[%c0_31, %c0_32] : memref<128x512xbf16, #tpu.memory_space<vmem>>, vector<128x512xbf16>
    %c0_33 = arith.constant 0 : index
    %c0_34 = arith.constant 0 : index
    %25 = vector.load %arg6[%c0_33, %c0_34] : memref<128x512xbf16, #tpu.memory_space<vmem>>, vector<128x512xbf16>
    %c0_i32 = arith.constant 0 : i32
    %c7_i32 = arith.constant 7 : i32
    %26 = arith.subi %c7_i32, %c0_i32 : i32
    %c0_35 = arith.constant 0 : index
    %c0_36 = arith.constant 0 : index
    %27 = vector.load %arg12[%c0_35, %c0_36] : memref<8x128xf32, #tpu.memory_space<vmem>>, vector<8x128xf32>
    %c0_37 = arith.constant 0 : index
    %c0_38 = arith.constant 0 : index
    %28 = vector.load %arg13[%c0_37, %c0_38] : memref<8x128xf32, #tpu.memory_space<vmem>>, vector<8x128xf32>
    %29 = arith.index_cast %c0_i32 : i32 to index
    %c0_39 = arith.constant 0 : index
    %c0_40 = arith.constant 0 : index
    %30 = vector.load %arg16[%29, %c0_39, %c0_40] : memref<8x8x512xf32, #tpu.memory_space<vmem>>, vector<1x8x512xf32>
    %31 = vector.shape_cast %30 : vector<1x8x512xf32> to vector<8x512xf32>
    %32 = arith.truncf %27 : vector<8x128xf32> to vector<8x128xbf16>
    %cst_41 = arith.constant dense<0.000000e+00> : vector<8x512xf32>
    %33 = tpu.matmul %32, %24, %cst_41 {dimension_numbers = #tpu.dot_dimension_numbers<[1], [0], [0], [1], [0, 0, 1, 1], [], []>} : vector<8x128xbf16>, vector<128x512xbf16>, vector<8x512xf32> -> vector<8x512xf32>
    %34 = arith.addf %31, %33 : vector<8x512xf32>
    %35 = vector.extract_strided_slice %34 {offsets = [0, 0], sizes = [8, 128], strides = [1, 1]} : vector<8x512xf32> to vector<8x128xf32>
    %36 = arith.negf %35 : vector<8x128xf32>
    %37 = math.exp %36 : vector<8x128xf32>
    %cst_42 = arith.constant 1.000000e+00 : f32
    %38 = vector.broadcast %cst_42 : f32 to vector<8x128xf32>
    %39 = arith.addf %38, %37 : vector<8x128xf32>
    %40 = arith.divf %38, %39 : vector<8x128xf32>
    %41 = vector.extract_strided_slice %34 {offsets = [0, 128], sizes = [8, 128], strides = [1, 1]} : vector<8x512xf32> to vector<8x128xf32>
    %42 = arith.negf %41 : vector<8x128xf32>
    %43 = math.exp %42 : vector<8x128xf32>
    %cst_43 = arith.constant 1.000000e+00 : f32
    %44 = vector.broadcast %cst_43 : f32 to vector<8x128xf32>
    %45 = arith.addf %44, %43 : vector<8x128xf32>
    %46 = arith.divf %44, %45 : vector<8x128xf32>
    %47 = vector.extract_strided_slice %34 {offsets = [0, 256], sizes = [8, 128], strides = [1, 1]} : vector<8x512xf32> to vector<8x128xf32>
    %48 = math.tanh %47 : vector<8x128xf32>
    %49 = vector.extract_strided_slice %34 {offsets = [0, 384], sizes = [8, 128], strides = [1, 1]} : vector<8x512xf32> to vector<8x128xf32>
    %50 = arith.negf %49 : vector<8x128xf32>
    %51 = math.exp %50 : vector<8x128xf32>
    %cst_44 = arith.constant 1.000000e+00 : f32
    %52 = vector.broadcast %cst_44 : f32 to vector<8x128xf32>
    %53 = arith.addf %52, %51 : vector<8x128xf32>
    %54 = arith.divf %52, %53 : vector<8x128xf32>
    %55 = arith.mulf %46, %28 : vector<8x128xf32>
    %56 = arith.mulf %40, %48 : vector<8x128xf32>
    %57 = arith.addf %55, %56 : vector<8x128xf32>
    %58 = math.tanh %57 : vector<8x128xf32>
    %59 = arith.mulf %54, %58 : vector<8x128xf32>
    %60 = vector.broadcast %c0_i32 : i32 to vector<8x1xi32>
    %61 = arith.cmpi slt, %60, %8 : vector<8x1xi32>
    %62 = vector.shape_cast %61 : vector<8x1xi1> to vector<8x1xi1>
    %63 = vector.broadcast %62 : vector<8x1xi1> to vector<8x128xi1>
    %64 = arith.select %63, %59, %27 : vector<8x128xi1>, vector<8x128xf32>
    %c0_45 = arith.constant 0 : index
    %c0_46 = arith.constant 0 : index
    %65 = vector.load %arg12[%c0_45, %c0_46] : memref<8x128xf32, #tpu.memory_space<vmem>>, vector<8x128xf32>
    tpu.vector_store %arg12[%c0_45, %c0_46], %64 {strides = array<i32>} : memref<8x128xf32, #tpu.memory_space<vmem>>, vector<8x128xf32>,
    %66 = vector.shape_cast %61 : vector<8x1xi1> to vector<8x1xi1>
    %67 = vector.broadcast %66 : vector<8x1xi1> to vector<8x128xi1>
    %68 = arith.select %67, %57, %28 : vector<8x128xi1>, vector<8x128xf32>
    %c0_47 = arith.constant 0 : index
    %c0_48 = arith.constant 0 : index
    %69 = vector.load %arg13[%c0_47, %c0_48] : memref<8x128xf32, #tpu.memory_space<vmem>>, vector<8x128xf32>
    tpu.vector_store %arg13[%c0_47, %c0_48], %68 {strides = array<i32>} : memref<8x128xf32, #tpu.memory_space<vmem>>, vector<8x128xf32>,
    %cst_49 = arith.constant 0.000000e+00 : f32
    %70 = vector.shape_cast %61 : vector<8x1xi1> to vector<8x1xi1>
    %71 = vector.broadcast %70 : vector<8x1xi1> to vector<8x128xi1>
    %72 = vector.broadcast %cst_49 : f32 to vector<8x128xf32>
    %73 = arith.select %71, %59, %72 : vector<8x128xi1>, vector<8x128xf32>
    %74 = arith.index_cast %c0_i32 : i32 to index
    %c0_50 = arith.constant 0 : index
    %c0_51 = arith.constant 0 : index
    %75 = vector.load %arg18[%74, %c0_50, %c0_51] : memref<8x8x128xf32, #tpu.memory_space<vmem>>, vector<1x8x128xf32>
    %76 = vector.shape_cast %75 : vector<1x8x128xf32> to vector<8x128xf32>
    %77 = vector.shape_cast %73 : vector<8x128xf32> to vector<1x8x128xf32>
    tpu.vector_store %arg18[%74, %c0_50, %c0_51], %77 {strides = array<i32>} : memref<8x8x128xf32, #tpu.memory_space<vmem>>, vector<1x8x128xf32>,
    %c0_52 = arith.constant 0 : index
    %c0_53 = arith.constant 0 : index
    %78 = vector.load %arg14[%c0_52, %c0_53] : memref<8x128xf32, #tpu.memory_space<vmem>>, vector<8x128xf32>
    %c0_54 = arith.constant 0 : index
    %c0_55 = arith.constant 0 : index
    %79 = vector.load %arg15[%c0_54, %c0_55] : memref<8x128xf32, #tpu.memory_space<vmem>>, vector<8x128xf32>
    %80 = arith.index_cast %26 : i32 to index
    %c0_56 = arith.constant 0 : index
    %c0_57 = arith.constant 0 : index
    %81 = vector.load %arg17[%80, %c0_56, %c0_57] : memref<8x8x512xf32, #tpu.memory_space<vmem>>, vector<1x8x512xf32>
    %82 = vector.shape_cast %81 : vector<1x8x512xf32> to vector<8x512xf32>
    %83 = arith.truncf %78 : vector<8x128xf32> to vector<8x128xbf16>
    %cst_58 = arith.constant dense<0.000000e+00> : vector<8x512xf32>
    %84 = tpu.matmul %83, %25, %cst_58 {dimension_numbers = #tpu.dot_dimension_numbers<[1], [0], [0], [1], [0, 0, 1, 1], [], []>} : vector<8x128xbf16>, vector<128x512xbf16>, vector<8x512xf32> -> vector<8x512xf32>
    %85 = arith.addf %82, %84 : vector<8x512xf32>
    %86 = vector.extract_strided_slice %85 {offsets = [0, 0], sizes = [8, 128], strides = [1, 1]} : vector<8x512xf32> to vector<8x128xf32>
    %87 = arith.negf %86 : vector<8x128xf32>
    %88 = math.exp %87 : vector<8x128xf32>
    %cst_59 = arith.constant 1.000000e+00 : f32
    %89 = vector.broadcast %cst_59 : f32 to vector<8x128xf32>
    %90 = arith.addf %89, %88 : vector<8x128xf32>
    %91 = arith.divf %89, %90 : vector<8x128xf32>
    %92 = vector.extract_strided_slice %85 {offsets = [0, 128], sizes = [8, 128], strides = [1, 1]} : vector<8x512xf32> to vector<8x128xf32>
    %93 = arith.negf %92 : vector<8x128xf32>
    %94 = math.exp %93 : vector<8x128xf32>
    %cst_60 = arith.constant 1.000000e+00 : f32
    %95 = vector.broadcast %cst_60 : f32 to vector<8x128xf32>
    %96 = arith.addf %95, %94 : vector<8x128xf32>
    %97 = arith.divf %95, %96 : vector<8x128xf32>
    %98 = vector.extract_strided_slice %85 {offsets = [0, 256], sizes = [8, 128], strides = [1, 1]} : vector<8x512xf32> to vector<8x128xf32>
    %99 = math.tanh %98 : vector<8x128xf32>
    %100 = vector.extract_strided_slice %85 {offsets = [0, 384], sizes = [8, 128], strides = [1, 1]} : vector<8x512xf32> to vector<8x128xf32>
    %101 = arith.negf %100 : vector<8x128xf32>
    %102 = math.exp %101 : vector<8x128xf32>
    %cst_61 = arith.constant 1.000000e+00 : f32
    %103 = vector.broadcast %cst_61 : f32 to vector<8x128xf32>
    %104 = arith.addf %103, %102 : vector<8x128xf32>
    %105 = arith.divf %103, %104 : vector<8x128xf32>
    %106 = arith.mulf %97, %79 : vector<8x128xf32>
    %107 = arith.mulf %91, %99 : vector<8x128xf32>
    %108 = arith.addf %106, %107 : vector<8x128xf32>
    %109 = math.tanh %108 : vector<8x128xf32>
    %110 = arith.mulf %105, %109 : vector<8x128xf32>
    %111 = vector.broadcast %26 : i32 to vector<8x1xi32>
    %112 = arith.cmpi slt, %111, %8 : vector<8x1xi32>
    %113 = vector.shape_cast %112 : vector<8x1xi1> to vector<8x1xi1>
    %114 = vector.broadcast %113 : vector<8x1xi1> to vector<8x128xi1>
    %115 = arith.select %114, %110, %78 : vector<8x128xi1>, vector<8x128xf32>
    %c0_62 = arith.constant 0 : index
    %c0_63 = arith.constant 0 : index
    %116 = vector.load %arg14[%c0_62, %c0_63] : memref<8x128xf32, #tpu.memory_space<vmem>>, vector<8x128xf32>
    tpu.vector_store %arg14[%c0_62, %c0_63], %115 {strides = array<i32>} : memref<8x128xf32, #tpu.memory_space<vmem>>, vector<8x128xf32>,
    %117 = vector.shape_cast %112 : vector<8x1xi1> to vector<8x1xi1>
    %118 = vector.broadcast %117 : vector<8x1xi1> to vector<8x128xi1>
    %119 = arith.select %118, %108, %79 : vector<8x128xi1>, vector<8x128xf32>
    %c0_64 = arith.constant 0 : index
    %c0_65 = arith.constant 0 : index
    %120 = vector.load %arg15[%c0_64, %c0_65] : memref<8x128xf32, #tpu.memory_space<vmem>>, vector<8x128xf32>
    tpu.vector_store %arg15[%c0_64, %c0_65], %119 {strides = array<i32>} : memref<8x128xf32, #tpu.memory_space<vmem>>, vector<8x128xf32>,
    %cst_66 = arith.constant 0.000000e+00 : f32
    %121 = vector.shape_cast %112 : vector<8x1xi1> to vector<8x1xi1>
    %122 = vector.broadcast %121 : vector<8x1xi1> to vector<8x128xi1>
    %123 = vector.broadcast %cst_66 : f32 to vector<8x128xf32>
    %124 = arith.select %122, %110, %123 : vector<8x128xi1>, vector<8x128xf32>
    %125 = arith.index_cast %26 : i32 to index
    %c0_67 = arith.constant 0 : index
    %c0_68 = arith.constant 0 : index
    %126 = vector.load %arg19[%125, %c0_67, %c0_68] : memref<8x8x128xf32, #tpu.memory_space<vmem>>, vector<1x8x128xf32>
    %127 = vector.shape_cast %126 : vector<1x8x128xf32> to vector<8x128xf32>
    %128 = vector.shape_cast %124 : vector<8x128xf32> to vector<1x8x128xf32>
    tpu.vector_store %arg19[%125, %c0_67, %c0_68], %128 {strides = array<i32>} : memref<8x8x128xf32, #tpu.memory_space<vmem>>, vector<1x8x128xf32>,
    %c1_i32 = arith.constant 1 : i32
    %c7_i32_69 = arith.constant 7 : i32
    %129 = arith.subi %c7_i32_69, %c1_i32 : i32
    %c0_70 = arith.constant 0 : index
    %c0_71 = arith.constant 0 : index
    %130 = vector.load %arg12[%c0_70, %c0_71] : memref<8x128xf32, #tpu.memory_space<vmem>>, vector<8x128xf32>
    %c0_72 = arith.constant 0 : index
    %c0_73 = arith.constant 0 : index
    %131 = vector.load %arg13[%c0_72, %c0_73] : memref<8x128xf32, #tpu.memory_space<vmem>>, vector<8x128xf32>
    %132 = arith.index_cast %c1_i32 : i32 to index
    %c0_74 = arith.constant 0 : index
    %c0_75 = arith.constant 0 : index
    %133 = vector.load %arg16[%132, %c0_74, %c0_75] : memref<8x8x512xf32, #tpu.memory_space<vmem>>, vector<1x8x512xf32>
    %134 = vector.shape_cast %133 : vector<1x8x512xf32> to vector<8x512xf32>
    %135 = arith.truncf %130 : vector<8x128xf32> to vector<8x128xbf16>
    %cst_76 = arith.constant dense<0.000000e+00> : vector<8x512xf32>
    %136 = tpu.matmul %135, %24, %cst_76 {dimension_numbers = #tpu.dot_dimension_numbers<[1], [0], [0], [1], [0, 0, 1, 1], [], []>} : vector<8x128xbf16>, vector<128x512xbf16>, vector<8x512xf32> -> vector<8x512xf32>
    %137 = arith.addf %134, %136 : vector<8x512xf32>
    %138 = vector.extract_strided_slice %137 {offsets = [0, 0], sizes = [8, 128], strides = [1, 1]} : vector<8x512xf32> to vector<8x128xf32>
    %139 = arith.negf %138 : vector<8x128xf32>
    %140 = math.exp %139 : vector<8x128xf32>
    %cst_77 = arith.constant 1.000000e+00 : f32
    %141 = vector.broadcast %cst_77 : f32 to vector<8x128xf32>
    %142 = arith.addf %141, %140 : vector<8x128xf32>
    %143 = arith.divf %141, %142 : vector<8x128xf32>
    %144 = vector.extract_strided_slice %137 {offsets = [0, 128], sizes = [8, 128], strides = [1, 1]} : vector<8x512xf32> to vector<8x128xf32>
    %145 = arith.negf %144 : vector<8x128xf32>
    %146 = math.exp %145 : vector<8x128xf32>
    %cst_78 = arith.constant 1.000000e+00 : f32
    %147 = vector.broadcast %cst_78 : f32 to vector<8x128xf32>
    %148 = arith.addf %147, %146 : vector<8x128xf32>
    %149 = arith.divf %147, %148 : vector<8x128xf32>
    %150 = vector.extract_strided_slice %137 {offsets = [0, 256], sizes = [8, 128], strides = [1, 1]} : vector<8x512xf32> to vector<8x128xf32>
    %151 = math.tanh %150 : vector<8x128xf32>
    %152 = vector.extract_strided_slice %137 {offsets = [0, 384], sizes = [8, 128], strides = [1, 1]} : vector<8x512xf32> to vector<8x128xf32>
    %153 = arith.negf %152 : vector<8x128xf32>
    %154 = math.exp %153 : vector<8x128xf32>
    %cst_79 = arith.constant 1.000000e+00 : f32
    %155 = vector.broadcast %cst_79 : f32 to vector<8x128xf32>
    %156 = arith.addf %155, %154 : vector<8x128xf32>
    %157 = arith.divf %155, %156 : vector<8x128xf32>
    %158 = arith.mulf %149, %131 : vector<8x128xf32>
    %159 = arith.mulf %143, %151 : vector<8x128xf32>
    %160 = arith.addf %158, %159 : vector<8x128xf32>
    %161 = math.tanh %160 : vector<8x128xf32>
    %162 = arith.mulf %157, %161 : vector<8x128xf32>
    %163 = vector.broadcast %c1_i32 : i32 to vector<8x1xi32>
    %164 = arith.cmpi slt, %163, %8 : vector<8x1xi32>
    %165 = vector.shape_cast %164 : vector<8x1xi1> to vector<8x1xi1>
    %166 = vector.broadcast %165 : vector<8x1xi1> to vector<8x128xi1>
    %167 = arith.select %166, %162, %130 : vector<8x128xi1>, vector<8x128xf32>
    %c0_80 = arith.constant 0 : index
    %c0_81 = arith.constant 0 : index
    %168 = vector.load %arg12[%c0_80, %c0_81] : memref<8x128xf32, #tpu.memory_space<vmem>>, vector<8x128xf32>
    tpu.vector_store %arg12[%c0_80, %c0_81], %167 {strides = array<i32>} : memref<8x128xf32, #tpu.memory_space<vmem>>, vector<8x128xf32>,
    %169 = vector.shape_cast %164 : vector<8x1xi1> to vector<8x1xi1>
    %170 = vector.broadcast %169 : vector<8x1xi1> to vector<8x128xi1>
    %171 = arith.select %170, %160, %131 : vector<8x128xi1>, vector<8x128xf32>
    %c0_82 = arith.constant 0 : index
    %c0_83 = arith.constant 0 : index
    %172 = vector.load %arg13[%c0_82, %c0_83] : memref<8x128xf32, #tpu.memory_space<vmem>>, vector<8x128xf32>
    tpu.vector_store %arg13[%c0_82, %c0_83], %171 {strides = array<i32>} : memref<8x128xf32, #tpu.memory_space<vmem>>, vector<8x128xf32>,
    %cst_84 = arith.constant 0.000000e+00 : f32
    %173 = vector.shape_cast %164 : vector<8x1xi1> to vector<8x1xi1>
    %174 = vector.broadcast %173 : vector<8x1xi1> to vector<8x128xi1>
    %175 = vector.broadcast %cst_84 : f32 to vector<8x128xf32>
    %176 = arith.select %174, %162, %175 : vector<8x128xi1>, vector<8x128xf32>
    %177 = arith.index_cast %c1_i32 : i32 to index
    %c0_85 = arith.constant 0 : index
    %c0_86 = arith.constant 0 : index
    %178 = vector.load %arg18[%177, %c0_85, %c0_86] : memref<8x8x128xf32, #tpu.memory_space<vmem>>, vector<1x8x128xf32>
    %179 = vector.shape_cast %178 : vector<1x8x128xf32> to vector<8x128xf32>
    %180 = vector.shape_cast %176 : vector<8x128xf32> to vector<1x8x128xf32>
    tpu.vector_store %arg18[%177, %c0_85, %c0_86], %180 {strides = array<i32>} : memref<8x8x128xf32, #tpu.memory_space<vmem>>, vector<1x8x128xf32>,
    %c0_87 = arith.constant 0 : index
    %c0_88 = arith.constant 0 : index
    %181 = vector.load %arg14[%c0_87, %c0_88] : memref<8x128xf32, #tpu.memory_space<vmem>>, vector<8x128xf32>
    %c0_89 = arith.constant 0 : index
    %c0_90 = arith.constant 0 : index
    %182 = vector.load %arg15[%c0_89, %c0_90] : memref<8x128xf32, #tpu.memory_space<vmem>>, vector<8x128xf32>
    %183 = arith.index_cast %129 : i32 to index
    %c0_91 = arith.constant 0 : index
    %c0_92 = arith.constant 0 : index
    %184 = vector.load %arg17[%183, %c0_91, %c0_92] : memref<8x8x512xf32, #tpu.memory_space<vmem>>, vector<1x8x512xf32>
    %185 = vector.shape_cast %184 : vector<1x8x512xf32> to vector<8x512xf32>
    %186 = arith.truncf %181 : vector<8x128xf32> to vector<8x128xbf16>
    %cst_93 = arith.constant dense<0.000000e+00> : vector<8x512xf32>
    %187 = tpu.matmul %186, %25, %cst_93 {dimension_numbers = #tpu.dot_dimension_numbers<[1], [0], [0], [1], [0, 0, 1, 1], [], []>} : vector<8x128xbf16>, vector<128x512xbf16>, vector<8x512xf32> -> vector<8x512xf32>
    %188 = arith.addf %185, %187 : vector<8x512xf32>
    %189 = vector.extract_strided_slice %188 {offsets = [0, 0], sizes = [8, 128], strides = [1, 1]} : vector<8x512xf32> to vector<8x128xf32>
    %190 = arith.negf %189 : vector<8x128xf32>
    %191 = math.exp %190 : vector<8x128xf32>
    %cst_94 = arith.constant 1.000000e+00 : f32
    %192 = vector.broadcast %cst_94 : f32 to vector<8x128xf32>
    %193 = arith.addf %192, %191 : vector<8x128xf32>
    %194 = arith.divf %192, %193 : vector<8x128xf32>
    %195 = vector.extract_strided_slice %188 {offsets = [0, 128], sizes = [8, 128], strides = [1, 1]} : vector<8x512xf32> to vector<8x128xf32>
    %196 = arith.negf %195 : vector<8x128xf32>
    %197 = math.exp %196 : vector<8x128xf32>
    %cst_95 = arith.constant 1.000000e+00 : f32
    %198 = vector.broadcast %cst_95 : f32 to vector<8x128xf32>
    %199 = arith.addf %198, %197 : vector<8x128xf32>
    %200 = arith.divf %198, %199 : vector<8x128xf32>
    %201 = vector.extract_strided_slice %188 {offsets = [0, 256], sizes = [8, 128], strides = [1, 1]} : vector<8x512xf32> to vector<8x128xf32>
    %202 = math.tanh %201 : vector<8x128xf32>
    %203 = vector.extract_strided_slice %188 {offsets = [0, 384], sizes = [8, 128], strides = [1, 1]} : vector<8x512xf32> to vector<8x128xf32>
    %204 = arith.negf %203 : vector<8x128xf32>
    %205 = math.exp %204 : vector<8x128xf32>
    %cst_96 = arith.constant 1.000000e+00 : f32
    %206 = vector.broadcast %cst_96 : f32 to vector<8x128xf32>
    %207 = arith.addf %206, %205 : vector<8x128xf32>
    %208 = arith.divf %206, %207 : vector<8x128xf32>
    %209 = arith.mulf %200, %182 : vector<8x128xf32>
    %210 = arith.mulf %194, %202 : vector<8x128xf32>
    %211 = arith.addf %209, %210 : vector<8x128xf32>
    %212 = math.tanh %211 : vector<8x128xf32>
    %213 = arith.mulf %208, %212 : vector<8x128xf32>
    %214 = vector.broadcast %129 : i32 to vector<8x1xi32>
    %215 = arith.cmpi slt, %214, %8 : vector<8x1xi32>
    %216 = vector.shape_cast %215 : vector<8x1xi1> to vector<8x1xi1>
    %217 = vector.broadcast %216 : vector<8x1xi1> to vector<8x128xi1>
    %218 = arith.select %217, %213, %181 : vector<8x128xi1>, vector<8x128xf32>
    %c0_97 = arith.constant 0 : index
    %c0_98 = arith.constant 0 : index
    %219 = vector.load %arg14[%c0_97, %c0_98] : memref<8x128xf32, #tpu.memory_space<vmem>>, vector<8x128xf32>
    tpu.vector_store %arg14[%c0_97, %c0_98], %218 {strides = array<i32>} : memref<8x128xf32, #tpu.memory_space<vmem>>, vector<8x128xf32>,
    %220 = vector.shape_cast %215 : vector<8x1xi1> to vector<8x1xi1>
    %221 = vector.broadcast %220 : vector<8x1xi1> to vector<8x128xi1>
    %222 = arith.select %221, %211, %182 : vector<8x128xi1>, vector<8x128xf32>
    %c0_99 = arith.constant 0 : index
    %c0_100 = arith.constant 0 : index
    %223 = vector.load %arg15[%c0_99, %c0_100] : memref<8x128xf32, #tpu.memory_space<vmem>>, vector<8x128xf32>
    tpu.vector_store %arg15[%c0_99, %c0_100], %222 {strides = array<i32>} : memref<8x128xf32, #tpu.memory_space<vmem>>, vector<8x128xf32>,
    %cst_101 = arith.constant 0.000000e+00 : f32
    %224 = vector.shape_cast %215 : vector<8x1xi1> to vector<8x1xi1>
    %225 = vector.broadcast %224 : vector<8x1xi1> to vector<8x128xi1>
    %226 = vector.broadcast %cst_101 : f32 to vector<8x128xf32>
    %227 = arith.select %225, %213, %226 : vector<8x128xi1>, vector<8x128xf32>
    %228 = arith.index_cast %129 : i32 to index
    %c0_102 = arith.constant 0 : index
    %c0_103 = arith.constant 0 : index
    %229 = vector.load %arg19[%228, %c0_102, %c0_103] : memref<8x8x128xf32, #tpu.memory_space<vmem>>, vector<1x8x128xf32>
    %230 = vector.shape_cast %229 : vector<1x8x128xf32> to vector<8x128xf32>
    %231 = vector.shape_cast %227 : vector<8x128xf32> to vector<1x8x128xf32>
    tpu.vector_store %arg19[%228, %c0_102, %c0_103], %231 {strides = array<i32>} : memref<8x8x128xf32, #tpu.memory_space<vmem>>, vector<1x8x128xf32>,
    %c2_i32 = arith.constant 2 : i32
    %c7_i32_104 = arith.constant 7 : i32
    %232 = arith.subi %c7_i32_104, %c2_i32 : i32
    %c0_105 = arith.constant 0 : index
    %c0_106 = arith.constant 0 : index
    %233 = vector.load %arg12[%c0_105, %c0_106] : memref<8x128xf32, #tpu.memory_space<vmem>>, vector<8x128xf32>
    %c0_107 = arith.constant 0 : index
    %c0_108 = arith.constant 0 : index
    %234 = vector.load %arg13[%c0_107, %c0_108] : memref<8x128xf32, #tpu.memory_space<vmem>>, vector<8x128xf32>
    %235 = arith.index_cast %c2_i32 : i32 to index
    %c0_109 = arith.constant 0 : index
    %c0_110 = arith.constant 0 : index
    %236 = vector.load %arg16[%235, %c0_109, %c0_110] : memref<8x8x512xf32, #tpu.memory_space<vmem>>, vector<1x8x512xf32>
    %237 = vector.shape_cast %236 : vector<1x8x512xf32> to vector<8x512xf32>
    %238 = arith.truncf %233 : vector<8x128xf32> to vector<8x128xbf16>
    %cst_111 = arith.constant dense<0.000000e+00> : vector<8x512xf32>
    %239 = tpu.matmul %238, %24, %cst_111 {dimension_numbers = #tpu.dot_dimension_numbers<[1], [0], [0], [1], [0, 0, 1, 1], [], []>} : vector<8x128xbf16>, vector<128x512xbf16>, vector<8x512xf32> -> vector<8x512xf32>
    %240 = arith.addf %237, %239 : vector<8x512xf32>
    %241 = vector.extract_strided_slice %240 {offsets = [0, 0], sizes = [8, 128], strides = [1, 1]} : vector<8x512xf32> to vector<8x128xf32>
    %242 = arith.negf %241 : vector<8x128xf32>
    %243 = math.exp %242 : vector<8x128xf32>
    %cst_112 = arith.constant 1.000000e+00 : f32
    %244 = vector.broadcast %cst_112 : f32 to vector<8x128xf32>
    %245 = arith.addf %244, %243 : vector<8x128xf32>
    %246 = arith.divf %244, %245 : vector<8x128xf32>
    %247 = vector.extract_strided_slice %240 {offsets = [0, 128], sizes = [8, 128], strides = [1, 1]} : vector<8x512xf32> to vector<8x128xf32>
    %248 = arith.negf %247 : vector<8x128xf32>
    %249 = math.exp %248 : vector<8x128xf32>
    %cst_113 = arith.constant 1.000000e+00 : f32
    %250 = vector.broadcast %cst_113 : f32 to vector<8x128xf32>
    %251 = arith.addf %250, %249 : vector<8x128xf32>
    %252 = arith.divf %250, %251 : vector<8x128xf32>
    %253 = vector.extract_strided_slice %240 {offsets = [0, 256], sizes = [8, 128], strides = [1, 1]} : vector<8x512xf32> to vector<8x128xf32>
    %254 = math.tanh %253 : vector<8x128xf32>
    %255 = vector.extract_strided_slice %240 {offsets = [0, 384], sizes = [8, 128], strides = [1, 1]} : vector<8x512xf32> to vector<8x128xf32>
    %256 = arith.negf %255 : vector<8x128xf32>
    %257 = math.exp %256 : vector<8x128xf32>
    %cst_114 = arith.constant 1.000000e+00 : f32
    %258 = vector.broadcast %cst_114 : f32 to vector<8x128xf32>
    %259 = arith.addf %258, %257 : vector<8x128xf32>
    %260 = arith.divf %258, %259 : vector<8x128xf32>
    %261 = arith.mulf %252, %234 : vector<8x128xf32>
    %262 = arith.mulf %246, %254 : vector<8x128xf32>
    %263 = arith.addf %261, %262 : vector<8x128xf32>
    %264 = math.tanh %263 : vector<8x128xf32>
    %265 = arith.mulf %260, %264 : vector<8x128xf32>
    %266 = vector.broadcast %c2_i32 : i32 to vector<8x1xi32>
    %267 = arith.cmpi slt, %266, %8 : vector<8x1xi32>
    %268 = vector.shape_cast %267 : vector<8x1xi1> to vector<8x1xi1>
    %269 = vector.broadcast %268 : vector<8x1xi1> to vector<8x128xi1>
    %270 = arith.select %269, %265, %233 : vector<8x128xi1>, vector<8x128xf32>
    %c0_115 = arith.constant 0 : index
    %c0_116 = arith.constant 0 : index
    %271 = vector.load %arg12[%c0_115, %c0_116] : memref<8x128xf32, #tpu.memory_space<vmem>>, vector<8x128xf32>
    tpu.vector_store %arg12[%c0_115, %c0_116], %270 {strides = array<i32>} : memref<8x128xf32, #tpu.memory_space<vmem>>, vector<8x128xf32>,
    %272 = vector.shape_cast %267 : vector<8x1xi1> to vector<8x1xi1>
    %273 = vector.broadcast %272 : vector<8x1xi1> to vector<8x128xi1>
    %274 = arith.select %273, %263, %234 : vector<8x128xi1>, vector<8x128xf32>
    %c0_117 = arith.constant 0 : index
    %c0_118 = arith.constant 0 : index
    %275 = vector.load %arg13[%c0_117, %c0_118] : memref<8x128xf32, #tpu.memory_space<vmem>>, vector<8x128xf32>
    tpu.vector_store %arg13[%c0_117, %c0_118], %274 {strides = array<i32>} : memref<8x128xf32, #tpu.memory_space<vmem>>, vector<8x128xf32>,
    %cst_119 = arith.constant 0.000000e+00 : f32
    %276 = vector.shape_cast %267 : vector<8x1xi1> to vector<8x1xi1>
    %277 = vector.broadcast %276 : vector<8x1xi1> to vector<8x128xi1>
    %278 = vector.broadcast %cst_119 : f32 to vector<8x128xf32>
    %279 = arith.select %277, %265, %278 : vector<8x128xi1>, vector<8x128xf32>
    %280 = arith.index_cast %c2_i32 : i32 to index
    %c0_120 = arith.constant 0 : index
    %c0_121 = arith.constant 0 : index
    %281 = vector.load %arg18[%280, %c0_120, %c0_121] : memref<8x8x128xf32, #tpu.memory_space<vmem>>, vector<1x8x128xf32>
    %282 = vector.shape_cast %281 : vector<1x8x128xf32> to vector<8x128xf32>
    %283 = vector.shape_cast %279 : vector<8x128xf32> to vector<1x8x128xf32>
    tpu.vector_store %arg18[%280, %c0_120, %c0_121], %283 {strides = array<i32>} : memref<8x8x128xf32, #tpu.memory_space<vmem>>, vector<1x8x128xf32>,
    %c0_122 = arith.constant 0 : index
    %c0_123 = arith.constant 0 : index
    %284 = vector.load %arg14[%c0_122, %c0_123] : memref<8x128xf32, #tpu.memory_space<vmem>>, vector<8x128xf32>
    %c0_124 = arith.constant 0 : index
    %c0_125 = arith.constant 0 : index
    %285 = vector.load %arg15[%c0_124, %c0_125] : memref<8x128xf32, #tpu.memory_space<vmem>>, vector<8x128xf32>
    %286 = arith.index_cast %232 : i32 to index
    %c0_126 = arith.constant 0 : index
    %c0_127 = arith.constant 0 : index
    %287 = vector.load %arg17[%286, %c0_126, %c0_127] : memref<8x8x512xf32, #tpu.memory_space<vmem>>, vector<1x8x512xf32>
    %288 = vector.shape_cast %287 : vector<1x8x512xf32> to vector<8x512xf32>
    %289 = arith.truncf %284 : vector<8x128xf32> to vector<8x128xbf16>
    %cst_128 = arith.constant dense<0.000000e+00> : vector<8x512xf32>
    %290 = tpu.matmul %289, %25, %cst_128 {dimension_numbers = #tpu.dot_dimension_numbers<[1], [0], [0], [1], [0, 0, 1, 1], [], []>} : vector<8x128xbf16>, vector<128x512xbf16>, vector<8x512xf32> -> vector<8x512xf32>
    %291 = arith.addf %288, %290 : vector<8x512xf32>
    %292 = vector.extract_strided_slice %291 {offsets = [0, 0], sizes = [8, 128], strides = [1, 1]} : vector<8x512xf32> to vector<8x128xf32>
    %293 = arith.negf %292 : vector<8x128xf32>
    %294 = math.exp %293 : vector<8x128xf32>
    %cst_129 = arith.constant 1.000000e+00 : f32
    %295 = vector.broadcast %cst_129 : f32 to vector<8x128xf32>
    %296 = arith.addf %295, %294 : vector<8x128xf32>
    %297 = arith.divf %295, %296 : vector<8x128xf32>
    %298 = vector.extract_strided_slice %291 {offsets = [0, 128], sizes = [8, 128], strides = [1, 1]} : vector<8x512xf32> to vector<8x128xf32>
    %299 = arith.negf %298 : vector<8x128xf32>
    %300 = math.exp %299 : vector<8x128xf32>
    %cst_130 = arith.constant 1.000000e+00 : f32
    %301 = vector.broadcast %cst_130 : f32 to vector<8x128xf32>
    %302 = arith.addf %301, %300 : vector<8x128xf32>
    %303 = arith.divf %301, %302 : vector<8x128xf32>
    %304 = vector.extract_strided_slice %291 {offsets = [0, 256], sizes = [8, 128], strides = [1, 1]} : vector<8x512xf32> to vector<8x128xf32>
    %305 = math.tanh %304 : vector<8x128xf32>
    %306 = vector.extract_strided_slice %291 {offsets = [0, 384], sizes = [8, 128], strides = [1, 1]} : vector<8x512xf32> to vector<8x128xf32>
    %307 = arith.negf %306 : vector<8x128xf32>
    %308 = math.exp %307 : vector<8x128xf32>
    %cst_131 = arith.constant 1.000000e+00 : f32
    %309 = vector.broadcast %cst_131 : f32 to vector<8x128xf32>
    %310 = arith.addf %309, %308 : vector<8x128xf32>
    %311 = arith.divf %309, %310 : vector<8x128xf32>
    %312 = arith.mulf %303, %285 : vector<8x128xf32>
    %313 = arith.mulf %297, %305 : vector<8x128xf32>
    %314 = arith.addf %312, %313 : vector<8x128xf32>
    %315 = math.tanh %314 : vector<8x128xf32>
    %316 = arith.mulf %311, %315 : vector<8x128xf32>
    %317 = vector.broadcast %232 : i32 to vector<8x1xi32>
    %318 = arith.cmpi slt, %317, %8 : vector<8x1xi32>
    %319 = vector.shape_cast %318 : vector<8x1xi1> to vector<8x1xi1>
    %320 = vector.broadcast %319 : vector<8x1xi1> to vector<8x128xi1>
    %321 = arith.select %320, %316, %284 : vector<8x128xi1>, vector<8x128xf32>
    %c0_132 = arith.constant 0 : index
    %c0_133 = arith.constant 0 : index
    %322 = vector.load %arg14[%c0_132, %c0_133] : memref<8x128xf32, #tpu.memory_space<vmem>>, vector<8x128xf32>
    tpu.vector_store %arg14[%c0_132, %c0_133], %321 {strides = array<i32>} : memref<8x128xf32, #tpu.memory_space<vmem>>, vector<8x128xf32>,
    %323 = vector.shape_cast %318 : vector<8x1xi1> to vector<8x1xi1>
    %324 = vector.broadcast %323 : vector<8x1xi1> to vector<8x128xi1>
    %325 = arith.select %324, %314, %285 : vector<8x128xi1>, vector<8x128xf32>
    %c0_134 = arith.constant 0 : index
    %c0_135 = arith.constant 0 : index
    %326 = vector.load %arg15[%c0_134, %c0_135] : memref<8x128xf32, #tpu.memory_space<vmem>>, vector<8x128xf32>
    tpu.vector_store %arg15[%c0_134, %c0_135], %325 {strides = array<i32>} : memref<8x128xf32, #tpu.memory_space<vmem>>, vector<8x128xf32>,
    %cst_136 = arith.constant 0.000000e+00 : f32
    %327 = vector.shape_cast %318 : vector<8x1xi1> to vector<8x1xi1>
    %328 = vector.broadcast %327 : vector<8x1xi1> to vector<8x128xi1>
    %329 = vector.broadcast %cst_136 : f32 to vector<8x128xf32>
    %330 = arith.select %328, %316, %329 : vector<8x128xi1>, vector<8x128xf32>
    %331 = arith.index_cast %232 : i32 to index
    %c0_137 = arith.constant 0 : index
    %c0_138 = arith.constant 0 : index
    %332 = vector.load %arg19[%331, %c0_137, %c0_138] : memref<8x8x128xf32, #tpu.memory_space<vmem>>, vector<1x8x128xf32>
    %333 = vector.shape_cast %332 : vector<1x8x128xf32> to vector<8x128xf32>
    %334 = vector.shape_cast %330 : vector<8x128xf32> to vector<1x8x128xf32>
    tpu.vector_store %arg19[%331, %c0_137, %c0_138], %334 {strides = array<i32>} : memref<8x8x128xf32, #tpu.memory_space<vmem>>, vector<1x8x128xf32>,
    %c3_i32 = arith.constant 3 : i32
    %c7_i32_139 = arith.constant 7 : i32
    %335 = arith.subi %c7_i32_139, %c3_i32 : i32
    %c0_140 = arith.constant 0 : index
    %c0_141 = arith.constant 0 : index
    %336 = vector.load %arg12[%c0_140, %c0_141] : memref<8x128xf32, #tpu.memory_space<vmem>>, vector<8x128xf32>
    %c0_142 = arith.constant 0 : index
    %c0_143 = arith.constant 0 : index
    %337 = vector.load %arg13[%c0_142, %c0_143] : memref<8x128xf32, #tpu.memory_space<vmem>>, vector<8x128xf32>
    %338 = arith.index_cast %c3_i32 : i32 to index
    %c0_144 = arith.constant 0 : index
    %c0_145 = arith.constant 0 : index
    %339 = vector.load %arg16[%338, %c0_144, %c0_145] : memref<8x8x512xf32, #tpu.memory_space<vmem>>, vector<1x8x512xf32>
    %340 = vector.shape_cast %339 : vector<1x8x512xf32> to vector<8x512xf32>
    %341 = arith.truncf %336 : vector<8x128xf32> to vector<8x128xbf16>
    %cst_146 = arith.constant dense<0.000000e+00> : vector<8x512xf32>
    %342 = tpu.matmul %341, %24, %cst_146 {dimension_numbers = #tpu.dot_dimension_numbers<[1], [0], [0], [1], [0, 0, 1, 1], [], []>} : vector<8x128xbf16>, vector<128x512xbf16>, vector<8x512xf32> -> vector<8x512xf32>
    %343 = arith.addf %340, %342 : vector<8x512xf32>
    %344 = vector.extract_strided_slice %343 {offsets = [0, 0], sizes = [8, 128], strides = [1, 1]} : vector<8x512xf32> to vector<8x128xf32>
    %345 = arith.negf %344 : vector<8x128xf32>
    %346 = math.exp %345 : vector<8x128xf32>
    %cst_147 = arith.constant 1.000000e+00 : f32
    %347 = vector.broadcast %cst_147 : f32 to vector<8x128xf32>
    %348 = arith.addf %347, %346 : vector<8x128xf32>
    %349 = arith.divf %347, %348 : vector<8x128xf32>
    %350 = vector.extract_strided_slice %343 {offsets = [0, 128], sizes = [8, 128], strides = [1, 1]} : vector<8x512xf32> to vector<8x128xf32>
    %351 = arith.negf %350 : vector<8x128xf32>
    %352 = math.exp %351 : vector<8x128xf32>
    %cst_148 = arith.constant 1.000000e+00 : f32
    %353 = vector.broadcast %cst_148 : f32 to vector<8x128xf32>
    %354 = arith.addf %353, %352 : vector<8x128xf32>
    %355 = arith.divf %353, %354 : vector<8x128xf32>
    %356 = vector.extract_strided_slice %343 {offsets = [0, 256], sizes = [8, 128], strides = [1, 1]} : vector<8x512xf32> to vector<8x128xf32>
    %357 = math.tanh %356 : vector<8x128xf32>
    %358 = vector.extract_strided_slice %343 {offsets = [0, 384], sizes = [8, 128], strides = [1, 1]} : vector<8x512xf32> to vector<8x128xf32>
    %359 = arith.negf %358 : vector<8x128xf32>
    %360 = math.exp %359 : vector<8x128xf32>
    %cst_149 = arith.constant 1.000000e+00 : f32
    %361 = vector.broadcast %cst_149 : f32 to vector<8x128xf32>
    %362 = arith.addf %361, %360 : vector<8x128xf32>
    %363 = arith.divf %361, %362 : vector<8x128xf32>
    %364 = arith.mulf %355, %337 : vector<8x128xf32>
    %365 = arith.mulf %349, %357 : vector<8x128xf32>
    %366 = arith.addf %364, %365 : vector<8x128xf32>
    %367 = math.tanh %366 : vector<8x128xf32>
    %368 = arith.mulf %363, %367 : vector<8x128xf32>
    %369 = vector.broadcast %c3_i32 : i32 to vector<8x1xi32>
    %370 = arith.cmpi slt, %369, %8 : vector<8x1xi32>
    %371 = vector.shape_cast %370 : vector<8x1xi1> to vector<8x1xi1>
    %372 = vector.broadcast %371 : vector<8x1xi1> to vector<8x128xi1>
    %373 = arith.select %372, %368, %336 : vector<8x128xi1>, vector<8x128xf32>
    %c0_150 = arith.constant 0 : index
    %c0_151 = arith.constant 0 : index
    %374 = vector.load %arg12[%c0_150, %c0_151] : memref<8x128xf32, #tpu.memory_space<vmem>>, vector<8x128xf32>
    tpu.vector_store %arg12[%c0_150, %c0_151], %373 {strides = array<i32>} : memref<8x128xf32, #tpu.memory_space<vmem>>, vector<8x128xf32>,
    %375 = vector.shape_cast %370 : vector<8x1xi1> to vector<8x1xi1>
    %376 = vector.broadcast %375 : vector<8x1xi1> to vector<8x128xi1>
    %377 = arith.select %376, %366, %337 : vector<8x128xi1>, vector<8x128xf32>
    %c0_152 = arith.constant 0 : index
    %c0_153 = arith.constant 0 : index
    %378 = vector.load %arg13[%c0_152, %c0_153] : memref<8x128xf32, #tpu.memory_space<vmem>>, vector<8x128xf32>
    tpu.vector_store %arg13[%c0_152, %c0_153], %377 {strides = array<i32>} : memref<8x128xf32, #tpu.memory_space<vmem>>, vector<8x128xf32>,
    %cst_154 = arith.constant 0.000000e+00 : f32
    %379 = vector.shape_cast %370 : vector<8x1xi1> to vector<8x1xi1>
    %380 = vector.broadcast %379 : vector<8x1xi1> to vector<8x128xi1>
    %381 = vector.broadcast %cst_154 : f32 to vector<8x128xf32>
    %382 = arith.select %380, %368, %381 : vector<8x128xi1>, vector<8x128xf32>
    %383 = arith.index_cast %c3_i32 : i32 to index
    %c0_155 = arith.constant 0 : index
    %c0_156 = arith.constant 0 : index
    %384 = vector.load %arg18[%383, %c0_155, %c0_156] : memref<8x8x128xf32, #tpu.memory_space<vmem>>, vector<1x8x128xf32>
    %385 = vector.shape_cast %384 : vector<1x8x128xf32> to vector<8x128xf32>
    %386 = vector.shape_cast %382 : vector<8x128xf32> to vector<1x8x128xf32>
    tpu.vector_store %arg18[%383, %c0_155, %c0_156], %386 {strides = array<i32>} : memref<8x8x128xf32, #tpu.memory_space<vmem>>, vector<1x8x128xf32>,
    %c0_157 = arith.constant 0 : index
    %c0_158 = arith.constant 0 : index
    %387 = vector.load %arg14[%c0_157, %c0_158] : memref<8x128xf32, #tpu.memory_space<vmem>>, vector<8x128xf32>
    %c0_159 = arith.constant 0 : index
    %c0_160 = arith.constant 0 : index
    %388 = vector.load %arg15[%c0_159, %c0_160] : memref<8x128xf32, #tpu.memory_space<vmem>>, vector<8x128xf32>
    %389 = arith.index_cast %335 : i32 to index
    %c0_161 = arith.constant 0 : index
    %c0_162 = arith.constant 0 : index
    %390 = vector.load %arg17[%389, %c0_161, %c0_162] : memref<8x8x512xf32, #tpu.memory_space<vmem>>, vector<1x8x512xf32>
    %391 = vector.shape_cast %390 : vector<1x8x512xf32> to vector<8x512xf32>
    %392 = arith.truncf %387 : vector<8x128xf32> to vector<8x128xbf16>
    %cst_163 = arith.constant dense<0.000000e+00> : vector<8x512xf32>
    %393 = tpu.matmul %392, %25, %cst_163 {dimension_numbers = #tpu.dot_dimension_numbers<[1], [0], [0], [1], [0, 0, 1, 1], [], []>} : vector<8x128xbf16>, vector<128x512xbf16>, vector<8x512xf32> -> vector<8x512xf32>
    %394 = arith.addf %391, %393 : vector<8x512xf32>
    %395 = vector.extract_strided_slice %394 {offsets = [0, 0], sizes = [8, 128], strides = [1, 1]} : vector<8x512xf32> to vector<8x128xf32>
    %396 = arith.negf %395 : vector<8x128xf32>
    %397 = math.exp %396 : vector<8x128xf32>
    %cst_164 = arith.constant 1.000000e+00 : f32
    %398 = vector.broadcast %cst_164 : f32 to vector<8x128xf32>
    %399 = arith.addf %398, %397 : vector<8x128xf32>
    %400 = arith.divf %398, %399 : vector<8x128xf32>
    %401 = vector.extract_strided_slice %394 {offsets = [0, 128], sizes = [8, 128], strides = [1, 1]} : vector<8x512xf32> to vector<8x128xf32>
    %402 = arith.negf %401 : vector<8x128xf32>
    %403 = math.exp %402 : vector<8x128xf32>
    %cst_165 = arith.constant 1.000000e+00 : f32
    %404 = vector.broadcast %cst_165 : f32 to vector<8x128xf32>
    %405 = arith.addf %404, %403 : vector<8x128xf32>
    %406 = arith.divf %404, %405 : vector<8x128xf32>
    %407 = vector.extract_strided_slice %394 {offsets = [0, 256], sizes = [8, 128], strides = [1, 1]} : vector<8x512xf32> to vector<8x128xf32>
    %408 = math.tanh %407 : vector<8x128xf32>
    %409 = vector.extract_strided_slice %394 {offsets = [0, 384], sizes = [8, 128], strides = [1, 1]} : vector<8x512xf32> to vector<8x128xf32>
    %410 = arith.negf %409 : vector<8x128xf32>
    %411 = math.exp %410 : vector<8x128xf32>
    %cst_166 = arith.constant 1.000000e+00 : f32
    %412 = vector.broadcast %cst_166 : f32 to vector<8x128xf32>
    %413 = arith.addf %412, %411 : vector<8x128xf32>
    %414 = arith.divf %412, %413 : vector<8x128xf32>
    %415 = arith.mulf %406, %388 : vector<8x128xf32>
    %416 = arith.mulf %400, %408 : vector<8x128xf32>
    %417 = arith.addf %415, %416 : vector<8x128xf32>
    %418 = math.tanh %417 : vector<8x128xf32>
    %419 = arith.mulf %414, %418 : vector<8x128xf32>
    %420 = vector.broadcast %335 : i32 to vector<8x1xi32>
    %421 = arith.cmpi slt, %420, %8 : vector<8x1xi32>
    %422 = vector.shape_cast %421 : vector<8x1xi1> to vector<8x1xi1>
    %423 = vector.broadcast %422 : vector<8x1xi1> to vector<8x128xi1>
    %424 = arith.select %423, %419, %387 : vector<8x128xi1>, vector<8x128xf32>
    %c0_167 = arith.constant 0 : index
    %c0_168 = arith.constant 0 : index
    %425 = vector.load %arg14[%c0_167, %c0_168] : memref<8x128xf32, #tpu.memory_space<vmem>>, vector<8x128xf32>
    tpu.vector_store %arg14[%c0_167, %c0_168], %424 {strides = array<i32>} : memref<8x128xf32, #tpu.memory_space<vmem>>, vector<8x128xf32>,
    %426 = vector.shape_cast %421 : vector<8x1xi1> to vector<8x1xi1>
    %427 = vector.broadcast %426 : vector<8x1xi1> to vector<8x128xi1>
    %428 = arith.select %427, %417, %388 : vector<8x128xi1>, vector<8x128xf32>
    %c0_169 = arith.constant 0 : index
    %c0_170 = arith.constant 0 : index
    %429 = vector.load %arg15[%c0_169, %c0_170] : memref<8x128xf32, #tpu.memory_space<vmem>>, vector<8x128xf32>
    tpu.vector_store %arg15[%c0_169, %c0_170], %428 {strides = array<i32>} : memref<8x128xf32, #tpu.memory_space<vmem>>, vector<8x128xf32>,
    %cst_171 = arith.constant 0.000000e+00 : f32
    %430 = vector.shape_cast %421 : vector<8x1xi1> to vector<8x1xi1>
    %431 = vector.broadcast %430 : vector<8x1xi1> to vector<8x128xi1>
    %432 = vector.broadcast %cst_171 : f32 to vector<8x128xf32>
    %433 = arith.select %431, %419, %432 : vector<8x128xi1>, vector<8x128xf32>
    %434 = arith.index_cast %335 : i32 to index
    %c0_172 = arith.constant 0 : index
    %c0_173 = arith.constant 0 : index
    %435 = vector.load %arg19[%434, %c0_172, %c0_173] : memref<8x8x128xf32, #tpu.memory_space<vmem>>, vector<1x8x128xf32>
    %436 = vector.shape_cast %435 : vector<1x8x128xf32> to vector<8x128xf32>
    %437 = vector.shape_cast %433 : vector<8x128xf32> to vector<1x8x128xf32>
    tpu.vector_store %arg19[%434, %c0_172, %c0_173], %437 {strides = array<i32>} : memref<8x8x128xf32, #tpu.memory_space<vmem>>, vector<1x8x128xf32>,
    %c4_i32 = arith.constant 4 : i32
    %c7_i32_174 = arith.constant 7 : i32
    %438 = arith.subi %c7_i32_174, %c4_i32 : i32
    %c0_175 = arith.constant 0 : index
    %c0_176 = arith.constant 0 : index
    %439 = vector.load %arg12[%c0_175, %c0_176] : memref<8x128xf32, #tpu.memory_space<vmem>>, vector<8x128xf32>
    %c0_177 = arith.constant 0 : index
    %c0_178 = arith.constant 0 : index
    %440 = vector.load %arg13[%c0_177, %c0_178] : memref<8x128xf32, #tpu.memory_space<vmem>>, vector<8x128xf32>
    %441 = arith.index_cast %c4_i32 : i32 to index
    %c0_179 = arith.constant 0 : index
    %c0_180 = arith.constant 0 : index
    %442 = vector.load %arg16[%441, %c0_179, %c0_180] : memref<8x8x512xf32, #tpu.memory_space<vmem>>, vector<1x8x512xf32>
    %443 = vector.shape_cast %442 : vector<1x8x512xf32> to vector<8x512xf32>
    %444 = arith.truncf %439 : vector<8x128xf32> to vector<8x128xbf16>
    %cst_181 = arith.constant dense<0.000000e+00> : vector<8x512xf32>
    %445 = tpu.matmul %444, %24, %cst_181 {dimension_numbers = #tpu.dot_dimension_numbers<[1], [0], [0], [1], [0, 0, 1, 1], [], []>} : vector<8x128xbf16>, vector<128x512xbf16>, vector<8x512xf32> -> vector<8x512xf32>
    %446 = arith.addf %443, %445 : vector<8x512xf32>
    %447 = vector.extract_strided_slice %446 {offsets = [0, 0], sizes = [8, 128], strides = [1, 1]} : vector<8x512xf32> to vector<8x128xf32>
    %448 = arith.negf %447 : vector<8x128xf32>
    %449 = math.exp %448 : vector<8x128xf32>
    %cst_182 = arith.constant 1.000000e+00 : f32
    %450 = vector.broadcast %cst_182 : f32 to vector<8x128xf32>
    %451 = arith.addf %450, %449 : vector<8x128xf32>
    %452 = arith.divf %450, %451 : vector<8x128xf32>
    %453 = vector.extract_strided_slice %446 {offsets = [0, 128], sizes = [8, 128], strides = [1, 1]} : vector<8x512xf32> to vector<8x128xf32>
    %454 = arith.negf %453 : vector<8x128xf32>
    %455 = math.exp %454 : vector<8x128xf32>
    %cst_183 = arith.constant 1.000000e+00 : f32
    %456 = vector.broadcast %cst_183 : f32 to vector<8x128xf32>
    %457 = arith.addf %456, %455 : vector<8x128xf32>
    %458 = arith.divf %456, %457 : vector<8x128xf32>
    %459 = vector.extract_strided_slice %446 {offsets = [0, 256], sizes = [8, 128], strides = [1, 1]} : vector<8x512xf32> to vector<8x128xf32>
    %460 = math.tanh %459 : vector<8x128xf32>
    %461 = vector.extract_strided_slice %446 {offsets = [0, 384], sizes = [8, 128], strides = [1, 1]} : vector<8x512xf32> to vector<8x128xf32>
    %462 = arith.negf %461 : vector<8x128xf32>
    %463 = math.exp %462 : vector<8x128xf32>
    %cst_184 = arith.constant 1.000000e+00 : f32
    %464 = vector.broadcast %cst_184 : f32 to vector<8x128xf32>
    %465 = arith.addf %464, %463 : vector<8x128xf32>
    %466 = arith.divf %464, %465 : vector<8x128xf32>
    %467 = arith.mulf %458, %440 : vector<8x128xf32>
    %468 = arith.mulf %452, %460 : vector<8x128xf32>
    %469 = arith.addf %467, %468 : vector<8x128xf32>
    %470 = math.tanh %469 : vector<8x128xf32>
    %471 = arith.mulf %466, %470 : vector<8x128xf32>
    %472 = vector.broadcast %c4_i32 : i32 to vector<8x1xi32>
    %473 = arith.cmpi slt, %472, %8 : vector<8x1xi32>
    %474 = vector.shape_cast %473 : vector<8x1xi1> to vector<8x1xi1>
    %475 = vector.broadcast %474 : vector<8x1xi1> to vector<8x128xi1>
    %476 = arith.select %475, %471, %439 : vector<8x128xi1>, vector<8x128xf32>
    %c0_185 = arith.constant 0 : index
    %c0_186 = arith.constant 0 : index
    %477 = vector.load %arg12[%c0_185, %c0_186] : memref<8x128xf32, #tpu.memory_space<vmem>>, vector<8x128xf32>
    tpu.vector_store %arg12[%c0_185, %c0_186], %476 {strides = array<i32>} : memref<8x128xf32, #tpu.memory_space<vmem>>, vector<8x128xf32>,
    %478 = vector.shape_cast %473 : vector<8x1xi1> to vector<8x1xi1>
    %479 = vector.broadcast %478 : vector<8x1xi1> to vector<8x128xi1>
    %480 = arith.select %479, %469, %440 : vector<8x128xi1>, vector<8x128xf32>
    %c0_187 = arith.constant 0 : index
    %c0_188 = arith.constant 0 : index
    %481 = vector.load %arg13[%c0_187, %c0_188] : memref<8x128xf32, #tpu.memory_space<vmem>>, vector<8x128xf32>
    tpu.vector_store %arg13[%c0_187, %c0_188], %480 {strides = array<i32>} : memref<8x128xf32, #tpu.memory_space<vmem>>, vector<8x128xf32>,
    %cst_189 = arith.constant 0.000000e+00 : f32
    %482 = vector.shape_cast %473 : vector<8x1xi1> to vector<8x1xi1>
    %483 = vector.broadcast %482 : vector<8x1xi1> to vector<8x128xi1>
    %484 = vector.broadcast %cst_189 : f32 to vector<8x128xf32>
    %485 = arith.select %483, %471, %484 : vector<8x128xi1>, vector<8x128xf32>
    %486 = arith.index_cast %c4_i32 : i32 to index
    %c0_190 = arith.constant 0 : index
    %c0_191 = arith.constant 0 : index
    %487 = vector.load %arg18[%486, %c0_190, %c0_191] : memref<8x8x128xf32, #tpu.memory_space<vmem>>, vector<1x8x128xf32>
    %488 = vector.shape_cast %487 : vector<1x8x128xf32> to vector<8x128xf32>
    %489 = vector.shape_cast %485 : vector<8x128xf32> to vector<1x8x128xf32>
    tpu.vector_store %arg18[%486, %c0_190, %c0_191], %489 {strides = array<i32>} : memref<8x8x128xf32, #tpu.memory_space<vmem>>, vector<1x8x128xf32>,
    %c0_192 = arith.constant 0 : index
    %c0_193 = arith.constant 0 : index
    %490 = vector.load %arg14[%c0_192, %c0_193] : memref<8x128xf32, #tpu.memory_space<vmem>>, vector<8x128xf32>
    %c0_194 = arith.constant 0 : index
    %c0_195 = arith.constant 0 : index
    %491 = vector.load %arg15[%c0_194, %c0_195] : memref<8x128xf32, #tpu.memory_space<vmem>>, vector<8x128xf32>
    %492 = arith.index_cast %438 : i32 to index
    %c0_196 = arith.constant 0 : index
    %c0_197 = arith.constant 0 : index
    %493 = vector.load %arg17[%492, %c0_196, %c0_197] : memref<8x8x512xf32, #tpu.memory_space<vmem>>, vector<1x8x512xf32>
    %494 = vector.shape_cast %493 : vector<1x8x512xf32> to vector<8x512xf32>
    %495 = arith.truncf %490 : vector<8x128xf32> to vector<8x128xbf16>
    %cst_198 = arith.constant dense<0.000000e+00> : vector<8x512xf32>
    %496 = tpu.matmul %495, %25, %cst_198 {dimension_numbers = #tpu.dot_dimension_numbers<[1], [0], [0], [1], [0, 0, 1, 1], [], []>} : vector<8x128xbf16>, vector<128x512xbf16>, vector<8x512xf32> -> vector<8x512xf32>
    %497 = arith.addf %494, %496 : vector<8x512xf32>
    %498 = vector.extract_strided_slice %497 {offsets = [0, 0], sizes = [8, 128], strides = [1, 1]} : vector<8x512xf32> to vector<8x128xf32>
    %499 = arith.negf %498 : vector<8x128xf32>
    %500 = math.exp %499 : vector<8x128xf32>
    %cst_199 = arith.constant 1.000000e+00 : f32
    %501 = vector.broadcast %cst_199 : f32 to vector<8x128xf32>
    %502 = arith.addf %501, %500 : vector<8x128xf32>
    %503 = arith.divf %501, %502 : vector<8x128xf32>
    %504 = vector.extract_strided_slice %497 {offsets = [0, 128], sizes = [8, 128], strides = [1, 1]} : vector<8x512xf32> to vector<8x128xf32>
    %505 = arith.negf %504 : vector<8x128xf32>
    %506 = math.exp %505 : vector<8x128xf32>
    %cst_200 = arith.constant 1.000000e+00 : f32
    %507 = vector.broadcast %cst_200 : f32 to vector<8x128xf32>
    %508 = arith.addf %507, %506 : vector<8x128xf32>
    %509 = arith.divf %507, %508 : vector<8x128xf32>
    %510 = vector.extract_strided_slice %497 {offsets = [0, 256], sizes = [8, 128], strides = [1, 1]} : vector<8x512xf32> to vector<8x128xf32>
    %511 = math.tanh %510 : vector<8x128xf32>
    %512 = vector.extract_strided_slice %497 {offsets = [0, 384], sizes = [8, 128], strides = [1, 1]} : vector<8x512xf32> to vector<8x128xf32>
    %513 = arith.negf %512 : vector<8x128xf32>
    %514 = math.exp %513 : vector<8x128xf32>
    %cst_201 = arith.constant 1.000000e+00 : f32
    %515 = vector.broadcast %cst_201 : f32 to vector<8x128xf32>
    %516 = arith.addf %515, %514 : vector<8x128xf32>
    %517 = arith.divf %515, %516 : vector<8x128xf32>
    %518 = arith.mulf %509, %491 : vector<8x128xf32>
    %519 = arith.mulf %503, %511 : vector<8x128xf32>
    %520 = arith.addf %518, %519 : vector<8x128xf32>
    %521 = math.tanh %520 : vector<8x128xf32>
    %522 = arith.mulf %517, %521 : vector<8x128xf32>
    %523 = vector.broadcast %438 : i32 to vector<8x1xi32>
    %524 = arith.cmpi slt, %523, %8 : vector<8x1xi32>
    %525 = vector.shape_cast %524 : vector<8x1xi1> to vector<8x1xi1>
    %526 = vector.broadcast %525 : vector<8x1xi1> to vector<8x128xi1>
    %527 = arith.select %526, %522, %490 : vector<8x128xi1>, vector<8x128xf32>
    %c0_202 = arith.constant 0 : index
    %c0_203 = arith.constant 0 : index
    %528 = vector.load %arg14[%c0_202, %c0_203] : memref<8x128xf32, #tpu.memory_space<vmem>>, vector<8x128xf32>
    tpu.vector_store %arg14[%c0_202, %c0_203], %527 {strides = array<i32>} : memref<8x128xf32, #tpu.memory_space<vmem>>, vector<8x128xf32>,
    %529 = vector.shape_cast %524 : vector<8x1xi1> to vector<8x1xi1>
    %530 = vector.broadcast %529 : vector<8x1xi1> to vector<8x128xi1>
    %531 = arith.select %530, %520, %491 : vector<8x128xi1>, vector<8x128xf32>
    %c0_204 = arith.constant 0 : index
    %c0_205 = arith.constant 0 : index
    %532 = vector.load %arg15[%c0_204, %c0_205] : memref<8x128xf32, #tpu.memory_space<vmem>>, vector<8x128xf32>
    tpu.vector_store %arg15[%c0_204, %c0_205], %531 {strides = array<i32>} : memref<8x128xf32, #tpu.memory_space<vmem>>, vector<8x128xf32>,
    %cst_206 = arith.constant 0.000000e+00 : f32
    %533 = vector.shape_cast %524 : vector<8x1xi1> to vector<8x1xi1>
    %534 = vector.broadcast %533 : vector<8x1xi1> to vector<8x128xi1>
    %535 = vector.broadcast %cst_206 : f32 to vector<8x128xf32>
    %536 = arith.select %534, %522, %535 : vector<8x128xi1>, vector<8x128xf32>
    %537 = arith.index_cast %438 : i32 to index
    %c0_207 = arith.constant 0 : index
    %c0_208 = arith.constant 0 : index
    %538 = vector.load %arg19[%537, %c0_207, %c0_208] : memref<8x8x128xf32, #tpu.memory_space<vmem>>, vector<1x8x128xf32>
    %539 = vector.shape_cast %538 : vector<1x8x128xf32> to vector<8x128xf32>
    %540 = vector.shape_cast %536 : vector<8x128xf32> to vector<1x8x128xf32>
    tpu.vector_store %arg19[%537, %c0_207, %c0_208], %540 {strides = array<i32>} : memref<8x8x128xf32, #tpu.memory_space<vmem>>, vector<1x8x128xf32>,
    %c5_i32 = arith.constant 5 : i32
    %c7_i32_209 = arith.constant 7 : i32
    %541 = arith.subi %c7_i32_209, %c5_i32 : i32
    %c0_210 = arith.constant 0 : index
    %c0_211 = arith.constant 0 : index
    %542 = vector.load %arg12[%c0_210, %c0_211] : memref<8x128xf32, #tpu.memory_space<vmem>>, vector<8x128xf32>
    %c0_212 = arith.constant 0 : index
    %c0_213 = arith.constant 0 : index
    %543 = vector.load %arg13[%c0_212, %c0_213] : memref<8x128xf32, #tpu.memory_space<vmem>>, vector<8x128xf32>
    %544 = arith.index_cast %c5_i32 : i32 to index
    %c0_214 = arith.constant 0 : index
    %c0_215 = arith.constant 0 : index
    %545 = vector.load %arg16[%544, %c0_214, %c0_215] : memref<8x8x512xf32, #tpu.memory_space<vmem>>, vector<1x8x512xf32>
    %546 = vector.shape_cast %545 : vector<1x8x512xf32> to vector<8x512xf32>
    %547 = arith.truncf %542 : vector<8x128xf32> to vector<8x128xbf16>
    %cst_216 = arith.constant dense<0.000000e+00> : vector<8x512xf32>
    %548 = tpu.matmul %547, %24, %cst_216 {dimension_numbers = #tpu.dot_dimension_numbers<[1], [0], [0], [1], [0, 0, 1, 1], [], []>} : vector<8x128xbf16>, vector<128x512xbf16>, vector<8x512xf32> -> vector<8x512xf32>
    %549 = arith.addf %546, %548 : vector<8x512xf32>
    %550 = vector.extract_strided_slice %549 {offsets = [0, 0], sizes = [8, 128], strides = [1, 1]} : vector<8x512xf32> to vector<8x128xf32>
    %551 = arith.negf %550 : vector<8x128xf32>
    %552 = math.exp %551 : vector<8x128xf32>
    %cst_217 = arith.constant 1.000000e+00 : f32
    %553 = vector.broadcast %cst_217 : f32 to vector<8x128xf32>
    %554 = arith.addf %553, %552 : vector<8x128xf32>
    %555 = arith.divf %553, %554 : vector<8x128xf32>
    %556 = vector.extract_strided_slice %549 {offsets = [0, 128], sizes = [8, 128], strides = [1, 1]} : vector<8x512xf32> to vector<8x128xf32>
    %557 = arith.negf %556 : vector<8x128xf32>
    %558 = math.exp %557 : vector<8x128xf32>
    %cst_218 = arith.constant 1.000000e+00 : f32
    %559 = vector.broadcast %cst_218 : f32 to vector<8x128xf32>
    %560 = arith.addf %559, %558 : vector<8x128xf32>
    %561 = arith.divf %559, %560 : vector<8x128xf32>
    %562 = vector.extract_strided_slice %549 {offsets = [0, 256], sizes = [8, 128], strides = [1, 1]} : vector<8x512xf32> to vector<8x128xf32>
    %563 = math.tanh %562 : vector<8x128xf32>
    %564 = vector.extract_strided_slice %549 {offsets = [0, 384], sizes = [8, 128], strides = [1, 1]} : vector<8x512xf32> to vector<8x128xf32>
    %565 = arith.negf %564 : vector<8x128xf32>
    %566 = math.exp %565 : vector<8x128xf32>
    %cst_219 = arith.constant 1.000000e+00 : f32
    %567 = vector.broadcast %cst_219 : f32 to vector<8x128xf32>
    %568 = arith.addf %567, %566 : vector<8x128xf32>
    %569 = arith.divf %567, %568 : vector<8x128xf32>
    %570 = arith.mulf %561, %543 : vector<8x128xf32>
    %571 = arith.mulf %555, %563 : vector<8x128xf32>
    %572 = arith.addf %570, %571 : vector<8x128xf32>
    %573 = math.tanh %572 : vector<8x128xf32>
    %574 = arith.mulf %569, %573 : vector<8x128xf32>
    %575 = vector.broadcast %c5_i32 : i32 to vector<8x1xi32>
    %576 = arith.cmpi slt, %575, %8 : vector<8x1xi32>
    %577 = vector.shape_cast %576 : vector<8x1xi1> to vector<8x1xi1>
    %578 = vector.broadcast %577 : vector<8x1xi1> to vector<8x128xi1>
    %579 = arith.select %578, %574, %542 : vector<8x128xi1>, vector<8x128xf32>
    %c0_220 = arith.constant 0 : index
    %c0_221 = arith.constant 0 : index
    %580 = vector.load %arg12[%c0_220, %c0_221] : memref<8x128xf32, #tpu.memory_space<vmem>>, vector<8x128xf32>
    tpu.vector_store %arg12[%c0_220, %c0_221], %579 {strides = array<i32>} : memref<8x128xf32, #tpu.memory_space<vmem>>, vector<8x128xf32>,
    %581 = vector.shape_cast %576 : vector<8x1xi1> to vector<8x1xi1>
    %582 = vector.broadcast %581 : vector<8x1xi1> to vector<8x128xi1>
    %583 = arith.select %582, %572, %543 : vector<8x128xi1>, vector<8x128xf32>
    %c0_222 = arith.constant 0 : index
    %c0_223 = arith.constant 0 : index
    %584 = vector.load %arg13[%c0_222, %c0_223] : memref<8x128xf32, #tpu.memory_space<vmem>>, vector<8x128xf32>
    tpu.vector_store %arg13[%c0_222, %c0_223], %583 {strides = array<i32>} : memref<8x128xf32, #tpu.memory_space<vmem>>, vector<8x128xf32>,
    %cst_224 = arith.constant 0.000000e+00 : f32
    %585 = vector.shape_cast %576 : vector<8x1xi1> to vector<8x1xi1>
    %586 = vector.broadcast %585 : vector<8x1xi1> to vector<8x128xi1>
    %587 = vector.broadcast %cst_224 : f32 to vector<8x128xf32>
    %588 = arith.select %586, %574, %587 : vector<8x128xi1>, vector<8x128xf32>
    %589 = arith.index_cast %c5_i32 : i32 to index
    %c0_225 = arith.constant 0 : index
    %c0_226 = arith.constant 0 : index
    %590 = vector.load %arg18[%589, %c0_225, %c0_226] : memref<8x8x128xf32, #tpu.memory_space<vmem>>, vector<1x8x128xf32>
    %591 = vector.shape_cast %590 : vector<1x8x128xf32> to vector<8x128xf32>
    %592 = vector.shape_cast %588 : vector<8x128xf32> to vector<1x8x128xf32>
    tpu.vector_store %arg18[%589, %c0_225, %c0_226], %592 {strides = array<i32>} : memref<8x8x128xf32, #tpu.memory_space<vmem>>, vector<1x8x128xf32>,
    %c0_227 = arith.constant 0 : index
    %c0_228 = arith.constant 0 : index
    %593 = vector.load %arg14[%c0_227, %c0_228] : memref<8x128xf32, #tpu.memory_space<vmem>>, vector<8x128xf32>
    %c0_229 = arith.constant 0 : index
    %c0_230 = arith.constant 0 : index
    %594 = vector.load %arg15[%c0_229, %c0_230] : memref<8x128xf32, #tpu.memory_space<vmem>>, vector<8x128xf32>
    %595 = arith.index_cast %541 : i32 to index
    %c0_231 = arith.constant 0 : index
    %c0_232 = arith.constant 0 : index
    %596 = vector.load %arg17[%595, %c0_231, %c0_232] : memref<8x8x512xf32, #tpu.memory_space<vmem>>, vector<1x8x512xf32>
    %597 = vector.shape_cast %596 : vector<1x8x512xf32> to vector<8x512xf32>
    %598 = arith.truncf %593 : vector<8x128xf32> to vector<8x128xbf16>
    %cst_233 = arith.constant dense<0.000000e+00> : vector<8x512xf32>
    %599 = tpu.matmul %598, %25, %cst_233 {dimension_numbers = #tpu.dot_dimension_numbers<[1], [0], [0], [1], [0, 0, 1, 1], [], []>} : vector<8x128xbf16>, vector<128x512xbf16>, vector<8x512xf32> -> vector<8x512xf32>
    %600 = arith.addf %597, %599 : vector<8x512xf32>
    %601 = vector.extract_strided_slice %600 {offsets = [0, 0], sizes = [8, 128], strides = [1, 1]} : vector<8x512xf32> to vector<8x128xf32>
    %602 = arith.negf %601 : vector<8x128xf32>
    %603 = math.exp %602 : vector<8x128xf32>
    %cst_234 = arith.constant 1.000000e+00 : f32
    %604 = vector.broadcast %cst_234 : f32 to vector<8x128xf32>
    %605 = arith.addf %604, %603 : vector<8x128xf32>
    %606 = arith.divf %604, %605 : vector<8x128xf32>
    %607 = vector.extract_strided_slice %600 {offsets = [0, 128], sizes = [8, 128], strides = [1, 1]} : vector<8x512xf32> to vector<8x128xf32>
    %608 = arith.negf %607 : vector<8x128xf32>
    %609 = math.exp %608 : vector<8x128xf32>
    %cst_235 = arith.constant 1.000000e+00 : f32
    %610 = vector.broadcast %cst_235 : f32 to vector<8x128xf32>
    %611 = arith.addf %610, %609 : vector<8x128xf32>
    %612 = arith.divf %610, %611 : vector<8x128xf32>
    %613 = vector.extract_strided_slice %600 {offsets = [0, 256], sizes = [8, 128], strides = [1, 1]} : vector<8x512xf32> to vector<8x128xf32>
    %614 = math.tanh %613 : vector<8x128xf32>
    %615 = vector.extract_strided_slice %600 {offsets = [0, 384], sizes = [8, 128], strides = [1, 1]} : vector<8x512xf32> to vector<8x128xf32>
    %616 = arith.negf %615 : vector<8x128xf32>
    %617 = math.exp %616 : vector<8x128xf32>
    %cst_236 = arith.constant 1.000000e+00 : f32
    %618 = vector.broadcast %cst_236 : f32 to vector<8x128xf32>
    %619 = arith.addf %618, %617 : vector<8x128xf32>
    %620 = arith.divf %618, %619 : vector<8x128xf32>
    %621 = arith.mulf %612, %594 : vector<8x128xf32>
    %622 = arith.mulf %606, %614 : vector<8x128xf32>
    %623 = arith.addf %621, %622 : vector<8x128xf32>
    %624 = math.tanh %623 : vector<8x128xf32>
    %625 = arith.mulf %620, %624 : vector<8x128xf32>
    %626 = vector.broadcast %541 : i32 to vector<8x1xi32>
    %627 = arith.cmpi slt, %626, %8 : vector<8x1xi32>
    %628 = vector.shape_cast %627 : vector<8x1xi1> to vector<8x1xi1>
    %629 = vector.broadcast %628 : vector<8x1xi1> to vector<8x128xi1>
    %630 = arith.select %629, %625, %593 : vector<8x128xi1>, vector<8x128xf32>
    %c0_237 = arith.constant 0 : index
    %c0_238 = arith.constant 0 : index
    %631 = vector.load %arg14[%c0_237, %c0_238] : memref<8x128xf32, #tpu.memory_space<vmem>>, vector<8x128xf32>
    tpu.vector_store %arg14[%c0_237, %c0_238], %630 {strides = array<i32>} : memref<8x128xf32, #tpu.memory_space<vmem>>, vector<8x128xf32>,
    %632 = vector.shape_cast %627 : vector<8x1xi1> to vector<8x1xi1>
    %633 = vector.broadcast %632 : vector<8x1xi1> to vector<8x128xi1>
    %634 = arith.select %633, %623, %594 : vector<8x128xi1>, vector<8x128xf32>
    %c0_239 = arith.constant 0 : index
    %c0_240 = arith.constant 0 : index
    %635 = vector.load %arg15[%c0_239, %c0_240] : memref<8x128xf32, #tpu.memory_space<vmem>>, vector<8x128xf32>
    tpu.vector_store %arg15[%c0_239, %c0_240], %634 {strides = array<i32>} : memref<8x128xf32, #tpu.memory_space<vmem>>, vector<8x128xf32>,
    %cst_241 = arith.constant 0.000000e+00 : f32
    %636 = vector.shape_cast %627 : vector<8x1xi1> to vector<8x1xi1>
    %637 = vector.broadcast %636 : vector<8x1xi1> to vector<8x128xi1>
    %638 = vector.broadcast %cst_241 : f32 to vector<8x128xf32>
    %639 = arith.select %637, %625, %638 : vector<8x128xi1>, vector<8x128xf32>
    %640 = arith.index_cast %541 : i32 to index
    %c0_242 = arith.constant 0 : index
    %c0_243 = arith.constant 0 : index
    %641 = vector.load %arg19[%640, %c0_242, %c0_243] : memref<8x8x128xf32, #tpu.memory_space<vmem>>, vector<1x8x128xf32>
    %642 = vector.shape_cast %641 : vector<1x8x128xf32> to vector<8x128xf32>
    %643 = vector.shape_cast %639 : vector<8x128xf32> to vector<1x8x128xf32>
    tpu.vector_store %arg19[%640, %c0_242, %c0_243], %643 {strides = array<i32>} : memref<8x8x128xf32, #tpu.memory_space<vmem>>, vector<1x8x128xf32>,
    %c6_i32 = arith.constant 6 : i32
    %c7_i32_244 = arith.constant 7 : i32
    %644 = arith.subi %c7_i32_244, %c6_i32 : i32
    %c0_245 = arith.constant 0 : index
    %c0_246 = arith.constant 0 : index
    %645 = vector.load %arg12[%c0_245, %c0_246] : memref<8x128xf32, #tpu.memory_space<vmem>>, vector<8x128xf32>
    %c0_247 = arith.constant 0 : index
    %c0_248 = arith.constant 0 : index
    %646 = vector.load %arg13[%c0_247, %c0_248] : memref<8x128xf32, #tpu.memory_space<vmem>>, vector<8x128xf32>
    %647 = arith.index_cast %c6_i32 : i32 to index
    %c0_249 = arith.constant 0 : index
    %c0_250 = arith.constant 0 : index
    %648 = vector.load %arg16[%647, %c0_249, %c0_250] : memref<8x8x512xf32, #tpu.memory_space<vmem>>, vector<1x8x512xf32>
    %649 = vector.shape_cast %648 : vector<1x8x512xf32> to vector<8x512xf32>
    %650 = arith.truncf %645 : vector<8x128xf32> to vector<8x128xbf16>
    %cst_251 = arith.constant dense<0.000000e+00> : vector<8x512xf32>
    %651 = tpu.matmul %650, %24, %cst_251 {dimension_numbers = #tpu.dot_dimension_numbers<[1], [0], [0], [1], [0, 0, 1, 1], [], []>} : vector<8x128xbf16>, vector<128x512xbf16>, vector<8x512xf32> -> vector<8x512xf32>
    %652 = arith.addf %649, %651 : vector<8x512xf32>
    %653 = vector.extract_strided_slice %652 {offsets = [0, 0], sizes = [8, 128], strides = [1, 1]} : vector<8x512xf32> to vector<8x128xf32>
    %654 = arith.negf %653 : vector<8x128xf32>
    %655 = math.exp %654 : vector<8x128xf32>
    %cst_252 = arith.constant 1.000000e+00 : f32
    %656 = vector.broadcast %cst_252 : f32 to vector<8x128xf32>
    %657 = arith.addf %656, %655 : vector<8x128xf32>
    %658 = arith.divf %656, %657 : vector<8x128xf32>
    %659 = vector.extract_strided_slice %652 {offsets = [0, 128], sizes = [8, 128], strides = [1, 1]} : vector<8x512xf32> to vector<8x128xf32>
    %660 = arith.negf %659 : vector<8x128xf32>
    %661 = math.exp %660 : vector<8x128xf32>
    %cst_253 = arith.constant 1.000000e+00 : f32
    %662 = vector.broadcast %cst_253 : f32 to vector<8x128xf32>
    %663 = arith.addf %662, %661 : vector<8x128xf32>
    %664 = arith.divf %662, %663 : vector<8x128xf32>
    %665 = vector.extract_strided_slice %652 {offsets = [0, 256], sizes = [8, 128], strides = [1, 1]} : vector<8x512xf32> to vector<8x128xf32>
    %666 = math.tanh %665 : vector<8x128xf32>
    %667 = vector.extract_strided_slice %652 {offsets = [0, 384], sizes = [8, 128], strides = [1, 1]} : vector<8x512xf32> to vector<8x128xf32>
    %668 = arith.negf %667 : vector<8x128xf32>
    %669 = math.exp %668 : vector<8x128xf32>
    %cst_254 = arith.constant 1.000000e+00 : f32
    %670 = vector.broadcast %cst_254 : f32 to vector<8x128xf32>
    %671 = arith.addf %670, %669 : vector<8x128xf32>
    %672 = arith.divf %670, %671 : vector<8x128xf32>
    %673 = arith.mulf %664, %646 : vector<8x128xf32>
    %674 = arith.mulf %658, %666 : vector<8x128xf32>
    %675 = arith.addf %673, %674 : vector<8x128xf32>
    %676 = math.tanh %675 : vector<8x128xf32>
    %677 = arith.mulf %672, %676 : vector<8x128xf32>
    %678 = vector.broadcast %c6_i32 : i32 to vector<8x1xi32>
    %679 = arith.cmpi slt, %678, %8 : vector<8x1xi32>
    %680 = vector.shape_cast %679 : vector<8x1xi1> to vector<8x1xi1>
    %681 = vector.broadcast %680 : vector<8x1xi1> to vector<8x128xi1>
    %682 = arith.select %681, %677, %645 : vector<8x128xi1>, vector<8x128xf32>
    %c0_255 = arith.constant 0 : index
    %c0_256 = arith.constant 0 : index
    %683 = vector.load %arg12[%c0_255, %c0_256] : memref<8x128xf32, #tpu.memory_space<vmem>>, vector<8x128xf32>
    tpu.vector_store %arg12[%c0_255, %c0_256], %682 {strides = array<i32>} : memref<8x128xf32, #tpu.memory_space<vmem>>, vector<8x128xf32>,
    %684 = vector.shape_cast %679 : vector<8x1xi1> to vector<8x1xi1>
    %685 = vector.broadcast %684 : vector<8x1xi1> to vector<8x128xi1>
    %686 = arith.select %685, %675, %646 : vector<8x128xi1>, vector<8x128xf32>
    %c0_257 = arith.constant 0 : index
    %c0_258 = arith.constant 0 : index
    %687 = vector.load %arg13[%c0_257, %c0_258] : memref<8x128xf32, #tpu.memory_space<vmem>>, vector<8x128xf32>
    tpu.vector_store %arg13[%c0_257, %c0_258], %686 {strides = array<i32>} : memref<8x128xf32, #tpu.memory_space<vmem>>, vector<8x128xf32>,
    %cst_259 = arith.constant 0.000000e+00 : f32
    %688 = vector.shape_cast %679 : vector<8x1xi1> to vector<8x1xi1>
    %689 = vector.broadcast %688 : vector<8x1xi1> to vector<8x128xi1>
    %690 = vector.broadcast %cst_259 : f32 to vector<8x128xf32>
    %691 = arith.select %689, %677, %690 : vector<8x128xi1>, vector<8x128xf32>
    %692 = arith.index_cast %c6_i32 : i32 to index
    %c0_260 = arith.constant 0 : index
    %c0_261 = arith.constant 0 : index
    %693 = vector.load %arg18[%692, %c0_260, %c0_261] : memref<8x8x128xf32, #tpu.memory_space<vmem>>, vector<1x8x128xf32>
    %694 = vector.shape_cast %693 : vector<1x8x128xf32> to vector<8x128xf32>
    %695 = vector.shape_cast %691 : vector<8x128xf32> to vector<1x8x128xf32>
    tpu.vector_store %arg18[%692, %c0_260, %c0_261], %695 {strides = array<i32>} : memref<8x8x128xf32, #tpu.memory_space<vmem>>, vector<1x8x128xf32>,
    %c0_262 = arith.constant 0 : index
    %c0_263 = arith.constant 0 : index
    %696 = vector.load %arg14[%c0_262, %c0_263] : memref<8x128xf32, #tpu.memory_space<vmem>>, vector<8x128xf32>
    %c0_264 = arith.constant 0 : index
    %c0_265 = arith.constant 0 : index
    %697 = vector.load %arg15[%c0_264, %c0_265] : memref<8x128xf32, #tpu.memory_space<vmem>>, vector<8x128xf32>
    %698 = arith.index_cast %644 : i32 to index
    %c0_266 = arith.constant 0 : index
    %c0_267 = arith.constant 0 : index
    %699 = vector.load %arg17[%698, %c0_266, %c0_267] : memref<8x8x512xf32, #tpu.memory_space<vmem>>, vector<1x8x512xf32>
    %700 = vector.shape_cast %699 : vector<1x8x512xf32> to vector<8x512xf32>
    %701 = arith.truncf %696 : vector<8x128xf32> to vector<8x128xbf16>
    %cst_268 = arith.constant dense<0.000000e+00> : vector<8x512xf32>
    %702 = tpu.matmul %701, %25, %cst_268 {dimension_numbers = #tpu.dot_dimension_numbers<[1], [0], [0], [1], [0, 0, 1, 1], [], []>} : vector<8x128xbf16>, vector<128x512xbf16>, vector<8x512xf32> -> vector<8x512xf32>
    %703 = arith.addf %700, %702 : vector<8x512xf32>
    %704 = vector.extract_strided_slice %703 {offsets = [0, 0], sizes = [8, 128], strides = [1, 1]} : vector<8x512xf32> to vector<8x128xf32>
    %705 = arith.negf %704 : vector<8x128xf32>
    %706 = math.exp %705 : vector<8x128xf32>
    %cst_269 = arith.constant 1.000000e+00 : f32
    %707 = vector.broadcast %cst_269 : f32 to vector<8x128xf32>
    %708 = arith.addf %707, %706 : vector<8x128xf32>
    %709 = arith.divf %707, %708 : vector<8x128xf32>
    %710 = vector.extract_strided_slice %703 {offsets = [0, 128], sizes = [8, 128], strides = [1, 1]} : vector<8x512xf32> to vector<8x128xf32>
    %711 = arith.negf %710 : vector<8x128xf32>
    %712 = math.exp %711 : vector<8x128xf32>
    %cst_270 = arith.constant 1.000000e+00 : f32
    %713 = vector.broadcast %cst_270 : f32 to vector<8x128xf32>
    %714 = arith.addf %713, %712 : vector<8x128xf32>
    %715 = arith.divf %713, %714 : vector<8x128xf32>
    %716 = vector.extract_strided_slice %703 {offsets = [0, 256], sizes = [8, 128], strides = [1, 1]} : vector<8x512xf32> to vector<8x128xf32>
    %717 = math.tanh %716 : vector<8x128xf32>
    %718 = vector.extract_strided_slice %703 {offsets = [0, 384], sizes = [8, 128], strides = [1, 1]} : vector<8x512xf32> to vector<8x128xf32>
    %719 = arith.negf %718 : vector<8x128xf32>
    %720 = math.exp %719 : vector<8x128xf32>
    %cst_271 = arith.constant 1.000000e+00 : f32
    %721 = vector.broadcast %cst_271 : f32 to vector<8x128xf32>
    %722 = arith.addf %721, %720 : vector<8x128xf32>
    %723 = arith.divf %721, %722 : vector<8x128xf32>
    %724 = arith.mulf %715, %697 : vector<8x128xf32>
    %725 = arith.mulf %709, %717 : vector<8x128xf32>
    %726 = arith.addf %724, %725 : vector<8x128xf32>
    %727 = math.tanh %726 : vector<8x128xf32>
    %728 = arith.mulf %723, %727 : vector<8x128xf32>
    %729 = vector.broadcast %644 : i32 to vector<8x1xi32>
    %730 = arith.cmpi slt, %729, %8 : vector<8x1xi32>
    %731 = vector.shape_cast %730 : vector<8x1xi1> to vector<8x1xi1>
    %732 = vector.broadcast %731 : vector<8x1xi1> to vector<8x128xi1>
    %733 = arith.select %732, %728, %696 : vector<8x128xi1>, vector<8x128xf32>
    %c0_272 = arith.constant 0 : index
    %c0_273 = arith.constant 0 : index
    %734 = vector.load %arg14[%c0_272, %c0_273] : memref<8x128xf32, #tpu.memory_space<vmem>>, vector<8x128xf32>
    tpu.vector_store %arg14[%c0_272, %c0_273], %733 {strides = array<i32>} : memref<8x128xf32, #tpu.memory_space<vmem>>, vector<8x128xf32>,
    %735 = vector.shape_cast %730 : vector<8x1xi1> to vector<8x1xi1>
    %736 = vector.broadcast %735 : vector<8x1xi1> to vector<8x128xi1>
    %737 = arith.select %736, %726, %697 : vector<8x128xi1>, vector<8x128xf32>
    %c0_274 = arith.constant 0 : index
    %c0_275 = arith.constant 0 : index
    %738 = vector.load %arg15[%c0_274, %c0_275] : memref<8x128xf32, #tpu.memory_space<vmem>>, vector<8x128xf32>
    tpu.vector_store %arg15[%c0_274, %c0_275], %737 {strides = array<i32>} : memref<8x128xf32, #tpu.memory_space<vmem>>, vector<8x128xf32>,
    %cst_276 = arith.constant 0.000000e+00 : f32
    %739 = vector.shape_cast %730 : vector<8x1xi1> to vector<8x1xi1>
    %740 = vector.broadcast %739 : vector<8x1xi1> to vector<8x128xi1>
    %741 = vector.broadcast %cst_276 : f32 to vector<8x128xf32>
    %742 = arith.select %740, %728, %741 : vector<8x128xi1>, vector<8x128xf32>
    %743 = arith.index_cast %644 : i32 to index
    %c0_277 = arith.constant 0 : index
    %c0_278 = arith.constant 0 : index
    %744 = vector.load %arg19[%743, %c0_277, %c0_278] : memref<8x8x128xf32, #tpu.memory_space<vmem>>, vector<1x8x128xf32>
    %745 = vector.shape_cast %744 : vector<1x8x128xf32> to vector<8x128xf32>
    %746 = vector.shape_cast %742 : vector<8x128xf32> to vector<1x8x128xf32>
    tpu.vector_store %arg19[%743, %c0_277, %c0_278], %746 {strides = array<i32>} : memref<8x8x128xf32, #tpu.memory_space<vmem>>, vector<1x8x128xf32>,
    %c7_i32_279 = arith.constant 7 : i32
    %c7_i32_280 = arith.constant 7 : i32
    %747 = arith.subi %c7_i32_280, %c7_i32_279 : i32
    %c0_281 = arith.constant 0 : index
    %c0_282 = arith.constant 0 : index
    %748 = vector.load %arg12[%c0_281, %c0_282] : memref<8x128xf32, #tpu.memory_space<vmem>>, vector<8x128xf32>
    %c0_283 = arith.constant 0 : index
    %c0_284 = arith.constant 0 : index
    %749 = vector.load %arg13[%c0_283, %c0_284] : memref<8x128xf32, #tpu.memory_space<vmem>>, vector<8x128xf32>
    %750 = arith.index_cast %c7_i32_279 : i32 to index
    %c0_285 = arith.constant 0 : index
    %c0_286 = arith.constant 0 : index
    %751 = vector.load %arg16[%750, %c0_285, %c0_286] : memref<8x8x512xf32, #tpu.memory_space<vmem>>, vector<1x8x512xf32>
    %752 = vector.shape_cast %751 : vector<1x8x512xf32> to vector<8x512xf32>
    %753 = arith.truncf %748 : vector<8x128xf32> to vector<8x128xbf16>
    %cst_287 = arith.constant dense<0.000000e+00> : vector<8x512xf32>
    %754 = tpu.matmul %753, %24, %cst_287 {dimension_numbers = #tpu.dot_dimension_numbers<[1], [0], [0], [1], [0, 0, 1, 1], [], []>} : vector<8x128xbf16>, vector<128x512xbf16>, vector<8x512xf32> -> vector<8x512xf32>
    %755 = arith.addf %752, %754 : vector<8x512xf32>
    %756 = vector.extract_strided_slice %755 {offsets = [0, 0], sizes = [8, 128], strides = [1, 1]} : vector<8x512xf32> to vector<8x128xf32>
    %757 = arith.negf %756 : vector<8x128xf32>
    %758 = math.exp %757 : vector<8x128xf32>
    %cst_288 = arith.constant 1.000000e+00 : f32
    %759 = vector.broadcast %cst_288 : f32 to vector<8x128xf32>
    %760 = arith.addf %759, %758 : vector<8x128xf32>
    %761 = arith.divf %759, %760 : vector<8x128xf32>
    %762 = vector.extract_strided_slice %755 {offsets = [0, 128], sizes = [8, 128], strides = [1, 1]} : vector<8x512xf32> to vector<8x128xf32>
    %763 = arith.negf %762 : vector<8x128xf32>
    %764 = math.exp %763 : vector<8x128xf32>
    %cst_289 = arith.constant 1.000000e+00 : f32
    %765 = vector.broadcast %cst_289 : f32 to vector<8x128xf32>
    %766 = arith.addf %765, %764 : vector<8x128xf32>
    %767 = arith.divf %765, %766 : vector<8x128xf32>
    %768 = vector.extract_strided_slice %755 {offsets = [0, 256], sizes = [8, 128], strides = [1, 1]} : vector<8x512xf32> to vector<8x128xf32>
    %769 = math.tanh %768 : vector<8x128xf32>
    %770 = vector.extract_strided_slice %755 {offsets = [0, 384], sizes = [8, 128], strides = [1, 1]} : vector<8x512xf32> to vector<8x128xf32>
    %771 = arith.negf %770 : vector<8x128xf32>
    %772 = math.exp %771 : vector<8x128xf32>
    %cst_290 = arith.constant 1.000000e+00 : f32
    %773 = vector.broadcast %cst_290 : f32 to vector<8x128xf32>
    %774 = arith.addf %773, %772 : vector<8x128xf32>
    %775 = arith.divf %773, %774 : vector<8x128xf32>
    %776 = arith.mulf %767, %749 : vector<8x128xf32>
    %777 = arith.mulf %761, %769 : vector<8x128xf32>
    %778 = arith.addf %776, %777 : vector<8x128xf32>
    %779 = math.tanh %778 : vector<8x128xf32>
    %780 = arith.mulf %775, %779 : vector<8x128xf32>
    %781 = vector.broadcast %c7_i32_279 : i32 to vector<8x1xi32>
    %782 = arith.cmpi slt, %781, %8 : vector<8x1xi32>
    %783 = vector.shape_cast %782 : vector<8x1xi1> to vector<8x1xi1>
    %784 = vector.broadcast %783 : vector<8x1xi1> to vector<8x128xi1>
    %785 = arith.select %784, %780, %748 : vector<8x128xi1>, vector<8x128xf32>
    %c0_291 = arith.constant 0 : index
    %c0_292 = arith.constant 0 : index
    %786 = vector.load %arg12[%c0_291, %c0_292] : memref<8x128xf32, #tpu.memory_space<vmem>>, vector<8x128xf32>
    tpu.vector_store %arg12[%c0_291, %c0_292], %785 {strides = array<i32>} : memref<8x128xf32, #tpu.memory_space<vmem>>, vector<8x128xf32>,
    %787 = vector.shape_cast %782 : vector<8x1xi1> to vector<8x1xi1>
    %788 = vector.broadcast %787 : vector<8x1xi1> to vector<8x128xi1>
    %789 = arith.select %788, %778, %749 : vector<8x128xi1>, vector<8x128xf32>
    %c0_293 = arith.constant 0 : index
    %c0_294 = arith.constant 0 : index
    %790 = vector.load %arg13[%c0_293, %c0_294] : memref<8x128xf32, #tpu.memory_space<vmem>>, vector<8x128xf32>
    tpu.vector_store %arg13[%c0_293, %c0_294], %789 {strides = array<i32>} : memref<8x128xf32, #tpu.memory_space<vmem>>, vector<8x128xf32>,
    %cst_295 = arith.constant 0.000000e+00 : f32
    %791 = vector.shape_cast %782 : vector<8x1xi1> to vector<8x1xi1>
    %792 = vector.broadcast %791 : vector<8x1xi1> to vector<8x128xi1>
    %793 = vector.broadcast %cst_295 : f32 to vector<8x128xf32>
    %794 = arith.select %792, %780, %793 : vector<8x128xi1>, vector<8x128xf32>
    %795 = arith.index_cast %c7_i32_279 : i32 to index
    %c0_296 = arith.constant 0 : index
    %c0_297 = arith.constant 0 : index
    %796 = vector.load %arg18[%795, %c0_296, %c0_297] : memref<8x8x128xf32, #tpu.memory_space<vmem>>, vector<1x8x128xf32>
    %797 = vector.shape_cast %796 : vector<1x8x128xf32> to vector<8x128xf32>
    %798 = vector.shape_cast %794 : vector<8x128xf32> to vector<1x8x128xf32>
    tpu.vector_store %arg18[%795, %c0_296, %c0_297], %798 {strides = array<i32>} : memref<8x8x128xf32, #tpu.memory_space<vmem>>, vector<1x8x128xf32>,
    %c0_298 = arith.constant 0 : index
    %c0_299 = arith.constant 0 : index
    %799 = vector.load %arg14[%c0_298, %c0_299] : memref<8x128xf32, #tpu.memory_space<vmem>>, vector<8x128xf32>
    %c0_300 = arith.constant 0 : index
    %c0_301 = arith.constant 0 : index
    %800 = vector.load %arg15[%c0_300, %c0_301] : memref<8x128xf32, #tpu.memory_space<vmem>>, vector<8x128xf32>
    %801 = arith.index_cast %747 : i32 to index
    %c0_302 = arith.constant 0 : index
    %c0_303 = arith.constant 0 : index
    %802 = vector.load %arg17[%801, %c0_302, %c0_303] : memref<8x8x512xf32, #tpu.memory_space<vmem>>, vector<1x8x512xf32>
    %803 = vector.shape_cast %802 : vector<1x8x512xf32> to vector<8x512xf32>
    %804 = arith.truncf %799 : vector<8x128xf32> to vector<8x128xbf16>
    %cst_304 = arith.constant dense<0.000000e+00> : vector<8x512xf32>
    %805 = tpu.matmul %804, %25, %cst_304 {dimension_numbers = #tpu.dot_dimension_numbers<[1], [0], [0], [1], [0, 0, 1, 1], [], []>} : vector<8x128xbf16>, vector<128x512xbf16>, vector<8x512xf32> -> vector<8x512xf32>
    %806 = arith.addf %803, %805 : vector<8x512xf32>
    %807 = vector.extract_strided_slice %806 {offsets = [0, 0], sizes = [8, 128], strides = [1, 1]} : vector<8x512xf32> to vector<8x128xf32>
    %808 = arith.negf %807 : vector<8x128xf32>
    %809 = math.exp %808 : vector<8x128xf32>
    %cst_305 = arith.constant 1.000000e+00 : f32
    %810 = vector.broadcast %cst_305 : f32 to vector<8x128xf32>
    %811 = arith.addf %810, %809 : vector<8x128xf32>
    %812 = arith.divf %810, %811 : vector<8x128xf32>
    %813 = vector.extract_strided_slice %806 {offsets = [0, 128], sizes = [8, 128], strides = [1, 1]} : vector<8x512xf32> to vector<8x128xf32>
    %814 = arith.negf %813 : vector<8x128xf32>
    %815 = math.exp %814 : vector<8x128xf32>
    %cst_306 = arith.constant 1.000000e+00 : f32
    %816 = vector.broadcast %cst_306 : f32 to vector<8x128xf32>
    %817 = arith.addf %816, %815 : vector<8x128xf32>
    %818 = arith.divf %816, %817 : vector<8x128xf32>
    %819 = vector.extract_strided_slice %806 {offsets = [0, 256], sizes = [8, 128], strides = [1, 1]} : vector<8x512xf32> to vector<8x128xf32>
    %820 = math.tanh %819 : vector<8x128xf32>
    %821 = vector.extract_strided_slice %806 {offsets = [0, 384], sizes = [8, 128], strides = [1, 1]} : vector<8x512xf32> to vector<8x128xf32>
    %822 = arith.negf %821 : vector<8x128xf32>
    %823 = math.exp %822 : vector<8x128xf32>
    %cst_307 = arith.constant 1.000000e+00 : f32
    %824 = vector.broadcast %cst_307 : f32 to vector<8x128xf32>
    %825 = arith.addf %824, %823 : vector<8x128xf32>
    %826 = arith.divf %824, %825 : vector<8x128xf32>
    %827 = arith.mulf %818, %800 : vector<8x128xf32>
    %828 = arith.mulf %812, %820 : vector<8x128xf32>
    %829 = arith.addf %827, %828 : vector<8x128xf32>
    %830 = math.tanh %829 : vector<8x128xf32>
    %831 = arith.mulf %826, %830 : vector<8x128xf32>
    %832 = vector.broadcast %747 : i32 to vector<8x1xi32>
    %833 = arith.cmpi slt, %832, %8 : vector<8x1xi32>
    %834 = vector.shape_cast %833 : vector<8x1xi1> to vector<8x1xi1>
    %835 = vector.broadcast %834 : vector<8x1xi1> to vector<8x128xi1>
    %836 = arith.select %835, %831, %799 : vector<8x128xi1>, vector<8x128xf32>
    %c0_308 = arith.constant 0 : index
    %c0_309 = arith.constant 0 : index
    %837 = vector.load %arg14[%c0_308, %c0_309] : memref<8x128xf32, #tpu.memory_space<vmem>>, vector<8x128xf32>
    tpu.vector_store %arg14[%c0_308, %c0_309], %836 {strides = array<i32>} : memref<8x128xf32, #tpu.memory_space<vmem>>, vector<8x128xf32>,
    %838 = vector.shape_cast %833 : vector<8x1xi1> to vector<8x1xi1>
    %839 = vector.broadcast %838 : vector<8x1xi1> to vector<8x128xi1>
    %840 = arith.select %839, %829, %800 : vector<8x128xi1>, vector<8x128xf32>
    %c0_310 = arith.constant 0 : index
    %c0_311 = arith.constant 0 : index
    %841 = vector.load %arg15[%c0_310, %c0_311] : memref<8x128xf32, #tpu.memory_space<vmem>>, vector<8x128xf32>
    tpu.vector_store %arg15[%c0_310, %c0_311], %840 {strides = array<i32>} : memref<8x128xf32, #tpu.memory_space<vmem>>, vector<8x128xf32>,
    %cst_312 = arith.constant 0.000000e+00 : f32
    %842 = vector.shape_cast %833 : vector<8x1xi1> to vector<8x1xi1>
    %843 = vector.broadcast %842 : vector<8x1xi1> to vector<8x128xi1>
    %844 = vector.broadcast %cst_312 : f32 to vector<8x128xf32>
    %845 = arith.select %843, %831, %844 : vector<8x128xi1>, vector<8x128xf32>
    %846 = arith.index_cast %747 : i32 to index
    %c0_313 = arith.constant 0 : index
    %c0_314 = arith.constant 0 : index
    %847 = vector.load %arg19[%846, %c0_313, %c0_314] : memref<8x8x128xf32, #tpu.memory_space<vmem>>, vector<1x8x128xf32>
    %848 = vector.shape_cast %847 : vector<1x8x128xf32> to vector<8x128xf32>
    %849 = vector.shape_cast %845 : vector<8x128xf32> to vector<1x8x128xf32>
    tpu.vector_store %arg19[%846, %c0_313, %c0_314], %849 {strides = array<i32>} : memref<8x8x128xf32, #tpu.memory_space<vmem>>, vector<1x8x128xf32>,
    %c8_i32 = arith.constant 8 : i32
    %c0_315 = arith.constant 0 : index
    %c0_316 = arith.constant 0 : index
    %c0_317 = arith.constant 0 : index
    %850 = vector.load %arg18[%c0_315, %c0_316, %c0_317] : memref<8x8x128xf32, #tpu.memory_space<vmem>>, vector<8x8x128xf32>
    %851 = arith.truncf %850 : vector<8x8x128xf32> to vector<8x8x128xbf16>
    %c0_318 = arith.constant 0 : index
    %c0_319 = arith.constant 0 : index
    %c0_320 = arith.constant 0 : index
    %852 = vector.load %arg19[%c0_318, %c0_319, %c0_320] : memref<8x8x128xf32, #tpu.memory_space<vmem>>, vector<8x8x128xf32>
    %853 = arith.truncf %852 : vector<8x8x128xf32> to vector<8x8x128xbf16>
    %c0_321 = arith.constant 0 : index
    %c0_322 = arith.constant 0 : index
    %854 = vector.load %arg8[%c0_321, %c0_322] : memref<128x128xbf16, #tpu.memory_space<vmem>>, vector<128x128xbf16>
    %cst_323 = arith.constant dense<0.000000e+00> : vector<8x8x128xf32>
    %855 = tpu.matmul %851, %854, %cst_323 {dimension_numbers = #tpu.dot_dimension_numbers<[2], [0], [0, 1], [1], [0, 0, 0, 1, 1, 1], [], []>} : vector<8x8x128xbf16>, vector<128x128xbf16>, vector<8x8x128xf32> -> vector<8x8x128xf32>
    %c0_324 = arith.constant 0 : index
    %c0_325 = arith.constant 0 : index
    %856 = vector.load %arg9[%c0_324, %c0_325] : memref<128x128xbf16, #tpu.memory_space<vmem>>, vector<128x128xbf16>
    %cst_326 = arith.constant dense<0.000000e+00> : vector<8x8x128xf32>
    %857 = tpu.matmul %853, %856, %cst_326 {dimension_numbers = #tpu.dot_dimension_numbers<[2], [0], [0, 1], [1], [0, 0, 0, 1, 1, 1], [], []>} : vector<8x8x128xbf16>, vector<128x128xbf16>, vector<8x8x128xf32> -> vector<8x8x128xf32>
    %858 = arith.addf %855, %857 : vector<8x8x128xf32>
    %c0_327 = arith.constant 0 : index
    %c0_328 = arith.constant 0 : index
    %859 = vector.load %arg10[%c0_327, %c0_328] : memref<1x128xf32, #tpu.memory_space<vmem>>, vector<1x128xf32>
    %860 = vector.shape_cast %859 : vector<1x128xf32> to vector<1x1x128xf32>
    %861 = vector.broadcast %860 : vector<1x1x128xf32> to vector<8x8x128xf32>
    %862 = arith.addf %858, %861 : vector<8x8x128xf32>
    %c0_329 = arith.constant 0 : index
    %c0_330 = arith.constant 0 : index
    %c0_331 = arith.constant 0 : index
    %863 = vector.load %arg11[%c0_329, %c0_330, %c0_331] : memref<8x8x128xf32, #tpu.memory_space<vmem>>, vector<8x8x128xf32>
    tpu.vector_store %arg11[%c0_329, %c0_330, %c0_331], %862 {strides = array<i32>} : memref<8x8x128xf32, #tpu.memory_space<vmem>>, vector<8x8x128xf32>,
    return
  }
}

</mosaic_0001>

<bundles_post_ra>
// kernel: bilstm_pallas.1
= control target key start
LH: loop header
LB: loop body
LE: loop exit
PB: predicated region body
PF: predicated region fallthrough
CT: control target
= control target key end

     0   :  { %v6277_v1 = vmov 0   ;;  %vm118_vm0 = vcmask 130048   ;;  %v6279_v56 = vmov 0.0|0.0   ;;  %s6265_s2 = inlined_call_operand.vmem [shape: bf16[16,512], index: 2, kind: input, shape index: {}]   ;;  %s6266_s0 = inlined_call_operand.vmem [shape: bf16[8,8,16], index: 0, kind: input, shape index: {}]   ;;  %s6267_s5 = inlined_call_operand.vmem [shape: bf16[16,512], index: 5, kind: input, shape index: {}]   ;;  %s6268_s3 = inlined_call_operand.vmem [shape: bf16[128,512], index: 3, kind: input, shape index: {}]   ;;  %s6269_s6 = inlined_call_operand.vmem [shape: bf16[128,512], index: 6, kind: input, shape index: {}]   ;;  %s6270_s1 = inlined_call_operand.vmem [shape: s32[8,1], index: 1, kind: input, shape index: {}]   ;;  %s6271_s4 = inlined_call_operand.vmem [shape: f32[1,512], index: 4, kind: input, shape index: {}]   ;;  %s6272_s7 = inlined_call_operand.vmem [shape: f32[1,512], index: 7, kind: input, shape index: {}]   ;;  %s6273_s8 = inlined_call_operand.vmem [shape: bf16[128,128], index: 8, kind: input, shape index: {}]   ;;  %s6274_s9 = inlined_call_operand.vmem [shape: bf16[128,128], index: 9, kind: input, shape index: {}]   ;;  %s6275_s10 = inlined_call_operand.vmem [shape: f32[1,128], index: 10, kind: input, shape index: {}]   ;;  %s6276_s11 = inlined_call_operand.vmem [shape: f32[8,8,128], index: 11, kind: output, shape index: {}]  }
   0x1   :  { %v3611_v0 = vld [vmem:[%s6265_s2 + $0x4] ss:$16 sps:$4 sm:$0xff]   ;;  %163 = vmatprep.mubr.bf16.mxu0 %v6277_v1  ;;  %236 = vmatprep.mubr.bf16.mxu1 %v6277_v1  ;;  %v3613_v2 = vld [vmem:[%s6265_s2 + $0xc] ss:$16 sps:$4 sm:$0xff]   ;;  %v3615_v3 = vld [vmem:[%s6265_s2] ss:$16 sps:$4 sm:$0xff]  }
   0x2   :  { %3609 = vset.pattern.permute.xlu0 %v6277_v1  ;;  %3610 = vset.pattern.permute.xlu1 %v6277_v1  ;;  %v3616_v4 = vld [vmem:[%s6265_s2 + $0x8] ss:$16 sps:$4 sm:$0xff]   ;;  %v3617_v5 = vld [vmem:[%s6266_s0] sm:$0xff]   ;;  %v3625_v9 = vld [vmem:[%s6267_s5 + $0xc] ss:$16 sps:$4 sm:$0xff]  }
   0x3   :  { %145 = vmatprep.subr.bf16.mxu0 %v3611_v0  ;;  %218 = vmatprep.subr.bf16.mxu1 %v3613_v2  ;;  %v3618_v6 = vld [vmem:[%s6267_s5] ss:$16 sps:$4 sm:$0xff]   ;;  %v3620_v7 = vld [vmem:[%s6267_s5 + $0x4] ss:$16 sps:$4 sm:$0xff]   ;;  %v3623_v8 = vld [vmem:[%s6267_s5 + $0x8] ss:$16 sps:$4 sm:$0xff]  }
   0x4   :  { %146 = vmatpush1.bf16.msra.mxu0 %v3615_v3  ;;  %219 = vmatpush1.bf16.msra.mxu1 %v3616_v4  ;;  %v4223_v10 = vld [vmem:[%s6268_s3 + $0xe4] ss:$16 sps:$4 sm:$0xff]   ;;  %v3621_v11 = vld [vmem:[%s6266_s0 + $0x8] sm:$0xff]   ;;  %v4249_v14 = vld [vmem:[%s6266_s0 + $0x18] sm:$0xff]  }
   0x5   :  { %369 = vmatprep.subr.bf16.mxu0 %v3620_v7  ;;  %442 = vmatprep.subr.bf16.mxu1 %v3625_v9  ;;  %v4231_v12 = vld [vmem:[%s6268_s3 + $0xec] ss:$16 sps:$4 sm:$0xff]   ;;  %v3622_v13 = vld [vmem:[%s6266_s0 + $0x10] sm:$0xff]   ;;  %v4265_v16 = vld [vmem:[%s6268_s3 + $0xe8] ss:$16 sps:$4 sm:$0xff]  }
   0x6   :  { %v4260_v15 = vld [vmem:[%s6268_s3 + $0xe0] ss:$16 sps:$4 sm:$0xff]   ;;  %v4270_v17 = vld [vmem:[%s6268_s3 + $0xc4] ss:$16 sps:$4 sm:$0xff]   ;;  %v4275_v18 = vld [vmem:[%s6268_s3 + $0xcc] ss:$16 sps:$4 sm:$0xff]  }
   0x7   :  { %3334 = vmatmul.mubr.msk.bf16.vlgmr.msra.gmra.mxu0 %vm118_vm0, %v3617_v5  ;;  %3338 = vmatmul.mubr.msk.bf16.vlgmr.msra.gmra.mxu1 %vm118_vm0, %v3617_v5  ;;  %v4282_v19 = vld [vmem:[%s6268_s3 + $0xc0] ss:$16 sps:$4 sm:$0xff]   ;;  %v4289_v20 = vld [vmem:[%s6268_s3 + $0xc8] ss:$16 sps:$4 sm:$0xff]   ;;  %v4294_v21 = vld [vmem:[%s6268_s3 + $0xa4] ss:$16 sps:$4 sm:$0xff]  }
   0x8   :  { %370 = vmatpush1.bf16.msra.mxu0 %v3618_v6  ;;  %173 = vmatprep.mubr.bf16.mxu0 %v6277_v1  ;;  %6398 = vst [vmem:[#allocation10_spill] sm:$0xff] %v4289_v20  ;;  %6399 = vst [vmem:[#allocation11_spill] sm:$0xff] %v4294_v21  ;;  %v4301_v22 = vld [vmem:[%s6268_s3 + $0xac] ss:$16 sps:$4 sm:$0xff]   ;;  %v4308_v23 = vld [vmem:[%s6268_s3 + $0xa0] ss:$16 sps:$4 sm:$0xff]  }
   0x9   :  { %246 = vmatprep.mubr.bf16.mxu1 %v6277_v1  ;;  %443 = vmatpush1.bf16.msra.mxu1 %v3623_v8  ;;  %6400 = vst [vmem:[#allocation12_spill] sm:$0xff] %v4301_v22  ;;  %6401 = vst [vmem:[#allocation13_spill] sm:$0xff] %v4308_v23  ;;  %v4313_v24 = vld [vmem:[%s6268_s3 + $0xa8] ss:$16 sps:$4 sm:$0xff]   ;;  %v4320_v25 = vld [vmem:[%s6268_s3 + $0x84] ss:$16 sps:$4 sm:$0xff]  }
   0xa   :  { %764 = vmatprep.subr.bf16.mxu0 %v4223_v10  ;;  %805 = vmatprep.subr.bf16.mxu1 %v4231_v12  ;;  %6402 = vst [vmem:[#allocation14_spill] sm:$0xff] %v4313_v24  ;;  %6403 = vst [vmem:[#allocation15_spill] sm:$0xff] %v4320_v25  ;;  %v4327_v26 = vld [vmem:[%s6268_s3 + $0x8c] ss:$16 sps:$4 sm:$0xff]   ;;  %v4334_v27 = vld [vmem:[%s6268_s3 + $0x80] ss:$16 sps:$4 sm:$0xff]  }
   0xb   :  { %6404 = vst [vmem:[#allocation16_spill] sm:$0xff] %v4327_v26  ;;  %6405 = vst [vmem:[#allocation17_spill] sm:$0xff] %v4334_v27  ;;  %v4341_v28 = vld [vmem:[%s6268_s3 + $0x88] ss:$16 sps:$4 sm:$0xff]   ;;  %v4346_v29 = vld [vmem:[%s6268_s3 + $0x64] ss:$16 sps:$4 sm:$0xff]  }
   0xc   :  { %6406 = vst [vmem:[#allocation18_spill] sm:$0xff] %v4341_v28  ;;  %6407 = vst [vmem:[#allocation19_spill] sm:$0xff] %v4346_v29  ;;  %v4353_v30 = vld [vmem:[%s6268_s3 + $0x6c] ss:$16 sps:$4 sm:$0xff]   ;;  %v4362_v31 = vld [vmem:[%s6268_s3 + $0x60] ss:$16 sps:$4 sm:$0xff]  }
   0xd   :  { %6408 = vst [vmem:[#allocation20_spill] sm:$0xff] %v4353_v30  ;;  %6409 = vst [vmem:[#allocation21_spill] sm:$0xff] %v4362_v31  ;;  %v4367_v32 = vld [vmem:[%s6268_s3 + $0x68] ss:$16 sps:$4 sm:$0xff]   ;;  %v4372_v33 = vld [vmem:[%s6270_s1] sm:$0xff] }
   0xe   :  { %6410 = vst [vmem:[#allocation22_spill] sm:$0xff] %v4367_v32  ;;  %v4379_v34 = vld [vmem:[%s6268_s3 + $0x44] ss:$16 sps:$4 sm:$0xff]   ;;  %v4384_v35 = vld [vmem:[%s6268_s3 + $0x4c] ss:$16 sps:$4 sm:$0xff]   ;;  %vm874_vm1 = vcmp.gt.s32.totalorder %v4372_v33, 0 }
   0xf   :  { %3335 = vmatmul.mubr.msk.bf16.gmra.mxu0 %vm118_vm0, %v3621_v11  ;;  %3339 = vmatmul.mubr.msk.bf16.gmra.mxu1 %vm118_vm0, %v3621_v11  ;;  %6411 = vst [vmem:[#allocation23_spill] sm:$0xff] %v4379_v34  ;;  %6412 = vst [vmem:[#allocation24_spill] sm:$0xff] %v4384_v35  ;;  %vm1295_vm2 = vcmp.gt.s32.totalorder %v4372_v33, 1  ;;  %v4395_v36 = vld [vmem:[%s6268_s3 + $0x40] ss:$16 sps:$4 sm:$0xff]   ;;  %v875_v38 = vsel %vm874_vm1, 1, %v6277_v1 }
  0x10   :  { %183 = vmatprep.mubr.bf16.mxu0 %v6277_v1  ;;  %256 = vmatprep.mubr.bf16.mxu1 %v6277_v1  ;;  %6413 = vst [vmem:[#allocation25_spill] sm:$0xff] %v4395_v36  ;;  %v4400_v37 = vld [vmem:[%s6268_s3 + $0x48] ss:$16 sps:$4 sm:$0xff]   ;;  %v1296_v39 = vsel %vm1295_vm2, 1, %v6277_v1  ;;  %v4409_v40 = vld [vmem:[%s6268_s3 + $0x24] ss:$16 sps:$4 sm:$0xff]  }
  0x11   :  { %6414 = vst [vmem:[#allocation26_spill] sm:$0xff] %v4400_v37  ;;  %6415 = vst [vmem:[#allocation27_spill] sm:$0xff] %v4409_v40  ;;  %v4414_v41 = vld [vmem:[%s6268_s3 + $0x2c] ss:$16 sps:$4 sm:$0xff]   ;;  %877 = vperm.xlu0 %3609, %v875_v38   ;;  %1298 = vperm.xlu1 %3610, %v1296_v39   ;;  %v4423_v42 = vld [vmem:[%s6268_s3 + $0x20] ss:$16 sps:$4 sm:$0xff]  }
  0x12   :  { %6416 = vst [vmem:[#allocation28_spill] sm:$0xff] %v4414_v41  ;;  %6417 = vst [vmem:[#allocation29_spill] sm:$0xff] %v4423_v42  ;;  %v4428_v43 = vld [vmem:[%s6268_s3 + $0x28] ss:$16 sps:$4 sm:$0xff]   ;;  %v4435_v44 = vld [vmem:[%s6268_s3 + $0x4] ss:$16 sps:$4 sm:$0xff]  }
  0x13   :  { %6418 = vst [vmem:[#allocation30_spill] sm:$0xff] %v4428_v43  ;;  %6419 = vst [vmem:[#allocation31_spill] sm:$0xff] %v4435_v44  ;;  %v4440_v45 = vld [vmem:[%s6268_s3 + $0xc] ss:$16 sps:$4 sm:$0xff]   ;;  %vm1164_vm3 = vcmp.gt.s32.totalorder %v4372_v33, 7  ;;  %vm1426_vm4 = vcmp.gt.s32.totalorder %v4372_v33, 6 }
  0x14   :  { %6420 = vst [vmem:[#allocation32_spill] sm:$0xff] %v4440_v45  ;;  %v4453_v46 = vld [vmem:[%s6268_s3] ss:$16 sps:$4 sm:$0xff]   ;;  %v4458_v47 = vld [vmem:[%s6268_s3 + $0x8] ss:$16 sps:$4 sm:$0xff]   ;;  %v1165_v48 = vsel %vm1164_vm3, 1, %v6277_v1 }
  0x15   :  { %6421 = vst [vmem:[#allocation33_spill] sm:$0xff] %v4453_v46  ;;  %6422 = vst [vmem:[#allocation34_spill] sm:$0xff] %v4458_v47  ;;  %v1427_v49 = vsel %vm1426_vm4, 1, %v6277_v1  ;;  %v4467_v50 = vld [vmem:[%s6269_s6 + $0xe4] ss:$16 sps:$4 sm:$0xff]   ;;  %1167 = vperm.xlu0 %3609, %v1165_v48   ;;  %vm1557_vm5 = vcmp.gt.s32.totalorder %v4372_v33, 2 }
  0x16   :  { %6423 = vst [vmem:[#allocation35_spill] sm:$0xff] %v4467_v50  ;;  %v4472_v51 = vld [vmem:[%s6269_s6 + $0xec] ss:$16 sps:$4 sm:$0xff]   ;;  %1429 = vperm.xlu1 %3610, %v1427_v49   ;;  %v4481_v52 = vld [vmem:[%s6269_s6 + $0xe0] ss:$16 sps:$4 sm:$0xff]   ;;  %v1558_v59 = vsel %vm1557_vm5, 1, %v6277_v1 }
  0x17   :  { %3336 = vmatmul.mubr.msk.bf16.gmra.mxu0 %vm118_vm0, %v3622_v13  ;;  %3340 = vmatmul.mubr.msk.bf16.gmra.mxu1 %vm118_vm0, %v3622_v13  ;;  %6424 = vst [vmem:[#allocation36_spill] sm:$0xff] %v4472_v51  ;;  %v4486_v53 = vld [vmem:[%s6269_s6 + $0xe8] ss:$16 sps:$4 sm:$0xff]   ;;  %v4493_v54 = vld [vmem:[%s6269_s6 + $0xc4] ss:$16 sps:$4 sm:$0xff]   ;;  %vm1819_vm6 = vcmp.gt.s32.totalorder %v4372_v33, 3 }
  0x18   :  { %193 = vmatprep.mubr.bf16.mxu0 %v6277_v1  ;;  %266 = vmatprep.mubr.bf16.mxu1 %v6277_v1  ;;  %v4498_v55 = vld [vmem:[%s6269_s6 + $0xcc] ss:$16 sps:$4 sm:$0xff]   ;;  %v4508_v57 = vld [vmem:[%s6269_s6 + $0xc0] ss:$16 sps:$4 sm:$0xff]   ;;  %v4513_v58 = vld [vmem:[%s6269_s6 + $0xc8] ss:$16 sps:$4 sm:$0xff]  }
  0x19   :  { %v4521_v60 = vld [vmem:[%s6269_s6 + $0xa4] ss:$16 sps:$4 sm:$0xff]   ;;  %v4526_v61 = vld [vmem:[%s6269_s6 + $0xac] ss:$16 sps:$4 sm:$0xff]   ;;  %1560 = vperm.xlu0 %3609, %v1558_v59   ;;  %v4536_v62 = vld [vmem:[%s6269_s6 + $0xa0] ss:$16 sps:$4 sm:$0xff]  }
  0x1a   :  { %v4541_v63 = vld [vmem:[%s6269_s6 + $0xa8] ss:$16 sps:$4 sm:$0xff]   ;;  %v1820_v0 = vsel %vm1819_vm6, 1, %v6277_v1  ;;  %v4549_v2 = vld [vmem:[%s6269_s6 + $0x84] ss:$16 sps:$4 sm:$0xff]   ;;  %vm1688_vm7 = vcmp.gt.s32.totalorder %v4372_v33, 5 }
  0x1b   :  { %v4554_v3 = vld [vmem:[%s6269_s6 + $0x8c] ss:$16 sps:$4 sm:$0xff]   ;;  %v4561_v4 = vld [vmem:[%s6269_s6 + $0x80] ss:$16 sps:$4 sm:$0xff]   ;;  %v4573_v6 = vld [vmem:[%s6269_s6 + $0x64] ss:$16 sps:$4 sm:$0xff]  }
  0x1c   :  { %v4578_v7 = vld [vmem:[%s6269_s6 + $0x6c] ss:$16 sps:$4 sm:$0xff]   ;;  %v4585_v8 = vld [vmem:[%s6269_s6 + $0x60] ss:$16 sps:$4 sm:$0xff]   ;;  %v4590_v9 = vld [vmem:[%s6269_s6 + $0x68] ss:$16 sps:$4 sm:$0xff]  }
  0x1d   :  { %1822 = vperm.xlu0 %3609, %v1820_v0   ;;  %v4614_v38 = vld [vmem:[%s6269_s6 + $0x48] ss:$16 sps:$4 sm:$0xff]   ;;  %v4621_v39 = vld [vmem:[%s6269_s6 + $0x24] ss:$16 sps:$4 sm:$0xff]   ;;  %v4626_v48 = vld [vmem:[%s6269_s6 + $0x2c] ss:$16 sps:$4 sm:$0xff]  }
  0x1e   :  { %6425 = vst [vmem:[#allocation37_spill] sm:$0xff] %v4626_v48  ;;  %v4633_v49 = vld [vmem:[%s6269_s6 + $0x20] ss:$16 sps:$4 sm:$0xff]   ;;  %v4638_v59 = vld [vmem:[%s6269_s6 + $0x28] ss:$16 sps:$4 sm:$0xff]   ;;  %vm1950_vm8 = vcmp.gt.s32.totalorder %v4372_v33, 4 }
  0x1f   :  { %3337 = vmatmul.mubr.msk.bf16.gmra.mxu0 %vm118_vm0, %v4249_v14  ;;  %3341 = vmatmul.mubr.msk.bf16.gmra.mxu1 %vm118_vm0, %v4249_v14  ;;  %6426 = vst [vmem:[#allocation38_spill] sm:$0xff] %v4638_v59  ;;  %v4645_v0 = vld [vmem:[%s6269_s6 + $0x4] ss:$16 sps:$4 sm:$0xff]  }
  0x20   :  { %387 = vmatprep.mubr.bf16.mxu0 %v6277_v1  ;;  %460 = vmatprep.mubr.bf16.mxu1 %v6277_v1 }
  0x27   :  { %3346 = vmatmul.mubr.msk.bf16.vlgmr.msra.gmra.mxu0 %vm118_vm0, %v3617_v5  ;;  %3350 = vmatmul.mubr.msk.bf16.vlgmr.msra.gmra.mxu1 %vm118_vm0, %v3617_v5  ;;  %v4566_v5 = vld [vmem:[%s6269_s6 + $0x88] ss:$16 sps:$4 sm:$0xff]  }
  0x28   :  { %765 = vmatpush1.bf16.msra.mxu0 %v4260_v15  ;;  %806 = vmatpush1.bf16.msra.mxu1 %v4265_v16 }
  0x29   :  { %766 = vmatprep.subr.bf16.mxu0 %v4270_v17  ;;  %807 = vmatprep.subr.bf16.mxu1 %v4275_v18 }
  0x2a   :  { %397 = vmatprep.mubr.bf16.mxu0 %v6277_v1  ;;  %470 = vmatprep.mubr.bf16.mxu1 %v6277_v1 }
  0x2c   :  { %767 = vmatpush1.bf16.msra.mxu0 %v4282_v19  ;;  %808 = vmatpush1.bf16.msra.mxu1 %v4289_v20 }
  0x2d   :  { %768 = vmatprep.subr.bf16.mxu0 %v4294_v21  ;;  %809 = vmatprep.subr.bf16.mxu1 %v4301_v22 }
  0x2f   :  { %3347 = vmatmul.mubr.msk.bf16.gmra.mxu0 %vm118_vm0, %v3621_v11  ;;  %3351 = vmatmul.mubr.msk.bf16.gmra.mxu1 %vm118_vm0, %v3621_v11  ;;  %v4597_v11 = vld [vmem:[%s6269_s6 + $0x44] ss:$16 sps:$4 sm:$0xff]  }
  0x30   :  { %769 = vmatpush1.bf16.msra.mxu0 %v4308_v23  ;;  %810 = vmatpush1.bf16.msra.mxu1 %v4313_v24 }
  0x31   :  { %770 = vmatprep.subr.bf16.mxu0 %v4320_v25  ;;  %811 = vmatprep.subr.bf16.mxu1 %v4327_v26 }
  0x32   :  { %407 = vmatprep.mubr.bf16.mxu0 %v6277_v1  ;;  %480 = vmatprep.mubr.bf16.mxu1 %v6277_v1 }
  0x34   :  { %771 = vmatpush1.bf16.msra.mxu0 %v4334_v27  ;;  %812 = vmatpush1.bf16.msra.mxu1 %v4341_v28 }
  0x35   :  { %772 = vmatprep.subr.bf16.mxu0 %v4346_v29  ;;  %813 = vmatprep.subr.bf16.mxu1 %v4353_v30 }
  0x37   :  { %3348 = vmatmul.mubr.msk.bf16.gmra.mxu0 %vm118_vm0, %v3622_v13  ;;  %3352 = vmatmul.mubr.msk.bf16.gmra.mxu1 %vm118_vm0, %v3622_v13  ;;  %v4602_v13 = vld [vmem:[%s6269_s6 + $0x4c] ss:$16 sps:$4 sm:$0xff]  }
  0x38   :  { %773 = vmatpush1.bf16.msra.mxu0 %v4362_v31  ;;  %814 = vmatpush1.bf16.msra.mxu1 %v4367_v32 }
  0x39   :  { %774 = vmatprep.subr.bf16.mxu0 %v4379_v34  ;;  %815 = vmatprep.subr.bf16.mxu1 %v4384_v35 }
  0x3a   :  { %417 = vmatprep.mubr.bf16.mxu0 %v6277_v1  ;;  %490 = vmatprep.mubr.bf16.mxu1 %v6277_v1 }
  0x3c   :  { %775 = vmatpush1.bf16.msra.mxu0 %v4395_v36  ;;  %816 = vmatpush1.bf16.msra.mxu1 %v4400_v37 }
  0x3d   :  { %776 = vmatprep.subr.bf16.mxu0 %v4409_v40  ;;  %817 = vmatprep.subr.bf16.mxu1 %v4414_v41 }
  0x3f   :  { %3349 = vmatmul.mubr.msk.bf16.gmra.mxu0 %vm118_vm0, %v4249_v14  ;;  %3353 = vmatmul.mubr.msk.bf16.gmra.mxu1 %vm118_vm0, %v4249_v14  ;;  %v4609_v14 = vld [vmem:[%s6269_s6 + $0x40] ss:$16 sps:$4 sm:$0xff]  }
  0x40   :  { %777 = vmatpush1.bf16.msra.mxu0 %v4423_v42  ;;  %818 = vmatpush1.bf16.msra.mxu1 %v4428_v43 }
  0x41   :  { %778 = vmatprep.subr.bf16.mxu0 %v4435_v44  ;;  %819 = vmatprep.subr.bf16.mxu1 %v4440_v45 }
  0x42   :  { %796 = vmatprep.mubr.bf16.mxu0 %v6277_v1  ;;  %837 = vmatprep.mubr.bf16.mxu1 %v6277_v1 }
  0x44   :  { %779 = vmatpush1.bf16.msra.mxu0 %v4453_v46  ;;  %820 = vmatpush1.bf16.msra.mxu1 %v4458_v47 }
  0x45   :  { %1054 = vmatprep.subr.bf16.mxu0 %v4467_v50  ;;  %1095 = vmatprep.subr.bf16.mxu1 %v4472_v51 }
  0x47   :  { %797 = vmatmul.mubr.bf16.vlgmr.msra.gmra.mxu0 %v6279_v56  ;;  %838 = vmatmul.mubr.bf16.vlgmr.msra.gmra.mxu1 %v6279_v56  ;;  %v4657_v56 = vld [vmem:[%s6269_s6] ss:$16 sps:$4 sm:$0xff]  }
  0x48   :  { %1055 = vmatpush1.bf16.msra.mxu0 %v4481_v52  ;;  %1096 = vmatpush1.bf16.msra.mxu1 %v4486_v53 }
  0x49   :  { %1056 = vmatprep.subr.bf16.mxu0 %v4493_v54  ;;  %1097 = vmatprep.subr.bf16.mxu1 %v4498_v55 }
  0x4a   :  { %1086 = vmatprep.mubr.bf16.mxu0 %v6277_v1  ;;  %1127 = vmatprep.mubr.bf16.mxu1 %v6277_v1  ;;  %v4650_v1 = vld [vmem:[%s6269_s6 + $0xc] ss:$16 sps:$4 sm:$0xff]  }
  0x4b   :  { %6427 = vst [vmem:[#allocation39_spill] sm:$0xff] %v4650_v1 }
  0x4c   :  { %1057 = vmatpush1.bf16.msra.mxu0 %v4508_v57  ;;  %1098 = vmatpush1.bf16.msra.mxu1 %v4513_v58 }
  0x4d   :  { %1058 = vmatprep.subr.bf16.mxu0 %v4521_v60  ;;  %1099 = vmatprep.subr.bf16.mxu1 %v4526_v61 }
  0x50   :  { %1059 = vmatpush1.bf16.msra.mxu0 %v4536_v62  ;;  %1100 = vmatpush1.bf16.msra.mxu1 %v4541_v63 }
  0x51   :  { %1060 = vmatprep.subr.bf16.mxu0 %v4549_v2  ;;  %1101 = vmatprep.subr.bf16.mxu1 %v4554_v3 }
  0x54   :  { %1061 = vmatpush1.bf16.msra.mxu0 %v4561_v4  ;;  %1102 = vmatpush1.bf16.msra.mxu1 %v4566_v5 }
  0x55   :  { %1062 = vmatprep.subr.bf16.mxu0 %v4573_v6  ;;  %1103 = vmatprep.subr.bf16.mxu1 %v4578_v7 }
  0x58   :  { %1063 = vmatpush1.bf16.msra.mxu0 %v4585_v8  ;;  %1104 = vmatpush1.bf16.msra.mxu1 %v4590_v9 }
  0x59   :  { %1064 = vmatprep.subr.bf16.mxu0 %v4597_v11  ;;  %1105 = vmatprep.subr.bf16.mxu1 %v4602_v13 }
  0x5c   :  { %1065 = vmatpush1.bf16.msra.mxu0 %v4609_v14  ;;  %1106 = vmatpush1.bf16.msra.mxu1 %v4614_v38 }
  0x5d   :  { %1066 = vmatprep.subr.bf16.mxu0 %v4621_v39  ;;  %1107 = vmatprep.subr.bf16.mxu1 %v4626_v48  ;;  %v4662_v48 = vld [vmem:[%s6269_s6 + $0x8] ss:$16 sps:$4 sm:$0xff]  }
  0x60   :  { %1067 = vmatpush1.bf16.msra.mxu0 %v4633_v49  ;;  %1108 = vmatpush1.bf16.msra.mxu1 %v4638_v59  ;;  %v6428_v59 = vmov 0.0|0.0  }
  0x61   :  { %1068 = vmatprep.subr.bf16.mxu0 %v4645_v0  ;;  %1109 = vmatprep.subr.bf16.mxu1 %v4650_v1  ;;  %v6429_v1 = vmov 0  }
  0x64   :  { %1069 = vmatpush1.bf16.msra.mxu0 %v4657_v56  ;;  %1110 = vmatpush1.bf16.msra.mxu1 %v4662_v48 }
  0x65   :  { %1185 = vmatprep.subr.bf16.mxu0 %v4223_v10  ;;  %1226 = vmatprep.subr.bf16.mxu1 %v4231_v12  ;;  %v58_v10 = vlaneseq }
  0x67   :  { %1087 = vmatmul.mubr.bf16.vlgmr.msra.gmra.mxu0 %v6428_v59  ;;  %1128 = vmatmul.mubr.bf16.vlgmr.msra.gmra.mxu1 %v6428_v59  ;;  %v4706_v12 = vshrl.u32 %v58_v10, 7 }
  0x68   :  { %1186 = vmatpush1.bf16.msra.mxu0 %v4260_v15  ;;  %1227 = vmatpush1.bf16.msra.mxu1 %v4265_v16 }
  0x69   :  { %1187 = vmatprep.subr.bf16.mxu0 %v4270_v17  ;;  %1228 = vmatprep.subr.bf16.mxu1 %v4275_v18  ;;  %v6299_v59 = vsub.s32 2, %v4706_v12  ;;  %v6308_v10 = vsub.s32 1, %v4706_v12 }
  0x6a   :  { %1217 = vmatprep.mubr.bf16.mxu0 %v6429_v1  ;;  %1258 = vmatprep.mubr.bf16.mxu1 %v6429_v1 }
  0x6c   :  { %1188 = vmatpush1.bf16.msra.mxu0 %v4282_v19  ;;  %1229 = vmatpush1.bf16.msra.mxu1 %v4289_v20 }
  0x6d   :  { %1189 = vmatprep.subr.bf16.mxu0 %v4294_v21  ;;  %1230 = vmatprep.subr.bf16.mxu1 %v4301_v22 }
  0x70   :  { %1190 = vmatpush1.bf16.msra.mxu0 %v4308_v23  ;;  %1231 = vmatpush1.bf16.msra.mxu1 %v4313_v24 }
  0x71   :  { %1191 = vmatprep.subr.bf16.mxu0 %v4320_v25  ;;  %1232 = vmatprep.subr.bf16.mxu1 %v4327_v26 }
  0x74   :  { %1192 = vmatpush1.bf16.msra.mxu0 %v4334_v27  ;;  %1233 = vmatpush1.bf16.msra.mxu1 %v4341_v28 }
  0x75   :  { %1193 = vmatprep.subr.bf16.mxu0 %v4346_v29  ;;  %1234 = vmatprep.subr.bf16.mxu1 %v4353_v30 }
  0x78   :  { %1194 = vmatpush1.bf16.msra.mxu0 %v4362_v31  ;;  %1235 = vmatpush1.bf16.msra.mxu1 %v4367_v32 }
  0x79   :  { %1195 = vmatprep.subr.bf16.mxu0 %v4379_v34  ;;  %1236 = vmatprep.subr.bf16.mxu1 %v4384_v35 }
  0x7c   :  { %1196 = vmatpush1.bf16.msra.mxu0 %v4395_v36  ;;  %1237 = vmatpush1.bf16.msra.mxu1 %v4400_v37 }
  0x7d   :  { %1197 = vmatprep.subr.bf16.mxu0 %v4409_v40  ;;  %1238 = vmatprep.subr.bf16.mxu1 %v4414_v41  ;;  %v6430_v41 = vsub.s32 3, %v4706_v12 }
  0x80   :  { %1198 = vmatpush1.bf16.msra.mxu0 %v4423_v42  ;;  %1239 = vmatpush1.bf16.msra.mxu1 %v4428_v43  ;;  %v6304_v42 = vsub.s32 0, %v4706_v12 }
  0x81   :  { %1199 = vmatprep.subr.bf16.mxu0 %v4435_v44  ;;  %1240 = vmatprep.subr.bf16.mxu1 %v4440_v45  ;;  %v56_v45 = vld [vmem:[%s6271_s4] sm:$0xf] }
  0x82   :  { %v4729_v43 = vrot.slane %v56_v45, %v6304_v42  ;;  %v4733_v40 = vrot.slane %v56_v45, %v6430_v41 }
  0x84   :  { %1200 = vmatpush1.bf16.msra.mxu0 %v4453_v46  ;;  %1241 = vmatpush1.bf16.msra.mxu1 %v4458_v47 }
  0x85   :  { %1316 = vmatprep.subr.bf16.mxu0 %v4467_v50  ;;  %1357 = vmatprep.subr.bf16.mxu1 %v4472_v51  ;;  %v4720_v51 = vrot.slane %v56_v45, %v6299_v59  ;;  %v4737_v59 = vrot.slane %v56_v45, %v6308_v10 }
  0xc7   :  { %v4714_v46 = vpop.f32.mrf.mxu0  ;;  %v4716_v47 = vpop.f32.mrf.mxu1 }
  0xc8   :  { %v239_v20 = vadd.f32 %v4716_v47, %v4720_v51 }
  0xc9   :  { %v4723_v50 = vpop.f32.mrf.mxu0  ;;  %v4725_v44 = vpop.f32.mrf.mxu1 }
  0xcb   :  { %v169_v37 = vpop.f32.mrf.mxu0  ;;  %v242_v36 = vpop.f32.mrf.mxu1 }
  0xcc   :  { %v4740_v35 = vadd.f32 %v169_v37, %v4729_v43  ;;  %v4743_v34 = vadd.f32 %v242_v36, %v4720_v51 }
  0xcd   :  { %v171_v32 = vpop.f32.mrf.mxu0  ;;  %v244_v31 = vpop.f32.mrf.mxu1 }
  0xce   :  { %6431 = vst [vmem:[#allocation40_spill] sm:$0xff] %v4740_v35  ;;  %6432 = vst [vmem:[#allocation41_spill] sm:$0xff] %v4743_v34  ;;  %v4746_v42 = vadd.f32 %v171_v32, %v4737_v59  ;;  %v4749_v41 = vadd.f32 %v244_v31, %v4733_v40 }
  0xcf   :  { %v175_v30 = vpop.f32.mrf.mxu0  ;;  %v248_v29 = vpop.f32.mrf.mxu1 }
  0xd0   :  { %6433 = vst [vmem:[#allocation42_spill] sm:$0xff] %v4746_v42  ;;  %6434 = vst [vmem:[#allocation43_spill] sm:$0xff] %v4749_v41  ;;  %v4752_v28 = vadd.f32 %v175_v30, %v4729_v43  ;;  %v4755_v45 = vadd.f32 %v248_v29, %v4720_v51 }
  0xd1   :  { %v177_v37 = vpop.f32.mrf.mxu0  ;;  %v250_v10 = vpop.f32.mrf.mxu1 }
  0xd2   :  { %6435 = vst [vmem:[#allocation44_spill] sm:$0xff] %v4752_v28  ;;  %6436 = vst [vmem:[#allocation45_spill] sm:$0xff] %v4755_v45  ;;  %v4758_v36 = vadd.f32 %v177_v37, %v4737_v59  ;;  %v4761_v34 = vadd.f32 %v250_v10, %v4733_v40 }
  0xd3   :  { %v179_v32 = vpop.f32.mrf.mxu0  ;;  %v252_v42 = vpop.f32.mrf.mxu1 }
  0xd4   :  { %6437 = vst [vmem:[#allocation46_spill] sm:$0xff] %v4758_v36  ;;  %6438 = vst [vmem:[#allocation47_spill] sm:$0xff] %v4761_v34  ;;  %v4764_v31 = vadd.f32 %v179_v32, %v4729_v43  ;;  %v4767_v41 = vadd.f32 %v252_v42, %v4720_v51 }
  0xd5   :  { %v181_v30 = vpop.f32.mrf.mxu0  ;;  %v254_v28 = vpop.f32.mrf.mxu1 }
  0xd6   :  { %6439 = vst [vmem:[#allocation48_spill] sm:$0xff] %v4764_v31  ;;  %6440 = vst [vmem:[#allocation49_spill] sm:$0xff] %v4767_v41  ;;  %v4770_v29 = vadd.f32 %v181_v30, %v4737_v59  ;;  %v4773_v45 = vadd.f32 %v254_v28, %v4733_v40 }
  0xd7   :  { %v185_v37 = vpop.f32.mrf.mxu0  ;;  %v258_v36 = vpop.f32.mrf.mxu1 }
  0xd8   :  { %6441 = vst [vmem:[#allocation50_spill] sm:$0xff] %v4770_v29  ;;  %6442 = vst [vmem:[#allocation51_spill] sm:$0xff] %v4773_v45  ;;  %v4776_v10 = vadd.f32 %v185_v37, %v4729_v43  ;;  %v4779_v34 = vadd.f32 %v258_v36, %v4720_v51 }
  0xd9   :  { %v187_v32 = vpop.f32.mrf.mxu0  ;;  %v260_v31 = vpop.f32.mrf.mxu1 }
  0xda   :  { %6443 = vst [vmem:[#allocation52_spill] sm:$0xff] %v4776_v10  ;;  %6444 = vst [vmem:[#allocation53_spill] sm:$0xff] %v4779_v34  ;;  %v4782_v42 = vadd.f32 %v187_v32, %v4737_v59  ;;  %v4785_v41 = vadd.f32 %v260_v31, %v4733_v40 }
  0xdb   :  { %v189_v30 = vpop.f32.mrf.mxu0  ;;  %v262_v29 = vpop.f32.mrf.mxu1 }
  0xdc   :  { %6445 = vst [vmem:[#allocation54_spill] sm:$0xff] %v4782_v42  ;;  %6446 = vst [vmem:[#allocation55_spill] sm:$0xff] %v4785_v41  ;;  %v4788_v28 = vadd.f32 %v189_v30, %v4729_v43  ;;  %v4791_v45 = vadd.f32 %v262_v29, %v4720_v51  ;;  %v313_v29 = vld [vmem:[%s6272_s7] sm:$0xf] }
  0xdd   :  { %v191_v37 = vpop.f32.mrf.mxu0  ;;  %v264_v10 = vpop.f32.mrf.mxu1 }
  0xde   :  { %6447 = vst [vmem:[#allocation56_spill] sm:$0xff] %v4788_v28  ;;  %6448 = vst [vmem:[#allocation57_spill] sm:$0xff] %v4791_v45  ;;  %v4794_v36 = vadd.f32 %v191_v37, %v4737_v59  ;;  %v4797_v34 = vadd.f32 %v264_v10, %v4733_v40 }
  0xdf   :  { %v195_v32 = vpop.f32.mrf.mxu0  ;;  %v268_v42 = vpop.f32.mrf.mxu1 }
  0xe0   :  { %6449 = vst [vmem:[#allocation58_spill] sm:$0xff] %v4794_v36  ;;  %6450 = vst [vmem:[#allocation59_spill] sm:$0xff] %v4797_v34  ;;  %v4800_v31 = vadd.f32 %v195_v32, %v4729_v43  ;;  %v4803_v41 = vadd.f32 %v268_v42, %v4720_v51  ;;  %v1689_v42 = vsel %vm1688_vm7, 1, %v6429_v1  ;;  %v1951_v36 = vsel %vm1950_vm8, 1, %v6429_v1 }
  0xe1   :  { %v197_v30 = vpop.f32.mrf.mxu0  ;;  %v270_v28 = vpop.f32.mrf.mxu1  ;;  %1691 = vperm.xlu1 %3610, %v1689_v42  }
  0xe2   :  { %6451 = vst [vmem:[#allocation60_spill] sm:$0xff] %v4800_v31  ;;  %6452 = vst [vmem:[#allocation61_spill] sm:$0xff] %v4803_v41  ;;  %v4809_v37 = vadd.f32 %v197_v30, %v4737_v59  ;;  %v4812_v10 = vadd.f32 %v270_v28, %v4733_v40  ;;  %v6457_v30 = vsub.s32 0, %v4706_v12  ;;  %v6458_v28 = vsub.s32 2, %v4706_v12 }
  0xe3   :  { %v199_v32 = vpop.f32.mrf.mxu0  ;;  %v272_v31 = vpop.f32.mrf.mxu1 }
  0xe4   :  { %6453 = vst [vmem:[#allocation62_spill] sm:$0xff] %v4809_v37  ;;  %6454 = vst [vmem:[#allocation63_spill] sm:$0xff] %v4812_v10  ;;  %v4818_v41 = vadd.f32 %v199_v32, %v4729_v43  ;;  %v4821_v45 = vadd.f32 %v272_v31, %v4720_v51  ;;  %v4825_v37 = vrot.slane %v313_v29, %v6457_v30  ;;  %v6461_v31 = vsub.s32 1, %v4706_v12 }
  0xe5   :  { %v4829_v10 = vrot.slane %v313_v29, %v6458_v28  ;;  %v201_v33 = vpop.f32.mrf.mxu0  ;;  %v274_v34 = vpop.f32.mrf.mxu1  ;;  %v6462_v30 = vsub.s32 3, %v4706_v12  ;;  %1953 = vperm.xlu1 %3610, %v1951_v36  }
  0xe6   :  { %6455 = vst [vmem:[#allocation64_spill] sm:$0xff] %v4818_v41  ;;  %6456 = vst [vmem:[#allocation65_spill] sm:$0xff] %v4821_v45  ;;  %v4833_v35 = vadd.f32 %v201_v33, %v4737_v59  ;;  %v4836_v32 = vadd.f32 %v274_v34, %v4733_v40  ;;  %v4840_v45 = vrot.slane %v313_v29, %v6461_v31 }
  0xe7   :  { %v4844_v41 = vrot.slane %v313_v29, %v6462_v30  ;;  %v389_v28 = vpop.f32.mrf.mxu0  ;;  %v462_v42 = vpop.f32.mrf.mxu1 }
  0xe8   :  { %6459 = vst [vmem:[#allocation66_spill] sm:$0xff] %v4833_v35  ;;  %6460 = vst [vmem:[#allocation67_spill] sm:$0xff] %v4836_v32  ;;  %v4847_v27 = vadd.f32 %v389_v28, %v4825_v37  ;;  %v4850_v26 = vadd.f32 %v462_v42, %v4829_v10 }
  0xe9   :  { %v391_v33 = vpop.f32.mrf.mxu0  ;;  %v464_v34 = vpop.f32.mrf.mxu1 }
  0xea   :  { %6463 = vst [vmem:[#allocation68_spill] sm:$0xff] %v4847_v27  ;;  %6464 = vst [vmem:[#allocation69_spill] sm:$0xff] %v4850_v26  ;;  %v4853_v32 = vadd.f32 %v391_v33, %v4840_v45  ;;  %v4856_v31 = vadd.f32 %v464_v34, %v4844_v41 }
  0xeb   :  { %v393_v12 = vpop.f32.mrf.mxu0  ;;  %v466_v29 = vpop.f32.mrf.mxu1 }
  0xec   :  { %6465 = vst [vmem:[#allocation70_spill] sm:$0xff] %v4853_v32  ;;  %6466 = vst [vmem:[#allocation71_spill] sm:$0xff] %v4856_v31  ;;  %v4859_v30 = vadd.f32 %v393_v12, %v4825_v37  ;;  %v4862_v28 = vadd.f32 %v466_v29, %v4829_v10 }
  0xed   :  { %v395_v27 = vpop.f32.mrf.mxu0  ;;  %v468_v42 = vpop.f32.mrf.mxu1 }
  0xee   :  { %6467 = vst [vmem:[#allocation72_spill] sm:$0xff] %v4859_v30  ;;  %6468 = vst [vmem:[#allocation73_spill] sm:$0xff] %v4862_v28  ;;  %v4865_v36 = vadd.f32 %v395_v27, %v4840_v45  ;;  %v4868_v26 = vadd.f32 %v468_v42, %v4844_v41 }
  0xef   :  { %v399_v33 = vpop.f32.mrf.mxu0  ;;  %v472_v32 = vpop.f32.mrf.mxu1 }
  0xf0   :  { %6469 = vst [vmem:[#allocation74_spill] sm:$0xff] %v4865_v36  ;;  %6470 = vst [vmem:[#allocation75_spill] sm:$0xff] %v4868_v26  ;;  %v4871_v34 = vadd.f32 %v399_v33, %v4825_v37  ;;  %v4874_v31 = vadd.f32 %v472_v32, %v4829_v10 }
  0xf1   :  { %v401_v12 = vpop.f32.mrf.mxu0  ;;  %v474_v35 = vpop.f32.mrf.mxu1 }
  0xf2   :  { %6471 = vst [vmem:[#allocation76_spill] sm:$0xff] %v4871_v34  ;;  %6472 = vst [vmem:[#allocation77_spill] sm:$0xff] %v4874_v31  ;;  %v4877_v29 = vadd.f32 %v401_v12, %v4840_v45  ;;  %v4880_v28 = vadd.f32 %v474_v35, %v4844_v41 }
  0xf3   :  { %v403_v27 = vpop.f32.mrf.mxu0  ;;  %v476_v36 = vpop.f32.mrf.mxu1 }
  0xf4   :  { %6473 = vst [vmem:[#allocation78_spill] sm:$0xff] %v4877_v29  ;;  %6474 = vst [vmem:[#allocation79_spill] sm:$0xff] %v4880_v28  ;;  %v4883_v42 = vadd.f32 %v403_v27, %v4825_v37  ;;  %v4886_v26 = vadd.f32 %v476_v36, %v4829_v10 }
  0xf5   :  { %v405_v33 = vpop.f32.mrf.mxu0  ;;  %v478_v30 = vpop.f32.mrf.mxu1 }
  0xf6   :  { %6475 = vst [vmem:[#allocation80_spill] sm:$0xff] %v4883_v42  ;;  %6476 = vst [vmem:[#allocation81_spill] sm:$0xff] %v4886_v26  ;;  %v4889_v32 = vadd.f32 %v405_v33, %v4840_v45  ;;  %v4892_v31 = vadd.f32 %v478_v30, %v4844_v41 }
  0xf7   :  { %v409_v12 = vpop.f32.mrf.mxu0  ;;  %v482_v29 = vpop.f32.mrf.mxu1 }
  0xf8   :  { %6477 = vst [vmem:[#allocation82_spill] sm:$0xff] %v4889_v32  ;;  %6478 = vst [vmem:[#allocation83_spill] sm:$0xff] %v4892_v31  ;;  %v4895_v35 = vadd.f32 %v409_v12, %v4825_v37  ;;  %v4898_v28 = vadd.f32 %v482_v29, %v4829_v10 }
  0xf9   :  { %v411_v27 = vpop.f32.mrf.mxu0  ;;  %v484_v34 = vpop.f32.mrf.mxu1 }
  0xfa   :  { %6479 = vst [vmem:[#allocation84_spill] sm:$0xff] %v4895_v35  ;;  %6480 = vst [vmem:[#allocation85_spill] sm:$0xff] %v4898_v28  ;;  %v4901_v36 = vadd.f32 %v411_v27, %v4840_v45  ;;  %v4904_v26 = vadd.f32 %v484_v34, %v4844_v41 }
  0xfb   :  { %v413_v33 = vpop.f32.mrf.mxu0  ;;  %v486_v32 = vpop.f32.mrf.mxu1 }
  0xfc   :  { %6481 = vst [vmem:[#allocation86_spill] sm:$0xff] %v4901_v36  ;;  %6482 = vst [vmem:[#allocation87_spill] sm:$0xff] %v4904_v26  ;;  %v4907_v30 = vadd.f32 %v413_v33, %v4825_v37  ;;  %v4910_v31 = vadd.f32 %v486_v32, %v4829_v10 }
  0xfd   :  { %v415_v12 = vpop.f32.mrf.mxu0  ;;  %v488_v42 = vpop.f32.mrf.mxu1 }
  0xfe   :  { %6483 = vst [vmem:[#allocation88_spill] sm:$0xff] %v4907_v30  ;;  %6484 = vst [vmem:[#allocation89_spill] sm:$0xff] %v4910_v31  ;;  %v4913_v29 = vadd.f32 %v415_v12, %v4840_v45  ;;  %v4916_v28 = vadd.f32 %v488_v42, %v4844_v41  ;;  %v166_v30 = vadd.f32 %v4714_v46, %v4729_v43 }
  0xff   :  { %v419_v27 = vpop.f32.mrf.mxu0  ;;  %v492_v36 = vpop.f32.mrf.mxu1  ;;  %v241_v43 = vadd.f32 %v4725_v44, %v4733_v40 }
 0x100   :  { %6485 = vst [vmem:[#allocation90_spill] sm:$0xff] %v4913_v29  ;;  %6486 = vst [vmem:[#allocation91_spill] sm:$0xff] %v4916_v28  ;;  %v4919_v34 = vadd.f32 %v419_v27, %v4825_v37  ;;  %v4922_v26 = vadd.f32 %v492_v36, %v4829_v10  ;;  %v168_v36 = vadd.f32 %v4723_v50, %v4737_v59 }
 0x101   :  { %v421_v33 = vpop.f32.mrf.mxu0  ;;  %v494_v35 = vpop.f32.mrf.mxu1 }
 0x102   :  { %6487 = vst [vmem:[#allocation92_spill] sm:$0xff] %v4919_v34  ;;  %6488 = vst [vmem:[#allocation93_spill] sm:$0xff] %v4922_v26  ;;  %v4925_v32 = vadd.f32 %v421_v33, %v4840_v45  ;;  %v4928_v31 = vadd.f32 %v494_v35, %v4844_v41 }
 0x103   :  { %v423_v12 = vpop.f32.mrf.mxu0  ;;  %v496_v29 = vpop.f32.mrf.mxu1 }
 0x104   :  { %6489 = vst [vmem:[#allocation94_spill] sm:$0xff] %v4925_v32  ;;  %6490 = vst [vmem:[#allocation95_spill] sm:$0xff] %v4928_v31 }
 0x105   :  { %v425_v42 = vpop.f32.mrf.mxu0  ;;  %v498_v28 = vpop.f32.mrf.mxu1 }
 0x107   :  { %v798_v27 = vpop.f32.mrf.mxu0  ;;  %v839_v34 = vpop.f32.mrf.mxu1 }
 0x108   :  { %v846_v26 = vadd.f32 %v798_v27, %v166_v30  ;;  %v848_v30 = vadd.f32 %v839_v34, %v239_v20 }
 0x109   :  { %v800_v25 = vpop.f32.mrf.mxu0  ;;  %v841_v24 = vpop.f32.mrf.mxu1 }
 0x10a   :  { %v3386_v33 = vmul.f32 -1.442695, %v846_v26  ;;  %v847_v32 = vadd.f32 %v800_v25, %v168_v36  ;;  %v849_v46 = vadd.f32 %v841_v24, %v241_v43  ;;  %v426_v24 = vadd.f32 %v425_v42, %v4840_v45 }
 0x10b   :  { %v802_v23 = vpop.f32.mrf.mxu0  ;;  %v843_v35 = vpop.f32.mrf.mxu1  ;;  %v499_v45 = vadd.f32 %v498_v28, %v4844_v41 }
 0x10c   :  { %3739 = vpow2.f32 %v3386_v33  ;;  %v3387_v31 = vmul.f32 -1.442695, %v847_v32  ;;  %v3388_v50 = vmul.f32 -1.442695, %v849_v46 }
 0x10d   :  { %v803_v22 = vpop.f32.mrf.mxu0  ;;  %v844_v21 = vpop.f32.mrf.mxu1 }
 0x10e   :  { %3741 = vpow2.f32 %v3387_v31  ;;  %v424_v21 = vadd.f32 %v423_v12, %v4825_v37 }
 0x10f   :  { %3743 = vpow2.f32 %v3388_v50 }
 0x119   :  { %v3740_v59 = vpop.eup %3739 }
 0x11a   :  { %v853_v27 = vadd.f32 1.0, %v3740_v59 }
 0x11b   :  { %v3742_v26 = vpop.eup %3741 }
 0x11c   :  { %3745 = vrcp.f32 %v853_v27  ;;  %v859_v23 = vadd.f32 1.0, %v3742_v26  ;;  %v3744_v31 = vpop.eup %3743  ;;  %v497_v27 = vadd.f32 %v496_v29, %v4829_v10 }
 0x11d   :  { %3747 = vtanh.f32 %v848_v30  ;;  %v866_v33 = vadd.f32 1.0, %v3744_v31 }
 0x11e   :  { %3749 = vrcp.f32 %v859_v23 }
 0x127   :  { %v1088_v22 = vpop.f32.mrf.mxu0  ;;  %v1129_v25 = vpop.f32.mrf.mxu1 }
 0x128   :  { %v1136_v40 = vadd.f32 %v1088_v22, %v424_v21  ;;  %v1138_v21 = vadd.f32 %v1129_v25, %v497_v27  ;;  %v6498_v27 = vld [vmem:[#allocation10_spill] sm:$0xff] }
 0x129   :  { %v3746_v44 = vpop.eup %3745  ;;  %v1090_v47 = vpop.f32.mrf.mxu0 }
 0x12a   :  { %v1131_v51 = vpop.f32.mrf.mxu1  ;;  %v3748_v32 = vpop.eup %3747  ;;  %v3421_v20 = vmul.f32 -1.442695, %v1136_v40  ;;  %v1137_v34 = vadd.f32 %v1090_v47, %v426_v24 }
 0x12b   :  { %v3750_v36 = vpop.eup %3749  ;;  %v1092_v35 = vpop.f32.mrf.mxu0  ;;  %v870_v43 = vmul.f32 %v3748_v32, %v3746_v44  ;;  %v1139_v42 = vadd.f32 %v1131_v51, %v499_v45  ;;  %v5000_v45 = vld [vmem:[%s6268_s3 + $0xe4] ss:$16 sps:$4 sm:$0xff]  }
 0x12c   :  { %v1133_v46 = vpop.f32.mrf.mxu1  ;;  %3751 = vpow2.f32 %v3421_v20  ;;  %v3422_v50 = vmul.f32 -1.442695, %v1137_v34  ;;  %v869_v37 = vmul.f32 0.0, %v3750_v36  ;;  %v4945_v24 = vpop.permute.xlu0 %877  ;;  %v6494_v35 = vld [vmem:[#allocation38_spill] sm:$0xff] }
 0x12d   :  { %v1093_v12 = vpop.f32.mrf.mxu0  ;;  %v3423_v26 = vmul.f32 -1.442695, %v1139_v42  ;;  %6491 = vst [vmem:[#allocation96_spill] sm:$0xff] %v4945_v24  ;;  %vm879_vm9 = vcmp.eq.s32.totalorder %v4945_v24, 1  ;;  %v6495_v46 = vld [vmem:[#allocation39_spill] sm:$0xff] }
 0x12e   :  { %v1134_v59 = vpop.f32.mrf.mxu1  ;;  %3753 = vpow2.f32 %v3422_v50  ;;  %v4940_v30 = vadd.f32 %v870_v43, %v869_v37  ;;  %vm3499_vm10 = vmpackc.low %vm879_vm9, %vm879_vm9  ;;  %v5006_v42 = vld [vmem:[%s6268_s3 + $0xec] ss:$16 sps:$4 sm:$0xff]  }
 0x12f   :  { %3755 = vrcp.f32 %v866_v33  ;;  %v6493_v33 = vld [vmem:[#allocation37_spill] sm:$0xff] }
 0x130   :  { %3757 = vtanh.f32 %v4940_v30  ;;  %v4988_v37 = vpop.permute.xlu0 %1167 }
 0x131   :  { %3759 = vpow2.f32 %v3423_v26  ;;  %6496 = vst [vmem:[#allocation37_spill] sm:$0xff] %v4988_v37  ;;  %vm1169_vm11 = vcmp.eq.s32.totalorder %v4988_v37, 1  ;;  %v6499_v26 = vld [vmem:[#allocation11_spill] sm:$0xff] }
 0x132   :  { %vm3505_vm12 = vmpackc.low %vm1169_vm11, %vm1169_vm11 }
 0x139   :  { %v3752_v23 = vpop.eup %3751 }
 0x13a   :  { %v1143_v22 = vadd.f32 1.0, %v3752_v23  ;;  %v6500_v23 = vld [vmem:[#allocation12_spill] sm:$0xff] }
 0x13b   :  { %v3754_v31 = vpop.eup %3753 }
 0x13c   :  { %v3756_v40 = vpop.eup %3755  ;;  %3761 = vrcp.f32 %v1143_v22  ;;  %v1149_v44 = vadd.f32 1.0, %v3754_v31  ;;  %v6506_v22 = vld [vmem:[#allocation18_spill] sm:$0xff]  ;;  %v6507_v31 = vld [vmem:[#allocation19_spill] sm:$0xff] }
 0x13d   :  { %v3758_v47 = vpop.eup %3757  ;;  %3763 = vtanh.f32 %v1138_v21  ;;  %v6501_v21 = vld [vmem:[#allocation13_spill] sm:$0xff] }
 0x13e   :  { %3765 = vrcp.f32 %v1149_v44  ;;  %v4947_v32 = vmul.f32 %v3758_v47, %v3756_v40  ;;  %v3760_v10 = vpop.eup %3759  ;;  %v6509_v40 = vld [vmem:[#allocation21_spill] sm:$0xff]  ;;  %v6510_v44 = vld [vmem:[#allocation22_spill] sm:$0xff]  ;;  %v6511_v47 = vld [vmem:[#allocation23_spill] sm:$0xff] }
 0x13f   :  { %v1156_v51 = vadd.f32 1.0, %v3760_v10  ;;  %v6513_v10 = vld [vmem:[#allocation25_spill] sm:$0xff] }
 0x140   :  { %6492 = vst [vmem:[#allocation97_spill] sm:$0xff] %v4947_v32  ;;  %v3500_v41 = vpack.c.bf16 %v4947_v32, %v4947_v32 }
 0x141   :  { %3767 = vrcp.f32 %v1156_v51  ;;  %v6517_v51 = vld [vmem:[#allocation29_spill] sm:$0xff] }
 0x142   :  { %3501 = vmatmul.mubr.msk.bf16.vlgmr.msra.gmra.mxu0 %vm3499_vm10, %v3500_v41  ;;  %3504 = vmatmul.mubr.msk.bf16.vlgmr.msra.gmra.mxu1 %vm3499_vm10, %v3500_v41  ;;  %v6512_v41 = vld [vmem:[#allocation24_spill] sm:$0xff] }
 0x143   :  { %1317 = vmatpush1.bf16.msra.mxu0 %v4481_v52  ;;  %1358 = vmatpush1.bf16.msra.mxu1 %v4486_v53 }
 0x144   :  { %1318 = vmatprep.subr.bf16.mxu0 %v4493_v54  ;;  %1359 = vmatprep.subr.bf16.mxu1 %v4498_v55 }
 0x145   :  { %1348 = vmatprep.mubr.bf16.mxu0 %v6429_v1  ;;  %1389 = vmatprep.mubr.bf16.mxu1 %v6429_v1 }
 0x147   :  { %1319 = vmatpush1.bf16.msra.mxu0 %v4508_v57  ;;  %1360 = vmatpush1.bf16.msra.mxu1 %v4513_v58 }
 0x148   :  { %1320 = vmatprep.subr.bf16.mxu0 %v4521_v60  ;;  %1361 = vmatprep.subr.bf16.mxu1 %v4526_v61 }
 0x149   :  { %v3762_v28 = vpop.eup %3761 }
 0x14a   :  { %v3764_v29 = vpop.eup %3763 }
 0x14b   :  { %v3766_v25 = vpop.eup %3765  ;;  %1321 = vmatpush1.bf16.msra.mxu0 %v4536_v62  ;;  %1362 = vmatpush1.bf16.msra.mxu1 %v4541_v63  ;;  %v1160_v34 = vmul.f32 %v3764_v29, %v3762_v28  ;;  %v6514_v28 = vld [vmem:[#allocation26_spill] sm:$0xff]  ;;  %v6515_v29 = vld [vmem:[#allocation27_spill] sm:$0xff] }
 0x14c   :  { %v1159_v20 = vmul.f32 0.0, %v3766_v25  ;;  %1322 = vmatprep.subr.bf16.mxu0 %v4549_v2  ;;  %1363 = vmatprep.subr.bf16.mxu1 %v4554_v3  ;;  %v6516_v25 = vld [vmem:[#allocation28_spill] sm:$0xff] }
 0x14e   :  { %v4969_v36 = vadd.f32 %v1160_v34, %v1159_v20  ;;  %v3768_v43 = vpop.eup %3767  ;;  %v6518_v20 = vld [vmem:[#allocation30_spill] sm:$0xff]  ;;  %v6519_v34 = vld [vmem:[#allocation31_spill] sm:$0xff] }
 0x14f   :  { %1323 = vmatpush1.bf16.msra.mxu0 %v4561_v4  ;;  %1364 = vmatpush1.bf16.msra.mxu1 %v4566_v5 }
 0x150   :  { %3769 = vtanh.f32 %v4969_v36  ;;  %1324 = vmatprep.subr.bf16.mxu0 %v4573_v6  ;;  %1365 = vmatprep.subr.bf16.mxu1 %v4578_v7 }
 0x153   :  { %1325 = vmatpush1.bf16.msra.mxu0 %v4585_v8  ;;  %1366 = vmatpush1.bf16.msra.mxu1 %v4590_v9 }
 0x154   :  { %1326 = vmatprep.subr.bf16.mxu0 %v4597_v11  ;;  %1367 = vmatprep.subr.bf16.mxu1 %v4602_v13 }
 0x157   :  { %1327 = vmatpush1.bf16.msra.mxu0 %v4609_v14  ;;  %1368 = vmatpush1.bf16.msra.mxu1 %v4614_v38 }
 0x158   :  { %1328 = vmatprep.subr.bf16.mxu0 %v4621_v39  ;;  %1369 = vmatprep.subr.bf16.mxu1 %v6493_v33 }
 0x15b   :  { %1329 = vmatpush1.bf16.msra.mxu0 %v4633_v49  ;;  %1370 = vmatpush1.bf16.msra.mxu1 %v6494_v35 }
 0x15c   :  { %1330 = vmatprep.subr.bf16.mxu0 %v4645_v0  ;;  %1371 = vmatprep.subr.bf16.mxu1 %v6495_v46 }
 0x15d   :  { %v3770_v50 = vpop.eup %3769 }
 0x15e   :  { %v4990_v12 = vmul.f32 %v3770_v50, %v3768_v43  ;;  %v6520_v43 = vld [vmem:[#allocation32_spill] sm:$0xff]  ;;  %v6521_v50 = vld [vmem:[#allocation33_spill] sm:$0xff] }
 0x15f   :  { %1331 = vmatpush1.bf16.msra.mxu0 %v4657_v56  ;;  %1372 = vmatpush1.bf16.msra.mxu1 %v4662_v48 }
 0x160   :  { %6497 = vst [vmem:[#allocation38_spill] sm:$0xff] %v4990_v12  ;;  %v3506_v59 = vpack.c.bf16 %v4990_v12, %v4990_v12  ;;  %1447 = vmatprep.subr.bf16.mxu0 %v5000_v45  ;;  %1488 = vmatprep.subr.bf16.mxu1 %v5006_v42 }
 0x162   :  { %3507 = vmatmul.mubr.msk.bf16.vlgmr.msra.gmra.mxu0 %vm3505_vm12, %v3506_v59  ;;  %3510 = vmatmul.mubr.msk.bf16.vlgmr.msra.gmra.mxu1 %vm3505_vm12, %v3506_v59  ;;  %v6522_v59 = vld [vmem:[#allocation34_spill] sm:$0xff] }
 0x163   :  { %1448 = vmatpush1.bf16.msra.mxu0 %v4260_v15  ;;  %1489 = vmatpush1.bf16.msra.mxu1 %v4265_v16  ;;  %v6502_v15 = vld [vmem:[#allocation14_spill] sm:$0xff]  ;;  %v6503_v16 = vld [vmem:[#allocation15_spill] sm:$0xff] }
 0x164   :  { %1449 = vmatprep.subr.bf16.mxu0 %v4270_v17  ;;  %1490 = vmatprep.subr.bf16.mxu1 %v4275_v18  ;;  %v6504_v17 = vld [vmem:[#allocation16_spill] sm:$0xff]  ;;  %v6505_v18 = vld [vmem:[#allocation17_spill] sm:$0xff] }
 0x165   :  { %1479 = vmatprep.mubr.bf16.mxu0 %v6429_v1  ;;  %1520 = vmatprep.mubr.bf16.mxu1 %v6429_v1 }
 0x167   :  { %1450 = vmatpush1.bf16.msra.mxu0 %v4282_v19  ;;  %1491 = vmatpush1.bf16.msra.mxu1 %v6498_v27  ;;  %v6508_v19 = vld [vmem:[#allocation20_spill] sm:$0xff]  ;;  %v6523_v27 = vld [vmem:[#allocation35_spill] sm:$0xff] }
 0x168   :  { %1451 = vmatprep.subr.bf16.mxu0 %v6499_v26  ;;  %1492 = vmatprep.subr.bf16.mxu1 %v6500_v23  ;;  %v6524_v26 = vld [vmem:[#allocation36_spill] sm:$0xff] }
 0x16b   :  { %1452 = vmatpush1.bf16.msra.mxu0 %v6501_v21  ;;  %1493 = vmatpush1.bf16.msra.mxu1 %v6502_v15  ;;  %v6525_v15 = vld [vmem:[#allocation40_spill] sm:$0xff] }
 0x16c   :  { %1453 = vmatprep.subr.bf16.mxu0 %v6503_v16  ;;  %1494 = vmatprep.subr.bf16.mxu1 %v6504_v17 }
 0x16f   :  { %1454 = vmatpush1.bf16.msra.mxu0 %v6505_v18  ;;  %1495 = vmatpush1.bf16.msra.mxu1 %v6506_v22 }
 0x170   :  { %1455 = vmatprep.subr.bf16.mxu0 %v6507_v31  ;;  %1496 = vmatprep.subr.bf16.mxu1 %v6508_v19  ;;  %v6526_v31 = vld [vmem:[#allocation42_spill] sm:$0xff] }
 0x173   :  { %1456 = vmatpush1.bf16.msra.mxu0 %v6509_v40  ;;  %1497 = vmatpush1.bf16.msra.mxu1 %v6510_v44 }
 0x174   :  { %1457 = vmatprep.subr.bf16.mxu0 %v6511_v47  ;;  %1498 = vmatprep.subr.bf16.mxu1 %v6512_v41 }
 0x177   :  { %1458 = vmatpush1.bf16.msra.mxu0 %v6513_v10  ;;  %1499 = vmatpush1.bf16.msra.mxu1 %v6514_v28  ;;  %v6527_v28 = vld [vmem:[#allocation43_spill] sm:$0xff] }
 0x178   :  { %1459 = vmatprep.subr.bf16.mxu0 %v6515_v29  ;;  %1500 = vmatprep.subr.bf16.mxu1 %v6516_v25  ;;  %v6528_v25 = vld [vmem:[#allocation41_spill] sm:$0xff] }
 0x17b   :  { %1460 = vmatpush1.bf16.msra.mxu0 %v6517_v51  ;;  %1501 = vmatpush1.bf16.msra.mxu1 %v6518_v20 }
 0x17c   :  { %1461 = vmatprep.subr.bf16.mxu0 %v6519_v34  ;;  %1502 = vmatprep.subr.bf16.mxu1 %v6520_v43 }
 0x17f   :  { %1462 = vmatpush1.bf16.msra.mxu0 %v6521_v50  ;;  %1503 = vmatpush1.bf16.msra.mxu1 %v6522_v59 }
 0x180   :  { %1578 = vmatprep.subr.bf16.mxu0 %v6523_v27  ;;  %1619 = vmatprep.subr.bf16.mxu1 %v6524_v26 }
 0x202   :  { %v1219_v23 = vpop.f32.mrf.mxu0  ;;  %v1260_v21 = vpop.f32.mrf.mxu1 }
 0x203   :  { %v1267_v16 = vadd.f32 %v1219_v23, %v6525_v15  ;;  %v1269_v51 = vadd.f32 %v1260_v21, %v6528_v25 }
 0x204   :  { %v1221_v17 = vpop.f32.mrf.mxu0  ;;  %v1262_v18 = vpop.f32.mrf.mxu1 }
 0x205   :  { %v3424_v22 = vmul.f32 -1.442695, %v1267_v16  ;;  %v1268_v19 = vadd.f32 %v1221_v17, %v6526_v31  ;;  %v1270_v29 = vadd.f32 %v1262_v18, %v6527_v28  ;;  %v6529_v16 = vld [vmem:[#allocation92_spill] sm:$0xff] }
 0x206   :  { %v1223_v40 = vpop.f32.mrf.mxu0  ;;  %v1264_v44 = vpop.f32.mrf.mxu1 }
 0x207   :  { %3771 = vpow2.f32 %v3424_v22  ;;  %v3425_v47 = vmul.f32 -1.442695, %v1268_v19  ;;  %v3426_v20 = vmul.f32 -1.442695, %v1270_v29  ;;  %v6530_v40 = vld [vmem:[#allocation94_spill] sm:$0xff] }
 0x208   :  { %v1224_v41 = vpop.f32.mrf.mxu0  ;;  %v1265_v10 = vpop.f32.mrf.mxu1 }
 0x209   :  { %3773 = vpow2.f32 %v3425_v47  ;;  %v882_v41 = vsel %vm879_vm9, %v4940_v30, 0.0  ;;  %v6532_v30 = vld [vmem:[#allocation95_spill] sm:$0xff] }
 0x20a   :  { %3775 = vtanh.f32 %v1269_v51 }
 0x20b   :  { %3777 = vpow2.f32 %v3426_v20 }
 0x214   :  { %v3772_v34 = vpop.eup %3771 }
 0x215   :  { %v1274_v43 = vadd.f32 1.0, %v3772_v34 }
 0x216   :  { %v3774_v50 = vpop.eup %3773 }
 0x217   :  { %3779 = vrcp.f32 %v1274_v43  ;;  %v1280_v59 = vadd.f32 1.0, %v3774_v50  ;;  %v3776_v27 = vpop.eup %3775  ;;  %v5055_v43 = vpop.permute.xlu1 %1298 }
 0x218   :  { %v3778_v15 = vpop.eup %3777  ;;  %6531 = vst [vmem:[#allocation39_spill] sm:$0xff] %v5055_v43  ;;  %vm1300_vm13 = vcmp.eq.s32.totalorder %v5055_v43, 1  ;;  %v5493_v43 = vld [vmem:[%s6269_s6 + $0x48] ss:$16 sps:$4 sm:$0xff]  }
 0x219   :  { %3781 = vrcp.f32 %v1280_v59  ;;  %v1287_v10 = vadd.f32 1.0, %v3778_v15  ;;  %vm6130_vm3 = vmpackc.low %vm1300_vm13, %vm879_vm9 }
 0x222   :  { %v1350_v26 = vpop.f32.mrf.mxu0  ;;  %v1391_v23 = vpop.f32.mrf.mxu1 }
 0x223   :  { %v1398_v17 = vadd.f32 %v1350_v26, %v6529_v16  ;;  %v6533_v26 = vld [vmem:[#allocation93_spill] sm:$0xff] }
 0x224   :  { %v3780_v22 = vpop.eup %3779  ;;  %v1352_v31 = vpop.f32.mrf.mxu0  ;;  %v1400_v15 = vadd.f32 %v1391_v23, %v6533_v26  ;;  %v5287_v26 = vld [vmem:[%s6268_s3 + $0x28] ss:$16 sps:$4 sm:$0xff]  }
 0x225   :  { %v1393_v18 = vpop.f32.mrf.mxu1  ;;  %v1291_v19 = vmul.f32 %v3780_v22, %v3776_v27  ;;  %v3427_v21 = vmul.f32 -1.442695, %v1398_v17  ;;  %v1399_v44 = vadd.f32 %v1352_v31, %v6530_v40  ;;  %6557 = vst [vmem:[#allocation33_spill] sm:$0xff] %v5287_v26 }
 0x226   :  { %v3782_v47 = vpop.eup %3781  ;;  %v1354_v28 = vpop.f32.mrf.mxu0  ;;  %v1401_v27 = vadd.f32 %v1393_v18, %v6532_v30  ;;  %v5275_v30 = vld [vmem:[%s6268_s3 + $0x2c] ss:$16 sps:$4 sm:$0xff]  }
 0x227   :  { %v1395_v29 = vpop.f32.mrf.mxu1  ;;  %v1290_v25 = vmul.f32 %v3782_v47, %v882_v41  ;;  %3783 = vpow2.f32 %v3427_v21  ;;  %v3428_v51 = vmul.f32 -1.442695, %v1399_v44  ;;  %v880_v47 = vsel %vm879_vm9, %v4947_v32, 0.0  ;;  %6555 = vst [vmem:[#allocation31_spill] sm:$0xff] %v5275_v30  ;;  %v5487_v32 = vld [vmem:[%s6269_s6 + $0x40] ss:$16 sps:$4 sm:$0xff]  }
 0x228   :  { %v1355_v20 = vpop.f32.mrf.mxu0  ;;  %v3429_v16 = vmul.f32 -1.442695, %v1401_v27  ;;  %v5089_v29 = vpop.permute.xlu1 %1429  ;;  %v5281_v27 = vld [vmem:[%s6268_s3 + $0x20] ss:$16 sps:$4 sm:$0xff]  }
 0x229   :  { %v1396_v34 = vpop.f32.mrf.mxu1  ;;  %v1292_v50 = vadd.f32 %v1291_v19, %v1290_v25  ;;  %3785 = vpow2.f32 %v3428_v51  ;;  %6535 = vst [vmem:[#allocation11_spill] sm:$0xff] %v5089_v29  ;;  %vm1431_vm14 = vcmp.eq.s32.totalorder %v5089_v29, 1  ;;  %v5251_v51 = vld [vmem:[%s6268_s3 + $0x4c] ss:$16 sps:$4 sm:$0xff]   ;;  %v5257_v20 = vld [vmem:[%s6268_s3 + $0x40] ss:$16 sps:$4 sm:$0xff]  }
 0x22a   :  { %3787 = vrcp.f32 %v1287_v10  ;;  %6551 = vst [vmem:[#allocation27_spill] sm:$0xff] %v5251_v51  ;;  %6552 = vst [vmem:[#allocation28_spill] sm:$0xff] %v5257_v20  ;;  %v5263_v34 = vld [vmem:[%s6268_s3 + $0x48] ss:$16 sps:$4 sm:$0xff]   ;;  %v5499_v29 = vld [vmem:[%s6269_s6 + $0x24] ss:$16 sps:$4 sm:$0xff]  }
 0x22b   :  { %3789 = vtanh.f32 %v1292_v50  ;;  %v5060_v59 = vsel %vm1300_vm13, %v1292_v50, %v882_v41  ;;  %6553 = vst [vmem:[#allocation29_spill] sm:$0xff] %v5263_v34  ;;  %v5269_v50 = vld [vmem:[%s6268_s3 + $0x24] ss:$16 sps:$4 sm:$0xff]   ;;  %6556 = vst [vmem:[#allocation32_spill] sm:$0xff] %v5281_v27 }
 0x22c   :  { %3791 = vtanh.f32 %v1400_v15  ;;  %6554 = vst [vmem:[#allocation30_spill] sm:$0xff] %v5269_v50  ;;  %v5293_v15 = vld [vmem:[%s6268_s3 + $0x4] ss:$16 sps:$4 sm:$0xff]   ;;  %vm6216_vm6 = vmpackc.low %vm1169_vm11, %vm1431_vm14 }
 0x22d   :  { %3793 = vpow2.f32 %v3429_v16  ;;  %6558 = vst [vmem:[#allocation34_spill] sm:$0xff] %v5293_v15  ;;  %v5299_v16 = vld [vmem:[%s6268_s3 + $0xc] ss:$16 sps:$4 sm:$0xff]  }
 0x22e   :  { %6559 = vst [vmem:[#allocation35_spill] sm:$0xff] %v5299_v16 }
 0x234   :  { %v3784_v17 = vpop.eup %3783 }
 0x235   :  { %v1405_v22 = vadd.f32 1.0, %v3784_v17  ;;  %v5305_v17 = vld [vmem:[%s6268_s3] ss:$16 sps:$4 sm:$0xff]  }
 0x236   :  { %v3786_v31 = vpop.eup %3785  ;;  %6560 = vst [vmem:[#allocation36_spill] sm:$0xff] %v5305_v17 }
 0x237   :  { %v3788_v19 = vpop.eup %3787  ;;  %3795 = vrcp.f32 %v1405_v22  ;;  %v1411_v21 = vadd.f32 1.0, %v3786_v31  ;;  %v5311_v22 = vld [vmem:[%s6268_s3 + $0x8] ss:$16 sps:$4 sm:$0xff]   ;;  %v5317_v31 = vld [vmem:[%s6269_s6 + $0xe4] ss:$16 sps:$4 sm:$0xff]  }
 0x238   :  { %v3790_v40 = vpop.eup %3789  ;;  %6561 = vst [vmem:[#allocation40_spill] sm:$0xff] %v5311_v22  ;;  %6562 = vst [vmem:[#allocation42_spill] sm:$0xff] %v5317_v31 }
 0x239   :  { %3797 = vrcp.f32 %v1411_v21  ;;  %v5064_v44 = vmul.f32 %v3790_v40, %v3788_v19  ;;  %v3792_v41 = vpop.eup %3791  ;;  %v5323_v19 = vld [vmem:[%s6269_s6 + $0xec] ss:$16 sps:$4 sm:$0xff]  }
 0x23a   :  { %v3794_v10 = vpop.eup %3793  ;;  %6563 = vst [vmem:[#allocation43_spill] sm:$0xff] %v5323_v19 }
 0x23b   :  { %6534 = vst [vmem:[#allocation10_spill] sm:$0xff] %v5064_v44  ;;  %v5072_v23 = vsel %vm1300_vm13, %v5064_v44, %v880_v47  ;;  %v6564_v47 = vld [vmem:[#allocation44_spill] sm:$0xff]  ;;  %v5333_v44 = vpop.permute.xlu0 %1560 }
 0x23c   :  { %v1446_v18 = vpack.c.bf16 %v5072_v23, %v5072_v23  ;;  %6570 = vst [vmem:[#allocation41_spill] sm:$0xff] %v5333_v44  ;;  %vm1562_vm15 = vcmp.eq.s32.totalorder %v5333_v44, 1  ;;  %6577 = vst [vmem:[#allocation44_spill] sm:$0xff] %v5487_v32  ;;  %v5505_v44 = vld [vmem:[%s6269_s6 + $0x2c] ss:$16 sps:$4 sm:$0xff]  }
 0x23e   :  { %1480 = vmatmul.mubr.bf16.vlgmr.msra.gmra.mxu0 %v1446_v18  ;;  %1521 = vmatmul.mubr.bf16.vlgmr.msra.gmra.mxu1 %v1446_v18 }
 0x23f   :  { %1579 = vmatpush1.bf16.msra.mxu0 %v4481_v52  ;;  %1620 = vmatpush1.bf16.msra.mxu1 %v4486_v53 }
 0x240   :  { %1580 = vmatprep.subr.bf16.mxu0 %v4493_v54  ;;  %1621 = vmatprep.subr.bf16.mxu1 %v4498_v55  ;;  %v1172_v54 = vsel %vm1169_vm11, %v4969_v36, 0.0  ;;  %v1418_v55 = vadd.f32 1.0, %v3794_v10  ;;  %v5227_v36 = vld [vmem:[%s6268_s3 + $0x6c] ss:$16 sps:$4 sm:$0xff]  }
 0x241   :  { %1610 = vmatprep.mubr.bf16.mxu0 %v6429_v1  ;;  %1651 = vmatprep.mubr.bf16.mxu1 %v6429_v1  ;;  %6547 = vst [vmem:[#allocation23_spill] sm:$0xff] %v5227_v36 }
 0x242   :  { %3799 = vrcp.f32 %v1418_v55 }
 0x243   :  { %1581 = vmatpush1.bf16.msra.mxu0 %v4508_v57  ;;  %1622 = vmatpush1.bf16.msra.mxu1 %v4513_v58 }
 0x244   :  { %v3796_v28 = vpop.eup %3795  ;;  %1582 = vmatprep.subr.bf16.mxu0 %v4521_v60  ;;  %1623 = vmatprep.subr.bf16.mxu1 %v4526_v61 }
 0x245   :  { %v1422_v52 = vmul.f32 %v3796_v28, %v3792_v41 }
 0x246   :  { %v3798_v53 = vpop.eup %3797 }
 0x247   :  { %v1421_v25 = vmul.f32 %v3798_v53, %v1172_v54  ;;  %1583 = vmatpush1.bf16.msra.mxu0 %v4536_v62  ;;  %1624 = vmatpush1.bf16.msra.mxu1 %v4541_v63  ;;  %v1170_v63 = vsel %vm1169_vm11, %v4990_v12, 0.0 }
 0x248   :  { %1584 = vmatprep.subr.bf16.mxu0 %v4549_v2  ;;  %1625 = vmatprep.subr.bf16.mxu1 %v4554_v3 }
 0x249   :  { %v1423_v57 = vadd.f32 %v1422_v52, %v1421_v25  ;;  %v6565_v52 = vld [vmem:[#allocation46_spill] sm:$0xff] }
 0x24a   :  { %6578 = vst [vmem:[#allocation46_spill] sm:$0xff] %v5493_v43 }
 0x24b   :  { %3801 = vtanh.f32 %v1423_v57  ;;  %1585 = vmatpush1.bf16.msra.mxu0 %v4561_v4  ;;  %1626 = vmatpush1.bf16.msra.mxu1 %v4566_v5  ;;  %v5100_v58 = vsel %vm1431_vm14, %v1423_v57, %v1172_v54  ;;  %v5141_v4 = vld [vmem:[%s6268_s3 + $0xe8] ss:$16 sps:$4 sm:$0xff]   ;;  %v5147_v5 = vld [vmem:[%s6268_s3 + $0xc4] ss:$16 sps:$4 sm:$0xff]  }
 0x24c   :  { %1586 = vmatprep.subr.bf16.mxu0 %v4573_v6  ;;  %1627 = vmatprep.subr.bf16.mxu1 %v4578_v7  ;;  %v5153_v6 = vld [vmem:[%s6268_s3 + $0xcc] ss:$16 sps:$4 sm:$0xff]   ;;  %v5161_v7 = vld [vmem:[%s6268_s3 + $0xc0] ss:$16 sps:$4 sm:$0xff]  }
 0x24f   :  { %1587 = vmatpush1.bf16.msra.mxu0 %v4585_v8  ;;  %1628 = vmatpush1.bf16.msra.mxu1 %v4590_v9  ;;  %v3800_v60 = vpop.eup %3799  ;;  %v5167_v8 = vld [vmem:[%s6268_s3 + $0xc8] ss:$16 sps:$4 sm:$0xff]   ;;  %v5173_v9 = vld [vmem:[%s6268_s3 + $0xa4] ss:$16 sps:$4 sm:$0xff]  }
 0x250   :  { %1588 = vmatprep.subr.bf16.mxu0 %v4597_v11  ;;  %1629 = vmatprep.subr.bf16.mxu1 %v4602_v13  ;;  %6537 = vst [vmem:[#allocation13_spill] sm:$0xff] %v5167_v8  ;;  %6538 = vst [vmem:[#allocation14_spill] sm:$0xff] %v5173_v9  ;;  %v5179_v11 = vld [vmem:[%s6268_s3 + $0xac] ss:$16 sps:$4 sm:$0xff]   ;;  %v5185_v13 = vld [vmem:[%s6268_s3 + $0xa0] ss:$16 sps:$4 sm:$0xff]  }
 0x251   :  { %6539 = vst [vmem:[#allocation15_spill] sm:$0xff] %v5179_v11  ;;  %6540 = vst [vmem:[#allocation16_spill] sm:$0xff] %v5185_v13 }
 0x253   :  { %1589 = vmatpush1.bf16.msra.mxu0 %v4609_v14  ;;  %1630 = vmatpush1.bf16.msra.mxu1 %v4614_v38  ;;  %v5191_v14 = vld [vmem:[%s6268_s3 + $0xa8] ss:$16 sps:$4 sm:$0xff]   ;;  %v5197_v38 = vld [vmem:[%s6268_s3 + $0x84] ss:$16 sps:$4 sm:$0xff]  }
 0x254   :  { %1590 = vmatprep.subr.bf16.mxu0 %v4621_v39  ;;  %1631 = vmatprep.subr.bf16.mxu1 %v6493_v33  ;;  %6541 = vst [vmem:[#allocation17_spill] sm:$0xff] %v5191_v14  ;;  %6542 = vst [vmem:[#allocation18_spill] sm:$0xff] %v5197_v38  ;;  %v5203_v39 = vld [vmem:[%s6268_s3 + $0x8c] ss:$16 sps:$4 sm:$0xff]   ;;  %v5233_v33 = vld [vmem:[%s6268_s3 + $0x60] ss:$16 sps:$4 sm:$0xff]  }
 0x255   :  { %6543 = vst [vmem:[#allocation19_spill] sm:$0xff] %v5203_v39  ;;  %6548 = vst [vmem:[#allocation24_spill] sm:$0xff] %v5233_v33 }
 0x257   :  { %1591 = vmatpush1.bf16.msra.mxu0 %v4633_v49  ;;  %1632 = vmatpush1.bf16.msra.mxu1 %v6494_v35  ;;  %v5215_v49 = vld [vmem:[%s6268_s3 + $0x88] ss:$16 sps:$4 sm:$0xff]  }
 0x258   :  { %v3802_v61 = vpop.eup %3801  ;;  %1592 = vmatprep.subr.bf16.mxu0 %v4645_v0  ;;  %1633 = vmatprep.subr.bf16.mxu1 %v6495_v46  ;;  %6545 = vst [vmem:[#allocation21_spill] sm:$0xff] %v5215_v49  ;;  %v5221_v0 = vld [vmem:[%s6268_s3 + $0x64] ss:$16 sps:$4 sm:$0xff]   ;;  %v5239_v35 = vld [vmem:[%s6268_s3 + $0x68] ss:$16 sps:$4 sm:$0xff]  }
 0x259   :  { %v5116_v62 = vmul.f32 %v3802_v61, %v3800_v60  ;;  %6546 = vst [vmem:[#allocation22_spill] sm:$0xff] %v5221_v0  ;;  %6549 = vst [vmem:[#allocation25_spill] sm:$0xff] %v5239_v35  ;;  %v5245_v46 = vld [vmem:[%s6268_s3 + $0x44] ss:$16 sps:$4 sm:$0xff]   ;;  %v6566_v61 = vld [vmem:[#allocation47_spill] sm:$0xff] }
 0x25a   :  { %6550 = vst [vmem:[#allocation26_spill] sm:$0xff] %v5245_v46  ;;  %6579 = vst [vmem:[#allocation47_spill] sm:$0xff] %v5499_v29 }
 0x25b   :  { %6536 = vst [vmem:[#allocation12_spill] sm:$0xff] %v5116_v62  ;;  %1593 = vmatpush1.bf16.msra.mxu0 %v4657_v56  ;;  %1634 = vmatpush1.bf16.msra.mxu1 %v4662_v48  ;;  %v5126_v2 = vsel %vm1431_vm14, %v5116_v62, %v1170_v63  ;;  %v5135_v56 = vld [vmem:[%s6268_s3 + $0xe0] ss:$16 sps:$4 sm:$0xff]  }
 0x25c   :  { %v1577_v3 = vpack.c.bf16 %v5126_v2, %v5126_v2  ;;  %1709 = vmatprep.subr.bf16.mxu0 %v5000_v45  ;;  %1750 = vmatprep.subr.bf16.mxu1 %v5006_v42  ;;  %v5209_v48 = vld [vmem:[%s6268_s3 + $0x80] ss:$16 sps:$4 sm:$0xff]  }
 0x25d   :  { %6544 = vst [vmem:[#allocation20_spill] sm:$0xff] %v5209_v48 }
 0x25e   :  { %1611 = vmatmul.mubr.bf16.vlgmr.msra.gmra.mxu0 %v1577_v3  ;;  %1652 = vmatmul.mubr.bf16.vlgmr.msra.gmra.mxu1 %v1577_v3  ;;  %v6567_v3 = vld [vmem:[#allocation45_spill] sm:$0xff] }
 0x25f   :  { %1710 = vmatpush1.bf16.msra.mxu0 %v5135_v56  ;;  %1751 = vmatpush1.bf16.msra.mxu1 %v5141_v4  ;;  %6580 = vst [vmem:[#allocation45_spill] sm:$0xff] %v5505_v44 }
 0x260   :  { %1711 = vmatprep.subr.bf16.mxu0 %v5147_v5  ;;  %1752 = vmatprep.subr.bf16.mxu1 %v5153_v6 }
 0x261   :  { %1741 = vmatprep.mubr.bf16.mxu0 %v6429_v1  ;;  %1782 = vmatprep.mubr.bf16.mxu1 %v6429_v1 }
 0x263   :  { %1712 = vmatpush1.bf16.msra.mxu0 %v5161_v7  ;;  %1753 = vmatpush1.bf16.msra.mxu1 %v5167_v8 }
 0x264   :  { %1713 = vmatprep.subr.bf16.mxu0 %v5173_v9  ;;  %1754 = vmatprep.subr.bf16.mxu1 %v5179_v11 }
 0x267   :  { %1714 = vmatpush1.bf16.msra.mxu0 %v5185_v13  ;;  %1755 = vmatpush1.bf16.msra.mxu1 %v5191_v14 }
 0x268   :  { %1715 = vmatprep.subr.bf16.mxu0 %v5197_v38  ;;  %1756 = vmatprep.subr.bf16.mxu1 %v5203_v39 }
 0x26b   :  { %1716 = vmatpush1.bf16.msra.mxu0 %v5209_v48  ;;  %1757 = vmatpush1.bf16.msra.mxu1 %v5215_v49 }
 0x26c   :  { %1717 = vmatprep.subr.bf16.mxu0 %v5221_v0  ;;  %1758 = vmatprep.subr.bf16.mxu1 %v5227_v36 }
 0x26f   :  { %1718 = vmatpush1.bf16.msra.mxu0 %v5233_v33  ;;  %1759 = vmatpush1.bf16.msra.mxu1 %v5239_v35 }
 0x270   :  { %1719 = vmatprep.subr.bf16.mxu0 %v5245_v46  ;;  %1760 = vmatprep.subr.bf16.mxu1 %v5251_v51 }
 0x273   :  { %1720 = vmatpush1.bf16.msra.mxu0 %v5257_v20  ;;  %1761 = vmatpush1.bf16.msra.mxu1 %v5263_v34 }
 0x274   :  { %1721 = vmatprep.subr.bf16.mxu0 %v5269_v50  ;;  %1762 = vmatprep.subr.bf16.mxu1 %v5275_v30 }
 0x277   :  { %1722 = vmatpush1.bf16.msra.mxu0 %v5281_v27  ;;  %1763 = vmatpush1.bf16.msra.mxu1 %v5287_v26 }
 0x278   :  { %1723 = vmatprep.subr.bf16.mxu0 %v5293_v15  ;;  %1764 = vmatprep.subr.bf16.mxu1 %v5299_v16 }
 0x27b   :  { %1724 = vmatpush1.bf16.msra.mxu0 %v5305_v17  ;;  %1765 = vmatpush1.bf16.msra.mxu1 %v5311_v22 }
 0x27c   :  { %1840 = vmatprep.subr.bf16.mxu0 %v5317_v31  ;;  %1881 = vmatprep.subr.bf16.mxu1 %v5323_v19 }
 0x2fe   :  { %v1481_v21 = vpop.f32.mrf.mxu0  ;;  %v1522_v40 = vpop.f32.mrf.mxu1 }
 0x2ff   :  { %v1529_v18 = vadd.f32 %v1481_v21, %v6564_v47  ;;  %v1531_v12 = vadd.f32 %v1522_v40, %v6567_v3 }
 0x300   :  { %v1483_v41 = vpop.f32.mrf.mxu0  ;;  %v1524_v10 = vpop.f32.mrf.mxu1 }
 0x301   :  { %v3430_v28 = vmul.f32 -1.442695, %v1529_v18  ;;  %v1530_v53 = vadd.f32 %v1483_v41, %v6565_v52  ;;  %v1532_v63 = vadd.f32 %v1524_v10, %v6566_v61 }
 0x302   :  { %v1485_v54 = vpop.f32.mrf.mxu0  ;;  %v1526_v55 = vpop.f32.mrf.mxu1 }
 0x303   :  { %3803 = vpow2.f32 %v3430_v28  ;;  %v3431_v25 = vmul.f32 -1.442695, %v1530_v53  ;;  %v3432_v62 = vmul.f32 -1.442695, %v1532_v63  ;;  %v6568_v53 = vld [vmem:[#allocation88_spill] sm:$0xff] }
 0x304   :  { %v1486_v57 = vpop.f32.mrf.mxu0  ;;  %v1527_v60 = vpop.f32.mrf.mxu1 }
 0x305   :  { %3805 = vpow2.f32 %v3431_v25  ;;  %v6569_v60 = vld [vmem:[#allocation90_spill] sm:$0xff] }
 0x306   :  { %3807 = vtanh.f32 %v1531_v12 }
 0x307   :  { %3809 = vpow2.f32 %v3432_v62 }
 0x310   :  { %v3804_v37 = vpop.eup %3803 }
 0x311   :  { %v1536_v24 = vadd.f32 1.0, %v3804_v37 }
 0x312   :  { %v3806_v21 = vpop.eup %3805 }
 0x313   :  { %3811 = vrcp.f32 %v1536_v24  ;;  %v1542_v47 = vadd.f32 1.0, %v3806_v21  ;;  %v3808_v18 = vpop.eup %3807 }
 0x314   :  { %v3810_v52 = vpop.eup %3809 }
 0x315   :  { %3813 = vrcp.f32 %v1542_v47  ;;  %v1549_v12 = vadd.f32 1.0, %v3810_v52  ;;  %v6571_v52 = vld [vmem:[#allocation91_spill] sm:$0xff] }
 0x31e   :  { %v1612_v41 = vpop.f32.mrf.mxu0  ;;  %v1653_v28 = vpop.f32.mrf.mxu1 }
 0x31f   :  { %v1660_v54 = vadd.f32 %v1612_v41, %v6568_v53 }
 0x320   :  { %v3812_v55 = vpop.eup %3811  ;;  %v1614_v25 = vpop.f32.mrf.mxu0 }
 0x321   :  { %v1655_v10 = vpop.f32.mrf.mxu1  ;;  %v1553_v57 = vmul.f32 %v3812_v55, %v3808_v18  ;;  %v3433_v40 = vmul.f32 -1.442695, %v1660_v54  ;;  %v1661_v61 = vadd.f32 %v1614_v25, %v6569_v60  ;;  %v6572_v54 = vld [vmem:[#allocation89_spill] sm:$0xff] }
 0x322   :  { %v3814_v37 = vpop.eup %3813  ;;  %v1616_v63 = vpop.f32.mrf.mxu0  ;;  %v1663_v53 = vadd.f32 %v1655_v10, %v6571_v52  ;;  %v1662_v55 = vadd.f32 %v1653_v28, %v6572_v54  ;;  %v5356_v10 = vld [vmem:[%s6269_s6 + $0xe0] ss:$16 sps:$4 sm:$0xff]   ;;  %v5400_v54 = vld [vmem:[%s6269_s6 + $0xac] ss:$16 sps:$4 sm:$0xff]  }
 0x323   :  { %v1657_v62 = vpop.f32.mrf.mxu1  ;;  %v1552_v24 = vmul.f32 %v3814_v37, %v5060_v59  ;;  %3815 = vpow2.f32 %v3433_v40  ;;  %v3434_v3 = vmul.f32 -1.442695, %v1661_v61 }
 0x324   :  { %v1617_v21 = vpop.f32.mrf.mxu0  ;;  %v3435_v25 = vmul.f32 -1.442695, %v1663_v53  ;;  %v5362_v62 = vld [vmem:[%s6269_s6 + $0xe8] ss:$16 sps:$4 sm:$0xff]   ;;  %v5394_v53 = vld [vmem:[%s6269_s6 + $0xa4] ss:$16 sps:$4 sm:$0xff]  }
 0x325   :  { %v1658_v47 = vpop.f32.mrf.mxu1  ;;  %v1554_v41 = vadd.f32 %v1553_v57, %v1552_v24  ;;  %3817 = vpow2.f32 %v3434_v3  ;;  %v5374_v24 = vld [vmem:[%s6269_s6 + $0xcc] ss:$16 sps:$4 sm:$0xff]  }
 0x326   :  { %3819 = vrcp.f32 %v1549_v12  ;;  %v5382_v47 = vld [vmem:[%s6269_s6 + $0xc0] ss:$16 sps:$4 sm:$0xff]  }
 0x327   :  { %3821 = vtanh.f32 %v1554_v41  ;;  %v5339_v18 = vsel %vm1562_vm15, %v1554_v41, %v5060_v59  ;;  %v5388_v41 = vld [vmem:[%s6269_s6 + $0xc8] ss:$16 sps:$4 sm:$0xff]  }
 0x328   :  { %3823 = vtanh.f32 %v1662_v55 }
 0x329   :  { %3825 = vpow2.f32 %v3435_v25 }
 0x330   :  { %v3816_v40 = vpop.eup %3815 }
 0x331   :  { %v1667_v60 = vadd.f32 1.0, %v3816_v40 }
 0x332   :  { %v3818_v61 = vpop.eup %3817 }
 0x333   :  { %v3820_v57 = vpop.eup %3819  ;;  %3827 = vrcp.f32 %v1667_v60  ;;  %v1673_v37 = vadd.f32 1.0, %v3818_v61  ;;  %v5407_v61 = vld [vmem:[%s6269_s6 + $0xa0] ss:$16 sps:$4 sm:$0xff]  }
 0x334   :  { %v3822_v12 = vpop.eup %3821 }
 0x335   :  { %3829 = vrcp.f32 %v1673_v37  ;;  %v5343_v63 = vmul.f32 %v3822_v12, %v3820_v57  ;;  %v3824_v3 = vpop.eup %3823  ;;  %v5413_v57 = vld [vmem:[%s6269_s6 + $0xa8] ss:$16 sps:$4 sm:$0xff]   ;;  %v5419_v37 = vld [vmem:[%s6269_s6 + $0x84] ss:$16 sps:$4 sm:$0xff]   ;;  %v5425_v12 = vld [vmem:[%s6269_s6 + $0x8c] ss:$16 sps:$4 sm:$0xff]  }
 0x336   :  { %v3826_v21 = vpop.eup %3825 }
 0x337   :  { %6573 = vst [vmem:[#allocation92_spill] sm:$0xff] %v5343_v63  ;;  %v5349_v59 = vsel %vm1562_vm15, %v5343_v63, %v5072_v23  ;;  %v5368_v23 = vld [vmem:[%s6269_s6 + $0xc4] ss:$16 sps:$4 sm:$0xff]   ;;  %v1680_v40 = vadd.f32 1.0, %v3826_v21  ;;  %v5434_v21 = vld [vmem:[%s6269_s6 + $0x80] ss:$16 sps:$4 sm:$0xff]  }
 0x338   :  { %v1708_v28 = vpack.c.bf16 %v5349_v59, %v5349_v59  ;;  %v5481_v63 = vld [vmem:[%s6269_s6 + $0x4c] ss:$16 sps:$4 sm:$0xff]  }
 0x339   :  { %3831 = vrcp.f32 %v1680_v40  ;;  %v5457_v40 = vld [vmem:[%s6269_s6 + $0x6c] ss:$16 sps:$4 sm:$0xff]   ;;  %6576 = vst [vmem:[#allocation93_spill] sm:$0xff] %v5481_v63 }
 0x33a   :  { %1742 = vmatmul.mubr.bf16.vlgmr.msra.gmra.mxu0 %v1708_v28  ;;  %1783 = vmatmul.mubr.bf16.vlgmr.msra.gmra.mxu1 %v1708_v28  ;;  %v5428_v28 = vpop.permute.xlu1 %1691 }
 0x33b   :  { %1841 = vmatpush1.bf16.msra.mxu0 %v5356_v10  ;;  %1882 = vmatpush1.bf16.msra.mxu1 %v5362_v62  ;;  %6574 = vst [vmem:[#allocation94_spill] sm:$0xff] %v5428_v28  ;;  %vm1693_vm0 = vcmp.eq.s32.totalorder %v5428_v28, 1 }
 0x33c   :  { %1842 = vmatprep.subr.bf16.mxu0 %v5368_v23  ;;  %1883 = vmatprep.subr.bf16.mxu1 %v5374_v24 }
 0x33d   :  { %1872 = vmatprep.mubr.bf16.mxu0 %v6429_v1  ;;  %1913 = vmatprep.mubr.bf16.mxu1 %v6429_v1 }
 0x33f   :  { %1843 = vmatpush1.bf16.msra.mxu0 %v5382_v47  ;;  %1884 = vmatpush1.bf16.msra.mxu1 %v5388_v41 }
 0x340   :  { %v3828_v52 = vpop.eup %3827  ;;  %1844 = vmatprep.subr.bf16.mxu0 %v5394_v53  ;;  %1885 = vmatprep.subr.bf16.mxu1 %v5400_v54 }
 0x341   :  { %v1684_v55 = vmul.f32 %v3828_v52, %v3824_v3  ;;  %v5440_v52 = vld [vmem:[%s6269_s6 + $0x88] ss:$16 sps:$4 sm:$0xff]  }
 0x342   :  { %v3830_v25 = vpop.eup %3829 }
 0x343   :  { %v1683_v60 = vmul.f32 %v3830_v25, %v5100_v58  ;;  %1845 = vmatpush1.bf16.msra.mxu0 %v5407_v61  ;;  %1886 = vmatpush1.bf16.msra.mxu1 %v5413_v57  ;;  %v5451_v25 = vld [vmem:[%s6269_s6 + $0x64] ss:$16 sps:$4 sm:$0xff]  }
 0x344   :  { %1846 = vmatprep.subr.bf16.mxu0 %v5419_v37  ;;  %1887 = vmatprep.subr.bf16.mxu1 %v5425_v12 }
 0x345   :  { %v1685_v3 = vadd.f32 %v1684_v55, %v1683_v60  ;;  %v5463_v60 = vld [vmem:[%s6269_s6 + $0x60] ss:$16 sps:$4 sm:$0xff]  }
 0x347   :  { %3833 = vtanh.f32 %v1685_v3  ;;  %1847 = vmatpush1.bf16.msra.mxu0 %v5434_v21  ;;  %1888 = vmatpush1.bf16.msra.mxu1 %v5440_v52  ;;  %v5446_v55 = vsel %vm1693_vm0, %v1685_v3, %v5100_v58  ;;  %v5469_v58 = vld [vmem:[%s6269_s6 + $0x68] ss:$16 sps:$4 sm:$0xff]   ;;  %v5475_v3 = vld [vmem:[%s6269_s6 + $0x44] ss:$16 sps:$4 sm:$0xff]  }
 0x348   :  { %1848 = vmatprep.subr.bf16.mxu0 %v5451_v25  ;;  %1889 = vmatprep.subr.bf16.mxu1 %v5457_v40  ;;  %6575 = vst [vmem:[#allocation95_spill] sm:$0xff] %v5475_v3 }
 0x34b   :  { %1849 = vmatpush1.bf16.msra.mxu0 %v5463_v60  ;;  %1890 = vmatpush1.bf16.msra.mxu1 %v5469_v58 }
 0x34c   :  { %1850 = vmatprep.subr.bf16.mxu0 %v5475_v3  ;;  %1891 = vmatprep.subr.bf16.mxu1 %v5481_v63  ;;  %v5511_v63 = vld [vmem:[%s6269_s6 + $0x20] ss:$16 sps:$4 sm:$0xff]   ;;  %v5529_v3 = vld [vmem:[%s6269_s6 + $0xc] ss:$16 sps:$4 sm:$0xff]  }
 0x34d   :  { %6581 = vst [vmem:[#allocation88_spill] sm:$0xff] %v5511_v63 }
 0x34f   :  { %1851 = vmatpush1.bf16.msra.mxu0 %v5487_v32  ;;  %1892 = vmatpush1.bf16.msra.mxu1 %v5493_v43  ;;  %v3832_v32 = vpop.eup %3831  ;;  %v5517_v43 = vld [vmem:[%s6269_s6 + $0x28] ss:$16 sps:$4 sm:$0xff]  }
 0x350   :  { %1852 = vmatprep.subr.bf16.mxu0 %v5499_v29  ;;  %1893 = vmatprep.subr.bf16.mxu1 %v5505_v44  ;;  %6582 = vst [vmem:[#allocation90_spill] sm:$0xff] %v5517_v43  ;;  %v5523_v44 = vld [vmem:[%s6269_s6 + $0x4] ss:$16 sps:$4 sm:$0xff]  }
 0x351   :  { %6583 = vst [vmem:[#allocation91_spill] sm:$0xff] %v5523_v44 }
 0x353   :  { %1853 = vmatpush1.bf16.msra.mxu0 %v5511_v63  ;;  %1894 = vmatpush1.bf16.msra.mxu1 %v5517_v43  ;;  %v5537_v43 = vld [vmem:[%s6269_s6] ss:$16 sps:$4 sm:$0xff]  }
 0x354   :  { %v3834_v29 = vpop.eup %3833  ;;  %1854 = vmatprep.subr.bf16.mxu0 %v5523_v44  ;;  %1895 = vmatprep.subr.bf16.mxu1 %v5529_v3  ;;  %v5543_v44 = vld [vmem:[%s6269_s6 + $0x8] ss:$16 sps:$4 sm:$0xff]  }
 0x355   :  { %v5532_v63 = vmul.f32 %v3834_v29, %v3832_v32 }
 0x357   :  { %6584 = vst [vmem:[#allocation89_spill] sm:$0xff] %v5532_v63  ;;  %1855 = vmatpush1.bf16.msra.mxu0 %v5537_v43  ;;  %1896 = vmatpush1.bf16.msra.mxu1 %v5543_v44  ;;  %v5550_v32 = vsel %vm1693_vm0, %v5532_v63, %v5126_v2  ;;  %v6585_v63 = vld [vmem:[#allocation48_spill] sm:$0xff] }
 0x358   :  { %v1839_v29 = vpack.c.bf16 %v5550_v32, %v5550_v32  ;;  %1971 = vmatprep.subr.bf16.mxu0 %v5000_v45  ;;  %2012 = vmatprep.subr.bf16.mxu1 %v5006_v42 }
 0x35a   :  { %1873 = vmatmul.mubr.bf16.vlgmr.msra.gmra.mxu0 %v1839_v29  ;;  %1914 = vmatmul.mubr.bf16.vlgmr.msra.gmra.mxu1 %v1839_v29 }
 0x35b   :  { %1972 = vmatpush1.bf16.msra.mxu0 %v5135_v56  ;;  %2013 = vmatpush1.bf16.msra.mxu1 %v5141_v4 }
 0x35c   :  { %1973 = vmatprep.subr.bf16.mxu0 %v5147_v5  ;;  %2014 = vmatprep.subr.bf16.mxu1 %v5153_v6 }
 0x35d   :  { %2003 = vmatprep.mubr.bf16.mxu0 %v6429_v1  ;;  %2044 = vmatprep.mubr.bf16.mxu1 %v6429_v1 }
 0x35f   :  { %1974 = vmatpush1.bf16.msra.mxu0 %v5161_v7  ;;  %2015 = vmatpush1.bf16.msra.mxu1 %v5167_v8 }
 0x360   :  { %1975 = vmatprep.subr.bf16.mxu0 %v5173_v9  ;;  %2016 = vmatprep.subr.bf16.mxu1 %v5179_v11 }
 0x363   :  { %1976 = vmatpush1.bf16.msra.mxu0 %v5185_v13  ;;  %2017 = vmatpush1.bf16.msra.mxu1 %v5191_v14 }
 0x364   :  { %1977 = vmatprep.subr.bf16.mxu0 %v5197_v38  ;;  %2018 = vmatprep.subr.bf16.mxu1 %v5203_v39 }
 0x367   :  { %1978 = vmatpush1.bf16.msra.mxu0 %v5209_v48  ;;  %2019 = vmatpush1.bf16.msra.mxu1 %v5215_v49 }
 0x368   :  { %1979 = vmatprep.subr.bf16.mxu0 %v5221_v0  ;;  %2020 = vmatprep.subr.bf16.mxu1 %v5227_v36 }
 0x36b   :  { %1980 = vmatpush1.bf16.msra.mxu0 %v5233_v33  ;;  %2021 = vmatpush1.bf16.msra.mxu1 %v5239_v35 }
 0x36c   :  { %1981 = vmatprep.subr.bf16.mxu0 %v5245_v46  ;;  %2022 = vmatprep.subr.bf16.mxu1 %v5251_v51  ;;  %v6588_v46 = vld [vmem:[#allocation49_spill] sm:$0xff] }
 0x36f   :  { %1982 = vmatpush1.bf16.msra.mxu0 %v5257_v20  ;;  %2023 = vmatpush1.bf16.msra.mxu1 %v5263_v34 }
 0x370   :  { %1983 = vmatprep.subr.bf16.mxu0 %v5269_v50  ;;  %2024 = vmatprep.subr.bf16.mxu1 %v5275_v30 }
 0x373   :  { %1984 = vmatpush1.bf16.msra.mxu0 %v5281_v27  ;;  %2025 = vmatpush1.bf16.msra.mxu1 %v5287_v26  ;;  %v6586_v26 = vld [vmem:[#allocation50_spill] sm:$0xff] }
 0x374   :  { %1985 = vmatprep.subr.bf16.mxu0 %v5293_v15  ;;  %2026 = vmatprep.subr.bf16.mxu1 %v5299_v16 }
 0x377   :  { %1986 = vmatpush1.bf16.msra.mxu0 %v5305_v17  ;;  %2027 = vmatpush1.bf16.msra.mxu1 %v5311_v22  ;;  %v6587_v22 = vld [vmem:[#allocation51_spill] sm:$0xff] }
 0x378   :  { %2096 = vmatprep.subr.bf16.mxu0 %v5317_v31  ;;  %2137 = vmatprep.subr.bf16.mxu1 %v5323_v19 }
 0x3fa   :  { %v1743_v2 = vpop.f32.mrf.mxu0  ;;  %v1784_v29 = vpop.f32.mrf.mxu1 }
 0x3fb   :  { %v1791_v28 = vadd.f32 %v1743_v2, %v6585_v63  ;;  %v1793_v19 = vadd.f32 %v1784_v29, %v6588_v46 }
 0x3fc   :  { %v1745_v30 = vpop.f32.mrf.mxu0  ;;  %v1786_v27 = vpop.f32.mrf.mxu1 }
 0x3fd   :  { %v3436_v50 = vmul.f32 -1.442695, %v1791_v28  ;;  %v1792_v34 = vadd.f32 %v1745_v30, %v6586_v26  ;;  %v1794_v31 = vadd.f32 %v1786_v27, %v6587_v22  ;;  %v6589_v26 = vld [vmem:[#allocation84_spill] sm:$0xff]  ;;  %v6590_v22 = vld [vmem:[#allocation86_spill] sm:$0xff] }
 0x3fe   :  { %v1747_v15 = vpop.f32.mrf.mxu0  ;;  %v1788_v20 = vpop.f32.mrf.mxu1 }
 0x3ff   :  { %3835 = vpow2.f32 %v3436_v50  ;;  %v3437_v16 = vmul.f32 -1.442695, %v1792_v34  ;;  %v3438_v35 = vmul.f32 -1.442695, %v1794_v31 }
 0x400   :  { %v1748_v17 = vpop.f32.mrf.mxu0  ;;  %v1789_v51 = vpop.f32.mrf.mxu1 }
 0x401   :  { %3837 = vpow2.f32 %v3437_v16 }
 0x402   :  { %3839 = vtanh.f32 %v1793_v19 }
 0x403   :  { %3841 = vpow2.f32 %v3438_v35 }
 0x40c   :  { %v3836_v33 = vpop.eup %3835 }
 0x40d   :  { %v1798_v36 = vadd.f32 1.0, %v3836_v33 }
 0x40e   :  { %v3838_v63 = vpop.eup %3837 }
 0x40f   :  { %3843 = vrcp.f32 %v1798_v36  ;;  %v1804_v28 = vadd.f32 1.0, %v3838_v63  ;;  %v3840_v30 = vpop.eup %3839  ;;  %v5596_v36 = vpop.permute.xlu0 %1822 }
 0x410   :  { %v3842_v34 = vpop.eup %3841  ;;  %vm1824_vm1 = vcmp.eq.s32.totalorder %v5596_v36, 1  ;;  %v3731_v36 = vld [vmem:[%s6274_s9 + $0x38] sm:$0xff]  }
 0x411   :  { %3845 = vrcp.f32 %v1804_v28  ;;  %v1811_v19 = vadd.f32 1.0, %v3842_v34  ;;  %v6591_v34 = vld [vmem:[#allocation87_spill] sm:$0xff]  ;;  %vm6160_vm4 = vmpackc.low %vm1824_vm1, %vm1562_vm15 }
 0x41a   :  { %v1874_v20 = vpop.f32.mrf.mxu0  ;;  %v1915_v50 = vpop.f32.mrf.mxu1 }
 0x41b   :  { %v1922_v51 = vadd.f32 %v1874_v20, %v6589_v26 }
 0x41c   :  { %v3844_v15 = vpop.eup %3843  ;;  %v1876_v16 = vpop.f32.mrf.mxu0 }
 0x41d   :  { %v1917_v27 = vpop.f32.mrf.mxu1  ;;  %v1815_v17 = vmul.f32 %v3844_v15, %v3840_v30  ;;  %v3439_v46 = vmul.f32 -1.442695, %v1922_v51  ;;  %v1923_v31 = vadd.f32 %v1876_v16, %v6590_v22  ;;  %v6592_v51 = vld [vmem:[#allocation85_spill] sm:$0xff] }
 0x41e   :  { %v3846_v33 = vpop.eup %3845  ;;  %v1878_v2 = vpop.f32.mrf.mxu0  ;;  %v1925_v26 = vadd.f32 %v1917_v27, %v6591_v34  ;;  %v1924_v15 = vadd.f32 %v1915_v50, %v6592_v51  ;;  %v6594_v51 = vld [vmem:[#allocation95_spill] sm:$0xff] }
 0x41f   :  { %v1919_v35 = vpop.f32.mrf.mxu1  ;;  %v1814_v29 = vmul.f32 %v3846_v33, %v5339_v18  ;;  %3847 = vpow2.f32 %v3439_v46  ;;  %v3440_v63 = vmul.f32 -1.442695, %v1923_v31 }
 0x420   :  { %v1879_v28 = vpop.f32.mrf.mxu0  ;;  %v3441_v16 = vmul.f32 -1.442695, %v1925_v26 }
 0x421   :  { %v1920_v0 = vpop.f32.mrf.mxu1  ;;  %v1816_v20 = vadd.f32 %v1815_v17, %v1814_v29  ;;  %3849 = vpow2.f32 %v3440_v63  ;;  %v5627_v28 = vpop.permute.xlu1 %1953 }
 0x422   :  { %3851 = vrcp.f32 %v1811_v19  ;;  %vm1955_vm2 = vcmp.eq.s32.totalorder %v5627_v28, 1  ;;  %v3733_v28 = vld [vmem:[%s6274_s9 + $0x28] sm:$0xff]  }
 0x423   :  { %3853 = vtanh.f32 %v1816_v20  ;;  %v5603_v30 = vsel %vm1824_vm1, %v1816_v20, %v5339_v18  ;;  %vm6172_vm5 = vmpackc.low %vm1693_vm0, %vm1955_vm2 }
 0x424   :  { %3855 = vtanh.f32 %v1924_v15  ;;  %v6595_v15 = vld [vmem:[#allocation93_spill] sm:$0xff] }
 0x425   :  { %3857 = vpow2.f32 %v3441_v16  ;;  %v6596_v16 = vld [vmem:[#allocation44_spill] sm:$0xff] }
 0x42c   :  { %v3848_v46 = vpop.eup %3847 }
 0x42d   :  { %v1929_v22 = vadd.f32 1.0, %v3848_v46  ;;  %v6597_v46 = vld [vmem:[#allocation46_spill] sm:$0xff] }
 0x42e   :  { %v3850_v0 = vpop.eup %3849 }
 0x42f   :  { %v3852_v17 = vpop.eup %3851  ;;  %3859 = vrcp.f32 %v1929_v22  ;;  %v1935_v31 = vadd.f32 1.0, %v3850_v0  ;;  %v6598_v22 = vld [vmem:[#allocation47_spill] sm:$0xff] }
 0x430   :  { %v3854_v33 = vpop.eup %3853 }
 0x431   :  { %3861 = vrcp.f32 %v1935_v31  ;;  %v5607_v19 = vmul.f32 %v3854_v33, %v3852_v17  ;;  %v3856_v27 = vpop.eup %3855  ;;  %v6600_v17 = vld [vmem:[#allocation88_spill] sm:$0xff]  ;;  %v6601_v31 = vld [vmem:[#allocation90_spill] sm:$0xff] }
 0x433   :  { %6593 = vst [vmem:[#allocation48_spill] sm:$0xff] %v5607_v19  ;;  %v5613_v18 = vsel %vm1824_vm1, %v5607_v19, %v5349_v59  ;;  %v3858_v59 = vpop.eup %3857  ;;  %v6616_v19 = vld [vmem:[#allocation34_spill] sm:$0xff] }
 0x434   :  { %v1970_v50 = vpack.c.bf16 %v5613_v18, %v5613_v18  ;;  %v1942_v63 = vadd.f32 1.0, %v3858_v59 }
 0x436   :  { %2004 = vmatmul.mubr.bf16.vlgmr.msra.gmra.mxu0 %v1970_v50  ;;  %2045 = vmatmul.mubr.bf16.vlgmr.msra.gmra.mxu1 %v1970_v50  ;;  %3863 = vrcp.f32 %v1942_v63  ;;  %v6602_v50 = vld [vmem:[#allocation91_spill] sm:$0xff] }
 0x437   :  { %2097 = vmatpush1.bf16.msra.mxu0 %v5356_v10  ;;  %2138 = vmatpush1.bf16.msra.mxu1 %v5362_v62  ;;  %v6609_v63 = vld [vmem:[#allocation27_spill] sm:$0xff] }
 0x438   :  { %2098 = vmatprep.subr.bf16.mxu0 %v5368_v23  ;;  %2139 = vmatprep.subr.bf16.mxu1 %v5374_v24 }
 0x439   :  { %2128 = vmatprep.mubr.bf16.mxu0 %v6429_v1  ;;  %2169 = vmatprep.mubr.bf16.mxu1 %v6429_v1 }
 0x43b   :  { %2099 = vmatpush1.bf16.msra.mxu0 %v5382_v47  ;;  %2140 = vmatpush1.bf16.msra.mxu1 %v5388_v41 }
 0x43c   :  { %v3860_v2 = vpop.eup %3859  ;;  %2100 = vmatprep.subr.bf16.mxu0 %v5394_v53  ;;  %2141 = vmatprep.subr.bf16.mxu1 %v5400_v54 }
 0x43d   :  { %v1946_v35 = vmul.f32 %v3860_v2, %v3856_v27 }
 0x43e   :  { %v3862_v29 = vpop.eup %3861 }
 0x43f   :  { %v1945_v20 = vmul.f32 %v3862_v29, %v5446_v55  ;;  %2101 = vmatpush1.bf16.msra.mxu0 %v5407_v61  ;;  %2142 = vmatpush1.bf16.msra.mxu1 %v5413_v57  ;;  %v6608_v29 = vld [vmem:[#allocation26_spill] sm:$0xff] }
 0x440   :  { %2102 = vmatprep.subr.bf16.mxu0 %v5419_v37  ;;  %2143 = vmatprep.subr.bf16.mxu1 %v5425_v12 }
 0x441   :  { %v1947_v34 = vadd.f32 %v1946_v35, %v1945_v20  ;;  %v6607_v35 = vld [vmem:[#allocation25_spill] sm:$0xff]  ;;  %v6610_v20 = vld [vmem:[#allocation28_spill] sm:$0xff] }
 0x443   :  { %3865 = vtanh.f32 %v1947_v34  ;;  %2103 = vmatpush1.bf16.msra.mxu0 %v5434_v21  ;;  %2144 = vmatpush1.bf16.msra.mxu1 %v5440_v52  ;;  %v5640_v26 = vsel %vm1955_vm2, %v1947_v34, %v5446_v55  ;;  %v6599_v55 = vld [vmem:[#allocation45_spill] sm:$0xff]  ;;  %v3864_v0 = vpop.eup %3863 }
 0x444   :  { %2104 = vmatprep.subr.bf16.mxu0 %v5451_v25  ;;  %2145 = vmatprep.subr.bf16.mxu1 %v5457_v40  ;;  %v6611_v34 = vld [vmem:[#allocation29_spill] sm:$0xff] }
 0x447   :  { %2105 = vmatpush1.bf16.msra.mxu0 %v5463_v60  ;;  %2146 = vmatpush1.bf16.msra.mxu1 %v5469_v58 }
 0x448   :  { %2106 = vmatprep.subr.bf16.mxu0 %v6594_v51  ;;  %2147 = vmatprep.subr.bf16.mxu1 %v6595_v15 }
 0x44b   :  { %2107 = vmatpush1.bf16.msra.mxu0 %v6596_v16  ;;  %2148 = vmatpush1.bf16.msra.mxu1 %v6597_v46 }
 0x44c   :  { %2108 = vmatprep.subr.bf16.mxu0 %v6598_v22  ;;  %2149 = vmatprep.subr.bf16.mxu1 %v6599_v55 }
 0x44f   :  { %2109 = vmatpush1.bf16.msra.mxu0 %v6600_v17  ;;  %2150 = vmatpush1.bf16.msra.mxu1 %v6601_v31 }
 0x450   :  { %v3866_v33 = vpop.eup %3865  ;;  %2110 = vmatprep.subr.bf16.mxu0 %v6602_v50  ;;  %2151 = vmatprep.subr.bf16.mxu1 %v5529_v3 }
 0x451   :  { %v5656_v27 = vmul.f32 %v3866_v33, %v3864_v0  ;;  %v6612_v0 = vld [vmem:[#allocation30_spill] sm:$0xff]  ;;  %v6613_v33 = vld [vmem:[#allocation31_spill] sm:$0xff] }
 0x453   :  { %6603 = vst [vmem:[#allocation50_spill] sm:$0xff] %v5656_v27  ;;  %2111 = vmatpush1.bf16.msra.mxu0 %v5537_v43  ;;  %2152 = vmatpush1.bf16.msra.mxu1 %v5543_v44  ;;  %v5664_v59 = vsel %vm1955_vm2, %v5656_v27, %v5550_v32  ;;  %v6606_v32 = vld [vmem:[#allocation24_spill] sm:$0xff]  ;;  %v6615_v27 = vld [vmem:[#allocation33_spill] sm:$0xff] }
 0x454   :  { %v2095_v2 = vpack.c.bf16 %v5664_v59, %v5664_v59  ;;  %2221 = vmatprep.subr.bf16.mxu0 %v5000_v45  ;;  %2262 = vmatprep.subr.bf16.mxu1 %v5006_v42  ;;  %v6604_v45 = vld [vmem:[#allocation22_spill] sm:$0xff]  ;;  %v6605_v42 = vld [vmem:[#allocation23_spill] sm:$0xff] }
 0x456   :  { %2129 = vmatmul.mubr.bf16.vlgmr.msra.gmra.mxu0 %v2095_v2  ;;  %2170 = vmatmul.mubr.bf16.vlgmr.msra.gmra.mxu1 %v2095_v2  ;;  %v6614_v2 = vld [vmem:[#allocation32_spill] sm:$0xff] }
 0x457   :  { %2222 = vmatpush1.bf16.msra.mxu0 %v5135_v56  ;;  %2263 = vmatpush1.bf16.msra.mxu1 %v5141_v4 }
 0x458   :  { %2223 = vmatprep.subr.bf16.mxu0 %v5147_v5  ;;  %2264 = vmatprep.subr.bf16.mxu1 %v5153_v6 }
 0x459   :  { %2253 = vmatprep.mubr.bf16.mxu0 %v6429_v1  ;;  %2294 = vmatprep.mubr.bf16.mxu1 %v6429_v1 }
 0x45b   :  { %2224 = vmatpush1.bf16.msra.mxu0 %v5161_v7  ;;  %2265 = vmatpush1.bf16.msra.mxu1 %v5167_v8 }
 0x45c   :  { %2225 = vmatprep.subr.bf16.mxu0 %v5173_v9  ;;  %2266 = vmatprep.subr.bf16.mxu1 %v5179_v11 }
 0x45f   :  { %2226 = vmatpush1.bf16.msra.mxu0 %v5185_v13  ;;  %2267 = vmatpush1.bf16.msra.mxu1 %v5191_v14  ;;  %v6625_v14 = vld [vmem:[#allocation53_spill] sm:$0xff] }
 0x460   :  { %2227 = vmatprep.subr.bf16.mxu0 %v5197_v38  ;;  %2268 = vmatprep.subr.bf16.mxu1 %v5203_v39 }
 0x463   :  { %2228 = vmatpush1.bf16.msra.mxu0 %v5209_v48  ;;  %2269 = vmatpush1.bf16.msra.mxu1 %v5215_v49 }
 0x464   :  { %2229 = vmatprep.subr.bf16.mxu0 %v6604_v45  ;;  %2270 = vmatprep.subr.bf16.mxu1 %v6605_v42  ;;  %v6622_v42 = vld [vmem:[#allocation52_spill] sm:$0xff] }
 0x467   :  { %2230 = vmatpush1.bf16.msra.mxu0 %v6606_v32  ;;  %2271 = vmatpush1.bf16.msra.mxu1 %v6607_v35  ;;  %v6617_v32 = vld [vmem:[#allocation35_spill] sm:$0xff]  ;;  %v6618_v35 = vld [vmem:[#allocation36_spill] sm:$0xff] }
 0x468   :  { %2231 = vmatprep.subr.bf16.mxu0 %v6608_v29  ;;  %2272 = vmatprep.subr.bf16.mxu1 %v6609_v63  ;;  %v6619_v29 = vld [vmem:[#allocation40_spill] sm:$0xff]  ;;  %v6620_v63 = vld [vmem:[#allocation42_spill] sm:$0xff] }
 0x46b   :  { %2232 = vmatpush1.bf16.msra.mxu0 %v6610_v20  ;;  %2273 = vmatpush1.bf16.msra.mxu1 %v6611_v34  ;;  %v6621_v20 = vld [vmem:[#allocation43_spill] sm:$0xff] }
 0x46c   :  { %2233 = vmatprep.subr.bf16.mxu0 %v6612_v0  ;;  %2274 = vmatprep.subr.bf16.mxu1 %v6613_v33 }
 0x46f   :  { %2234 = vmatpush1.bf16.msra.mxu0 %v6614_v2  ;;  %2275 = vmatpush1.bf16.msra.mxu1 %v6615_v27  ;;  %v6623_v27 = vld [vmem:[#allocation54_spill] sm:$0xff] }
 0x470   :  { %2235 = vmatprep.subr.bf16.mxu0 %v6616_v19  ;;  %2276 = vmatprep.subr.bf16.mxu1 %v6617_v32 }
 0x473   :  { %2236 = vmatpush1.bf16.msra.mxu0 %v6618_v35  ;;  %2277 = vmatpush1.bf16.msra.mxu1 %v6619_v29  ;;  %v6624_v29 = vld [vmem:[#allocation55_spill] sm:$0xff] }
 0x474   :  { %2346 = vmatprep.subr.bf16.mxu0 %v6620_v63  ;;  %2387 = vmatprep.subr.bf16.mxu1 %v6621_v20 }
 0x4f6   :  { %v2005_v34 = vpop.f32.mrf.mxu0  ;;  %v2046_v0 = vpop.f32.mrf.mxu1 }
 0x4f7   :  { %v2053_v33 = vadd.f32 %v2005_v34, %v6622_v42  ;;  %v2055_v20 = vadd.f32 %v2046_v0, %v6625_v14 }
 0x4f8   :  { %v2007_v45 = vpop.f32.mrf.mxu0  ;;  %v2048_v2 = vpop.f32.mrf.mxu1 }
 0x4f9   :  { %v3442_v49 = vmul.f32 -1.442695, %v2053_v33  ;;  %v2054_v48 = vadd.f32 %v2007_v45, %v6623_v27  ;;  %v2056_v63 = vadd.f32 %v2048_v2, %v6624_v29  ;;  %v6626_v27 = vld [vmem:[#allocation80_spill] sm:$0xff] }
 0x4fa   :  { %v2009_v19 = vpop.f32.mrf.mxu0  ;;  %v2050_v39 = vpop.f32.mrf.mxu1 }
 0x4fb   :  { %3867 = vpow2.f32 %v3442_v49  ;;  %v3443_v32 = vmul.f32 -1.442695, %v2054_v48  ;;  %v3444_v13 = vmul.f32 -1.442695, %v2056_v63  ;;  %v6627_v63 = vld [vmem:[#allocation82_spill] sm:$0xff] }
 0x4fc   :  { %v2010_v35 = vpop.f32.mrf.mxu0  ;;  %v2051_v38 = vpop.f32.mrf.mxu1 }
 0x4fd   :  { %3869 = vpow2.f32 %v3443_v32 }
 0x4fe   :  { %3871 = vtanh.f32 %v2055_v20 }
 0x4ff   :  { %3873 = vpow2.f32 %v3444_v13 }
 0x508   :  { %v3868_v11 = vpop.eup %3867 }
 0x509   :  { %v2060_v9 = vadd.f32 1.0, %v3868_v11 }
 0x50a   :  { %v3870_v42 = vpop.eup %3869 }
 0x50b   :  { %3875 = vrcp.f32 %v2060_v9  ;;  %v2066_v34 = vadd.f32 1.0, %v3870_v42  ;;  %v3872_v19 = vpop.eup %3871 }
 0x50c   :  { %v3874_v48 = vpop.eup %3873 }
 0x50d   :  { %3877 = vrcp.f32 %v2066_v34  ;;  %v2073_v20 = vadd.f32 1.0, %v3874_v48  ;;  %v6629_v48 = vld [vmem:[#allocation81_spill] sm:$0xff] }
 0x516   :  { %v2130_v39 = vpop.f32.mrf.mxu0  ;;  %v2171_v49 = vpop.f32.mrf.mxu1 }
 0x517   :  { %v2178_v38 = vadd.f32 %v2130_v39, %v6626_v27  ;;  %v6628_v39 = vld [vmem:[#allocation83_spill] sm:$0xff] }
 0x518   :  { %v3876_v45 = vpop.eup %3875  ;;  %v2132_v32 = vpop.f32.mrf.mxu0 }
 0x519   :  { %v2173_v35 = vpop.f32.mrf.mxu1  ;;  %v2077_v29 = vmul.f32 %v3876_v45, %v3872_v19  ;;  %v3445_v14 = vmul.f32 -1.442695, %v2178_v38  ;;  %v2179_v0 = vadd.f32 %v2132_v32, %v6627_v63  ;;  %v2180_v38 = vadd.f32 %v2171_v49, %v6629_v48 }
 0x51a   :  { %v3878_v11 = vpop.eup %3877  ;;  %v2134_v33 = vpop.f32.mrf.mxu0  ;;  %v2181_v27 = vadd.f32 %v2173_v35, %v6628_v39 }
 0x51b   :  { %v2175_v13 = vpop.f32.mrf.mxu1  ;;  %v2076_v9 = vmul.f32 %v3878_v11, %v5603_v30  ;;  %3879 = vpow2.f32 %v3445_v14  ;;  %v3446_v2 = vmul.f32 -1.442695, %v2179_v0 }
 0x51c   :  { %v2135_v42 = vpop.f32.mrf.mxu0  ;;  %v3447_v45 = vmul.f32 -1.442695, %v2181_v27 }
 0x51d   :  { %v2176_v34 = vpop.f32.mrf.mxu1  ;;  %v2078_v8 = vadd.f32 %v2077_v29, %v2076_v9  ;;  %3881 = vpow2.f32 %v3446_v2 }
 0x51e   :  { %3883 = vrcp.f32 %v2073_v20 }
 0x51f   :  { %3885 = vtanh.f32 %v2078_v8  ;;  %v5714_v19 = vsel %vm1955_vm2, %v2078_v8, %v5603_v30 }
 0x520   :  { %3887 = vtanh.f32 %v2180_v38 }
 0x521   :  { %3889 = vpow2.f32 %v3447_v45  ;;  %v5779_v45 = vld [vmem:[%s6268_s3 + $0xe4] ss:$16 sps:$4 sm:$0xff]  }
 0x528   :  { %v3880_v32 = vpop.eup %3879 }
 0x529   :  { %v2185_v63 = vadd.f32 1.0, %v3880_v32  ;;  %v5785_v32 = vld [vmem:[%s6268_s3 + $0xec] ss:$16 sps:$4 sm:$0xff]  }
 0x52a   :  { %v3882_v14 = vpop.eup %3881 }
 0x52b   :  { %v3884_v0 = vpop.eup %3883  ;;  %3891 = vrcp.f32 %v2185_v63  ;;  %v2191_v29 = vadd.f32 1.0, %v3882_v14  ;;  %v6631_v63 = vld [vmem:[#allocation14_spill] sm:$0xff]  ;;  %v6632_v14 = vld [vmem:[#allocation15_spill] sm:$0xff] }
 0x52c   :  { %v3886_v11 = vpop.eup %3885 }
 0x52d   :  { %3893 = vrcp.f32 %v2191_v29  ;;  %v5718_v20 = vmul.f32 %v3886_v11, %v3884_v0  ;;  %v3888_v49 = vpop.eup %3887  ;;  %v6633_v0 = vld [vmem:[#allocation16_spill] sm:$0xff]  ;;  %v6638_v29 = vld [vmem:[#allocation21_spill] sm:$0xff]  ;;  %v6639_v11 = vld [vmem:[#allocation22_spill] sm:$0xff] }
 0x52f   :  { %v5724_v8 = vsel %vm1955_vm2, %v5718_v20, %v5613_v18  ;;  %v3890_v18 = vpop.eup %3889 }
 0x530   :  { %v2220_v30 = vpack.c.bf16 %v5724_v8, %v5724_v8  ;;  %v2198_v9 = vadd.f32 1.0, %v3890_v18  ;;  %v6643_v18 = vld [vmem:[#allocation26_spill] sm:$0xff] }
 0x532   :  { %2254 = vmatmul.mubr.bf16.vlgmr.msra.gmra.mxu0 %v2220_v30  ;;  %2295 = vmatmul.mubr.bf16.vlgmr.msra.gmra.mxu1 %v2220_v30  ;;  %3895 = vrcp.f32 %v2198_v9  ;;  %v6641_v30 = vld [vmem:[#allocation24_spill] sm:$0xff]  ;;  %v6647_v9 = vld [vmem:[#allocation30_spill] sm:$0xff] }
 0x533   :  { %2347 = vmatpush1.bf16.msra.mxu0 %v5356_v10  ;;  %2388 = vmatpush1.bf16.msra.mxu1 %v5362_v62 }
 0x534   :  { %2348 = vmatprep.subr.bf16.mxu0 %v5368_v23  ;;  %2389 = vmatprep.subr.bf16.mxu1 %v5374_v24 }
 0x535   :  { %2378 = vmatprep.mubr.bf16.mxu0 %v6429_v1  ;;  %2419 = vmatprep.mubr.bf16.mxu1 %v6429_v1 }
 0x537   :  { %2349 = vmatpush1.bf16.msra.mxu0 %v5382_v47  ;;  %2390 = vmatpush1.bf16.msra.mxu1 %v5388_v41 }
 0x538   :  { %v3892_v35 = vpop.eup %3891  ;;  %2350 = vmatprep.subr.bf16.mxu0 %v5394_v53  ;;  %2391 = vmatprep.subr.bf16.mxu1 %v5400_v54 }
 0x539   :  { %v2202_v33 = vmul.f32 %v3892_v35, %v3888_v49  ;;  %v6642_v49 = vld [vmem:[#allocation25_spill] sm:$0xff]  ;;  %v6644_v35 = vld [vmem:[#allocation27_spill] sm:$0xff] }
 0x53a   :  { %v3894_v13 = vpop.eup %3893 }
 0x53b   :  { %v2201_v2 = vmul.f32 %v3894_v13, %v5640_v26  ;;  %2351 = vmatpush1.bf16.msra.mxu0 %v5407_v61  ;;  %2392 = vmatpush1.bf16.msra.mxu1 %v5413_v57  ;;  %v6646_v13 = vld [vmem:[#allocation29_spill] sm:$0xff] }
 0x53c   :  { %2352 = vmatprep.subr.bf16.mxu0 %v5419_v37  ;;  %2393 = vmatprep.subr.bf16.mxu1 %v5425_v12 }
 0x53d   :  { %v2203_v42 = vadd.f32 %v2202_v33, %v2201_v2  ;;  %v6645_v33 = vld [vmem:[#allocation28_spill] sm:$0xff]  ;;  %v6648_v2 = vld [vmem:[#allocation31_spill] sm:$0xff] }
 0x53f   :  { %3897 = vtanh.f32 %v2203_v42  ;;  %2353 = vmatpush1.bf16.msra.mxu0 %v5434_v21  ;;  %2394 = vmatpush1.bf16.msra.mxu1 %v5440_v52  ;;  %v5748_v34 = vsel %vm1824_vm1, %v2203_v42, %v5640_v26  ;;  %v3896_v26 = vpop.eup %3895  ;;  %v6649_v42 = vld [vmem:[#allocation32_spill] sm:$0xff] }
 0x540   :  { %2354 = vmatprep.subr.bf16.mxu0 %v5451_v25  ;;  %2395 = vmatprep.subr.bf16.mxu1 %v5457_v40 }
 0x543   :  { %2355 = vmatpush1.bf16.msra.mxu0 %v5463_v60  ;;  %2396 = vmatpush1.bf16.msra.mxu1 %v5469_v58 }
 0x544   :  { %2356 = vmatprep.subr.bf16.mxu0 %v6594_v51  ;;  %2397 = vmatprep.subr.bf16.mxu1 %v6595_v15 }
 0x547   :  { %2357 = vmatpush1.bf16.msra.mxu0 %v6596_v16  ;;  %2398 = vmatpush1.bf16.msra.mxu1 %v6597_v46 }
 0x548   :  { %2358 = vmatprep.subr.bf16.mxu0 %v6598_v22  ;;  %2399 = vmatprep.subr.bf16.mxu1 %v6599_v55 }
 0x54b   :  { %2359 = vmatpush1.bf16.msra.mxu0 %v6600_v17  ;;  %2400 = vmatpush1.bf16.msra.mxu1 %v6601_v31 }
 0x54c   :  { %v3898_v39 = vpop.eup %3897  ;;  %2360 = vmatprep.subr.bf16.mxu0 %v6602_v50  ;;  %2401 = vmatprep.subr.bf16.mxu1 %v5529_v3 }
 0x54d   :  { %v5764_v27 = vmul.f32 %v3898_v39, %v3896_v26  ;;  %v6650_v26 = vld [vmem:[#allocation33_spill] sm:$0xff]  ;;  %v6651_v39 = vld [vmem:[#allocation34_spill] sm:$0xff] }
 0x54f   :  { %2361 = vmatpush1.bf16.msra.mxu0 %v5537_v43  ;;  %2402 = vmatpush1.bf16.msra.mxu1 %v5543_v44  ;;  %v5772_v48 = vsel %vm1824_vm1, %v5764_v27, %v5664_v59  ;;  %v6630_v59 = vld [vmem:[#allocation13_spill] sm:$0xff] }
 0x550   :  { %v2345_v38 = vpack.c.bf16 %v5772_v48, %v5772_v48  ;;  %2471 = vmatprep.subr.bf16.mxu0 %v5779_v45  ;;  %2512 = vmatprep.subr.bf16.mxu1 %v5785_v32 }
 0x552   :  { %2379 = vmatmul.mubr.bf16.vlgmr.msra.gmra.mxu0 %v2345_v38  ;;  %2420 = vmatmul.mubr.bf16.vlgmr.msra.gmra.mxu1 %v2345_v38  ;;  %v6652_v38 = vld [vmem:[#allocation35_spill] sm:$0xff] }
 0x553   :  { %2472 = vmatpush1.bf16.msra.mxu0 %v5135_v56  ;;  %2513 = vmatpush1.bf16.msra.mxu1 %v5141_v4  ;;  %v6634_v56 = vld [vmem:[#allocation17_spill] sm:$0xff]  ;;  %v6635_v4 = vld [vmem:[#allocation18_spill] sm:$0xff] }
 0x554   :  { %2473 = vmatprep.subr.bf16.mxu0 %v5147_v5  ;;  %2514 = vmatprep.subr.bf16.mxu1 %v5153_v6  ;;  %v6636_v5 = vld [vmem:[#allocation19_spill] sm:$0xff]  ;;  %v6637_v6 = vld [vmem:[#allocation20_spill] sm:$0xff] }
 0x555   :  { %2503 = vmatprep.mubr.bf16.mxu0 %v6429_v1  ;;  %2544 = vmatprep.mubr.bf16.mxu1 %v6429_v1 }
 0x557   :  { %2474 = vmatpush1.bf16.msra.mxu0 %v5161_v7  ;;  %2515 = vmatpush1.bf16.msra.mxu1 %v6630_v59  ;;  %v6640_v7 = vld [vmem:[#allocation23_spill] sm:$0xff]  ;;  %v6653_v59 = vld [vmem:[#allocation36_spill] sm:$0xff] }
 0x558   :  { %2475 = vmatprep.subr.bf16.mxu0 %v6631_v63  ;;  %2516 = vmatprep.subr.bf16.mxu1 %v6632_v14  ;;  %v6654_v63 = vld [vmem:[#allocation40_spill] sm:$0xff]  ;;  %v6655_v14 = vld [vmem:[#allocation42_spill] sm:$0xff] }
 0x55b   :  { %2476 = vmatpush1.bf16.msra.mxu0 %v6633_v0  ;;  %2517 = vmatpush1.bf16.msra.mxu1 %v6634_v56  ;;  %v6656_v0 = vld [vmem:[#allocation43_spill] sm:$0xff] }
 0x55c   :  { %2477 = vmatprep.subr.bf16.mxu0 %v6635_v4  ;;  %2518 = vmatprep.subr.bf16.mxu1 %v6636_v5  ;;  %v6657_v5 = vld [vmem:[#allocation56_spill] sm:$0xff] }
 0x55f   :  { %2478 = vmatpush1.bf16.msra.mxu0 %v6637_v6  ;;  %2519 = vmatpush1.bf16.msra.mxu1 %v6638_v29 }
 0x560   :  { %2479 = vmatprep.subr.bf16.mxu0 %v6639_v11  ;;  %2520 = vmatprep.subr.bf16.mxu1 %v6640_v7 }
 0x563   :  { %2480 = vmatpush1.bf16.msra.mxu0 %v6641_v30  ;;  %2521 = vmatpush1.bf16.msra.mxu1 %v6642_v49  ;;  %v6658_v30 = vld [vmem:[#allocation58_spill] sm:$0xff] }
 0x564   :  { %2481 = vmatprep.subr.bf16.mxu0 %v6643_v18  ;;  %2522 = vmatprep.subr.bf16.mxu1 %v6644_v35 }
 0x567   :  { %2482 = vmatpush1.bf16.msra.mxu0 %v6645_v33  ;;  %2523 = vmatpush1.bf16.msra.mxu1 %v6646_v13 }
 0x568   :  { %2483 = vmatprep.subr.bf16.mxu0 %v6647_v9  ;;  %2524 = vmatprep.subr.bf16.mxu1 %v6648_v2  ;;  %v6659_v2 = vld [vmem:[#allocation59_spill] sm:$0xff] }
 0x56b   :  { %2484 = vmatpush1.bf16.msra.mxu0 %v6649_v42  ;;  %2525 = vmatpush1.bf16.msra.mxu1 %v6650_v26  ;;  %v6660_v26 = vld [vmem:[#allocation57_spill] sm:$0xff] }
 0x56c   :  { %2485 = vmatprep.subr.bf16.mxu0 %v6651_v39  ;;  %2526 = vmatprep.subr.bf16.mxu1 %v6652_v38 }
 0x56f   :  { %2486 = vmatpush1.bf16.msra.mxu0 %v6653_v59  ;;  %2527 = vmatpush1.bf16.msra.mxu1 %v6654_v63 }
 0x570   :  { %2596 = vmatprep.subr.bf16.mxu0 %v6655_v14  ;;  %2637 = vmatprep.subr.bf16.mxu1 %v6656_v0 }
 0x5f2   :  { %v2255_v56 = vpop.f32.mrf.mxu0  ;;  %v2296_v4 = vpop.f32.mrf.mxu1 }
 0x5f3   :  { %v2303_v6 = vadd.f32 %v2255_v56, %v6657_v5  ;;  %v2305_v39 = vadd.f32 %v2296_v4, %v6660_v26 }
 0x5f4   :  { %v2257_v29 = vpop.f32.mrf.mxu0  ;;  %v2298_v11 = vpop.f32.mrf.mxu1 }
 0x5f5   :  { %v3448_v7 = vmul.f32 -1.442695, %v2303_v6  ;;  %v2304_v49 = vadd.f32 %v2257_v29, %v6658_v30  ;;  %v2306_v42 = vadd.f32 %v2298_v11, %v6659_v2 }
 0x5f6   :  { %v2259_v18 = vpop.f32.mrf.mxu0  ;;  %v2300_v35 = vpop.f32.mrf.mxu1 }
 0x5f7   :  { %3899 = vpow2.f32 %v3448_v7  ;;  %v3449_v33 = vmul.f32 -1.442695, %v2304_v49  ;;  %v3450_v38 = vmul.f32 -1.442695, %v2306_v42  ;;  %v6661_v7 = vld [vmem:[#allocation76_spill] sm:$0xff] }
 0x5f8   :  { %v2260_v13 = vpop.f32.mrf.mxu0  ;;  %v2301_v9 = vpop.f32.mrf.mxu1 }
 0x5f9   :  { %3901 = vpow2.f32 %v3449_v33  ;;  %v6662_v33 = vld [vmem:[#allocation78_spill] sm:$0xff] }
 0x5fa   :  { %3903 = vtanh.f32 %v2305_v39 }
 0x5fb   :  { %3905 = vpow2.f32 %v3450_v38 }
 0x604   :  { %v3900_v59 = vpop.eup %3899 }
 0x605   :  { %v2310_v63 = vadd.f32 1.0, %v3900_v59 }
 0x606   :  { %v3902_v14 = vpop.eup %3901 }
 0x607   :  { %3907 = vrcp.f32 %v2310_v63  ;;  %v2316_v0 = vadd.f32 1.0, %v3902_v14  ;;  %v3904_v56 = vpop.eup %3903 }
 0x608   :  { %v3906_v29 = vpop.eup %3905 }
 0x609   :  { %3909 = vrcp.f32 %v2316_v0  ;;  %v2323_v2 = vadd.f32 1.0, %v3906_v29  ;;  %v6665_v29 = vld [vmem:[#allocation77_spill] sm:$0xff]  ;;  %v3734_v0 = vld [vmem:[%s6274_s9 + $0x20] sm:$0xff]  }
 0x612   :  { %v2380_v5 = vpop.f32.mrf.mxu0  ;;  %v2421_v6 = vpop.f32.mrf.mxu1 }
 0x613   :  { %v2428_v30 = vadd.f32 %v2380_v5, %v6661_v7  ;;  %v6664_v5 = vld [vmem:[#allocation79_spill] sm:$0xff] }
 0x614   :  { %v3908_v49 = vpop.eup %3907  ;;  %v2382_v18 = vpop.f32.mrf.mxu0 }
 0x615   :  { %v2423_v11 = vpop.f32.mrf.mxu1  ;;  %v2327_v35 = vmul.f32 %v3908_v49, %v3904_v56  ;;  %v3451_v4 = vmul.f32 -1.442695, %v2428_v30  ;;  %v2429_v13 = vadd.f32 %v2382_v18, %v6662_v33  ;;  %v2430_v30 = vadd.f32 %v2421_v6, %v6665_v29  ;;  %v4091_v29 = vld [vmem:[%s6269_s6 + $0xe4] ss:$16 sps:$4 sm:$0xff]  }
 0x616   :  { %v3910_v9 = vpop.eup %3909  ;;  %v2384_v42 = vpop.f32.mrf.mxu0  ;;  %v2431_v7 = vadd.f32 %v2423_v11, %v6664_v5  ;;  %v4089_v5 = vld [vmem:[%s6268_s3] ss:$16 sps:$4 sm:$0xff]  }
 0x617   :  { %v2425_v26 = vpop.f32.mrf.mxu1  ;;  %v2326_v39 = vmul.f32 %v3910_v9, %v5714_v19  ;;  %3911 = vpow2.f32 %v3451_v4  ;;  %v3452_v38 = vmul.f32 -1.442695, %v2429_v13 }
 0x618   :  { %v2385_v59 = vpop.f32.mrf.mxu0  ;;  %v3453_v49 = vmul.f32 -1.442695, %v2431_v7  ;;  %v4083_v26 = vld [vmem:[%s6268_s3 + $0x24] ss:$16 sps:$4 sm:$0xff]   ;;  %v4090_v7 = vld [vmem:[%s6268_s3 + $0x8] ss:$16 sps:$4 sm:$0xff]  }
 0x619   :  { %v2426_v63 = vpop.f32.mrf.mxu1  ;;  %v2328_v14 = vadd.f32 %v2327_v35, %v2326_v39  ;;  %3913 = vpow2.f32 %v3452_v38  ;;  %v4084_v39 = vld [vmem:[%s6268_s3 + $0x2c] ss:$16 sps:$4 sm:$0xff]   ;;  %v4085_v38 = vld [vmem:[%s6268_s3 + $0x20] ss:$16 sps:$4 sm:$0xff]   ;;  %v4086_v59 = vld [vmem:[%s6268_s3 + $0x28] ss:$16 sps:$4 sm:$0xff]  }
 0x61a   :  { %3915 = vrcp.f32 %v2323_v2  ;;  %v4087_v63 = vld [vmem:[%s6268_s3 + $0x4] ss:$16 sps:$4 sm:$0xff]  }
 0x61b   :  { %3917 = vtanh.f32 %v2328_v14  ;;  %v5832_v56 = vsel %vm1693_vm0, %v2328_v14, %v5714_v19  ;;  %v4088_v14 = vld [vmem:[%s6268_s3 + $0xc] ss:$16 sps:$4 sm:$0xff]  }
 0x61c   :  { %3919 = vtanh.f32 %v2430_v30  ;;  %v4092_v30 = vld [vmem:[%s6269_s6 + $0xec] ss:$16 sps:$4 sm:$0xff]  }
 0x61d   :  { %3921 = vpow2.f32 %v3453_v49 }
 0x624   :  { %v3912_v18 = vpop.eup %3911 }
 0x625   :  { %v2435_v33 = vadd.f32 1.0, %v3912_v18 }
 0x626   :  { %v3914_v4 = vpop.eup %3913 }
 0x627   :  { %v3916_v13 = vpop.eup %3915  ;;  %3923 = vrcp.f32 %v2435_v33  ;;  %v2441_v35 = vadd.f32 1.0, %v3914_v4  ;;  %v6667_v33 = vld [vmem:[#allocation60_spill] sm:$0xff] }
 0x628   :  { %v3918_v9 = vpop.eup %3917 }
 0x629   :  { %3925 = vrcp.f32 %v2441_v35  ;;  %v5836_v2 = vmul.f32 %v3918_v9, %v3916_v13  ;;  %v3920_v11 = vpop.eup %3919 }
 0x62b   :  { %v5842_v19 = vsel %vm1693_vm0, %v5836_v2, %v5724_v8  ;;  %v3922_v8 = vpop.eup %3921 }
 0x62c   :  { %v2470_v6 = vpack.c.bf16 %v5842_v19, %v5842_v19 }
 0x62e   :  { %2504 = vmatmul.mubr.bf16.vlgmr.msra.gmra.mxu0 %v2470_v6  ;;  %2545 = vmatmul.mubr.bf16.vlgmr.msra.gmra.mxu1 %v2470_v6  ;;  %v6668_v6 = vld [vmem:[#allocation62_spill] sm:$0xff] }
 0x62f   :  { %2597 = vmatpush1.bf16.msra.mxu0 %v5356_v10  ;;  %2638 = vmatpush1.bf16.msra.mxu1 %v5362_v62 }
 0x630   :  { %2598 = vmatprep.subr.bf16.mxu0 %v5368_v23  ;;  %2639 = vmatprep.subr.bf16.mxu1 %v5374_v24  ;;  %v2448_v23 = vadd.f32 1.0, %v3922_v8 }
 0x631   :  { %2628 = vmatprep.mubr.bf16.mxu0 %v6429_v1  ;;  %2669 = vmatprep.mubr.bf16.mxu1 %v6429_v1 }
 0x632   :  { %3927 = vrcp.f32 %v2448_v23 }
 0x633   :  { %2599 = vmatpush1.bf16.msra.mxu0 %v5382_v47  ;;  %2640 = vmatpush1.bf16.msra.mxu1 %v5388_v41  ;;  %v3736_v41 = vld [vmem:[%s6274_s9 + $0x10] sm:$0xff]  }
 0x634   :  { %v3924_v42 = vpop.eup %3923  ;;  %2600 = vmatprep.subr.bf16.mxu0 %v5394_v53  ;;  %2641 = vmatprep.subr.bf16.mxu1 %v5400_v54 }
 0x635   :  { %v2452_v10 = vmul.f32 %v3924_v42, %v3920_v11 }
 0x636   :  { %v3926_v62 = vpop.eup %3925 }
 0x637   :  { %v2451_v24 = vmul.f32 %v3926_v62, %v5748_v34  ;;  %2601 = vmatpush1.bf16.msra.mxu0 %v5407_v61  ;;  %2642 = vmatpush1.bf16.msra.mxu1 %v5413_v57 }
 0x638   :  { %2602 = vmatprep.subr.bf16.mxu0 %v5419_v37  ;;  %2643 = vmatprep.subr.bf16.mxu1 %v5425_v12 }
 0x639   :  { %v2453_v47 = vadd.f32 %v2452_v10, %v2451_v24  ;;  %v6669_v24 = vld [vmem:[#allocation63_spill] sm:$0xff] }
 0x63b   :  { %3929 = vtanh.f32 %v2453_v47  ;;  %2603 = vmatpush1.bf16.msra.mxu0 %v5434_v21  ;;  %2644 = vmatpush1.bf16.msra.mxu1 %v5440_v52  ;;  %v5866_v53 = vsel %vm1562_vm15, %v2453_v47, %v5748_v34  ;;  %v4063_v21 = vld [vmem:[%s6268_s3 + $0xc4] ss:$16 sps:$4 sm:$0xff]   ;;  %v4064_v52 = vld [vmem:[%s6268_s3 + $0xcc] ss:$16 sps:$4 sm:$0xff]  }
 0x63c   :  { %2604 = vmatprep.subr.bf16.mxu0 %v5451_v25  ;;  %2645 = vmatprep.subr.bf16.mxu1 %v5457_v40  ;;  %v4065_v25 = vld [vmem:[%s6268_s3 + $0xc0] ss:$16 sps:$4 sm:$0xff]   ;;  %v4066_v40 = vld [vmem:[%s6268_s3 + $0xc8] ss:$16 sps:$4 sm:$0xff]   ;;  %v4079_v34 = vld [vmem:[%s6268_s3 + $0x44] ss:$16 sps:$4 sm:$0xff]  }
 0x63f   :  { %2605 = vmatpush1.bf16.msra.mxu0 %v5463_v60  ;;  %2646 = vmatpush1.bf16.msra.mxu1 %v5469_v58  ;;  %v3928_v54 = vpop.eup %3927  ;;  %v4067_v60 = vld [vmem:[%s6268_s3 + $0xa4] ss:$16 sps:$4 sm:$0xff]   ;;  %v4068_v58 = vld [vmem:[%s6268_s3 + $0xac] ss:$16 sps:$4 sm:$0xff]  }
 0x640   :  { %2606 = vmatprep.subr.bf16.mxu0 %v6594_v51  ;;  %2647 = vmatprep.subr.bf16.mxu1 %v6595_v15  ;;  %v4070_v51 = vld [vmem:[%s6268_s3 + $0xa8] ss:$16 sps:$4 sm:$0xff]   ;;  %v4071_v15 = vld [vmem:[%s6268_s3 + $0x84] ss:$16 sps:$4 sm:$0xff]  }
 0x643   :  { %2607 = vmatpush1.bf16.msra.mxu0 %v6596_v16  ;;  %2648 = vmatpush1.bf16.msra.mxu1 %v6597_v46  ;;  %v4072_v16 = vld [vmem:[%s6268_s3 + $0x8c] ss:$16 sps:$4 sm:$0xff]   ;;  %v4073_v46 = vld [vmem:[%s6268_s3 + $0x80] ss:$16 sps:$4 sm:$0xff]  }
 0x644   :  { %2608 = vmatprep.subr.bf16.mxu0 %v6598_v22  ;;  %2649 = vmatprep.subr.bf16.mxu1 %v6599_v55  ;;  %v4074_v22 = vld [vmem:[%s6268_s3 + $0x88] ss:$16 sps:$4 sm:$0xff]   ;;  %v4075_v55 = vld [vmem:[%s6268_s3 + $0x64] ss:$16 sps:$4 sm:$0xff]  }
 0x647   :  { %2609 = vmatpush1.bf16.msra.mxu0 %v6600_v17  ;;  %2650 = vmatpush1.bf16.msra.mxu1 %v6601_v31  ;;  %v4076_v17 = vld [vmem:[%s6268_s3 + $0x6c] ss:$16 sps:$4 sm:$0xff]   ;;  %v4077_v31 = vld [vmem:[%s6268_s3 + $0x60] ss:$16 sps:$4 sm:$0xff]  }
 0x648   :  { %v3930_v61 = vpop.eup %3929  ;;  %2610 = vmatprep.subr.bf16.mxu0 %v6602_v50  ;;  %2651 = vmatprep.subr.bf16.mxu1 %v5529_v3  ;;  %v4069_v3 = vld [vmem:[%s6268_s3 + $0xa0] ss:$16 sps:$4 sm:$0xff]   ;;  %v4078_v50 = vld [vmem:[%s6268_s3 + $0x68] ss:$16 sps:$4 sm:$0xff]  }
 0x649   :  { %v5882_v57 = vmul.f32 %v3930_v61, %v3928_v54  ;;  %v6670_v54 = vld [vmem:[#allocation61_spill] sm:$0xff] }
 0x64b   :  { %2611 = vmatpush1.bf16.msra.mxu0 %v5537_v43  ;;  %2652 = vmatpush1.bf16.msra.mxu1 %v5543_v44  ;;  %v5890_v37 = vsel %vm1562_vm15, %v5882_v57, %v5772_v48  ;;  %v4061_v43 = vld [vmem:[%s6268_s3 + $0xe0] ss:$16 sps:$4 sm:$0xff]   ;;  %v4062_v44 = vld [vmem:[%s6268_s3 + $0xe8] ss:$16 sps:$4 sm:$0xff]   ;;  %v4080_v48 = vld [vmem:[%s6268_s3 + $0x4c] ss:$16 sps:$4 sm:$0xff]  }
 0x64c   :  { %v2595_v12 = vpack.c.bf16 %v5890_v37, %v5890_v37  ;;  %2721 = vmatprep.subr.bf16.mxu0 %v5779_v45  ;;  %2762 = vmatprep.subr.bf16.mxu1 %v5785_v32  ;;  %v4081_v45 = vld [vmem:[%s6268_s3 + $0x40] ss:$16 sps:$4 sm:$0xff]   ;;  %v4082_v32 = vld [vmem:[%s6268_s3 + $0x48] ss:$16 sps:$4 sm:$0xff]  }
 0x64e   :  { %2629 = vmatmul.mubr.bf16.vlgmr.msra.gmra.mxu0 %v2595_v12  ;;  %2670 = vmatmul.mubr.bf16.vlgmr.msra.gmra.mxu1 %v2595_v12 }
 0x64f   :  { %2722 = vmatpush1.bf16.msra.mxu0 %v4061_v43  ;;  %2763 = vmatpush1.bf16.msra.mxu1 %v4062_v44 }
 0x650   :  { %2723 = vmatprep.subr.bf16.mxu0 %v4063_v21  ;;  %2764 = vmatprep.subr.bf16.mxu1 %v4064_v52 }
 0x651   :  { %2753 = vmatprep.mubr.bf16.mxu0 %v6429_v1  ;;  %2794 = vmatprep.mubr.bf16.mxu1 %v6429_v1 }
 0x653   :  { %2724 = vmatpush1.bf16.msra.mxu0 %v4065_v25  ;;  %2765 = vmatpush1.bf16.msra.mxu1 %v4066_v40 }
 0x654   :  { %2725 = vmatprep.subr.bf16.mxu0 %v4067_v60  ;;  %2766 = vmatprep.subr.bf16.mxu1 %v4068_v58 }
 0x657   :  { %2726 = vmatpush1.bf16.msra.mxu0 %v4069_v3  ;;  %2767 = vmatpush1.bf16.msra.mxu1 %v4070_v51  ;;  %v6671_v3 = vld [vmem:[#allocation72_spill] sm:$0xff] }
 0x658   :  { %2727 = vmatprep.subr.bf16.mxu0 %v4071_v15  ;;  %2768 = vmatprep.subr.bf16.mxu1 %v4072_v16 }
 0x65b   :  { %2728 = vmatpush1.bf16.msra.mxu0 %v4073_v46  ;;  %2769 = vmatpush1.bf16.msra.mxu1 %v4074_v22 }
 0x65c   :  { %2729 = vmatprep.subr.bf16.mxu0 %v4075_v55  ;;  %2770 = vmatprep.subr.bf16.mxu1 %v4076_v17  ;;  %v6672_v17 = vld [vmem:[#allocation74_spill] sm:$0xff] }
 0x65f   :  { %2730 = vmatpush1.bf16.msra.mxu0 %v4077_v31  ;;  %2771 = vmatpush1.bf16.msra.mxu1 %v4078_v50 }
 0x660   :  { %2731 = vmatprep.subr.bf16.mxu0 %v4079_v34  ;;  %2772 = vmatprep.subr.bf16.mxu1 %v4080_v48 }
 0x663   :  { %2732 = vmatpush1.bf16.msra.mxu0 %v4081_v45  ;;  %2773 = vmatpush1.bf16.msra.mxu1 %v4082_v32 }
 0x664   :  { %2733 = vmatprep.subr.bf16.mxu0 %v4083_v26  ;;  %2774 = vmatprep.subr.bf16.mxu1 %v4084_v39 }
 0x667   :  { %2734 = vmatpush1.bf16.msra.mxu0 %v4085_v38  ;;  %2775 = vmatpush1.bf16.msra.mxu1 %v4086_v59 }
 0x668   :  { %2735 = vmatprep.subr.bf16.mxu0 %v4087_v63  ;;  %2776 = vmatprep.subr.bf16.mxu1 %v4088_v14 }
 0x66b   :  { %2736 = vmatpush1.bf16.msra.mxu0 %v4089_v5  ;;  %2777 = vmatpush1.bf16.msra.mxu1 %v4090_v7  ;;  %v6674_v5 = vld [vmem:[#allocation75_spill] sm:$0xff] }
 0x66c   :  { %2845 = vmatprep.subr.bf16.mxu0 %v4091_v29  ;;  %2886 = vmatprep.subr.bf16.mxu1 %v4092_v30  ;;  %v6675_v29 = vld [vmem:[#allocation73_spill] sm:$0xff] }
 0x6ee   :  { %v2505_v49 = vpop.f32.mrf.mxu0  ;;  %v2546_v18 = vpop.f32.mrf.mxu1 }
 0x6ef   :  { %v2553_v4 = vadd.f32 %v2505_v49, %v6667_v33  ;;  %v2555_v61 = vadd.f32 %v2546_v18, %v6670_v54 }
 0x6f0   :  { %v2507_v13 = vpop.f32.mrf.mxu0  ;;  %v2548_v35 = vpop.f32.mrf.mxu1 }
 0x6f1   :  { %v3454_v9 = vmul.f32 -1.442695, %v2553_v4  ;;  %v2554_v11 = vadd.f32 %v2507_v13, %v6668_v6  ;;  %v2556_v47 = vadd.f32 %v2548_v35, %v6669_v24  ;;  %v4097_v24 = vld [vmem:[%s6269_s6 + $0xc0] ss:$16 sps:$4 sm:$0xff]  }
 0x6f2   :  { %v2509_v8 = vpop.f32.mrf.mxu0  ;;  %v2550_v42 = vpop.f32.mrf.mxu1 }
 0x6f3   :  { %3931 = vpow2.f32 %v3454_v9  ;;  %v3455_v10 = vmul.f32 -1.442695, %v2554_v11  ;;  %v3456_v12 = vmul.f32 -1.442695, %v2556_v47  ;;  %v4093_v8 = vld [vmem:[%s6269_s6 + $0xe0] ss:$16 sps:$4 sm:$0xff]  }
 0x6f4   :  { %v2510_v62 = vpop.f32.mrf.mxu0  ;;  %v2551_v23 = vpop.f32.mrf.mxu1  ;;  %v4094_v42 = vld [vmem:[%s6269_s6 + $0xe8] ss:$16 sps:$4 sm:$0xff]  }
 0x6f5   :  { %3933 = vpow2.f32 %v3455_v10  ;;  %v4095_v10 = vld [vmem:[%s6269_s6 + $0xc4] ss:$16 sps:$4 sm:$0xff]   ;;  %v4098_v47 = vld [vmem:[%s6269_s6 + $0xc8] ss:$16 sps:$4 sm:$0xff]  }
 0x6f6   :  { %3935 = vtanh.f32 %v2555_v61  ;;  %v4099_v61 = vld [vmem:[%s6269_s6 + $0xa4] ss:$16 sps:$4 sm:$0xff]  }
 0x6f7   :  { %3937 = vpow2.f32 %v3456_v12 }
 0x700   :  { %v3932_v43 = vpop.eup %3931 }
 0x701   :  { %v2560_v44 = vadd.f32 1.0, %v3932_v43 }
 0x702   :  { %v3934_v21 = vpop.eup %3933 }
 0x703   :  { %3939 = vrcp.f32 %v2560_v44  ;;  %v2566_v52 = vadd.f32 1.0, %v3934_v21  ;;  %v3936_v25 = vpop.eup %3935 }
 0x704   :  { %v3938_v58 = vpop.eup %3937 }
 0x705   :  { %3941 = vrcp.f32 %v2566_v52  ;;  %v2573_v34 = vadd.f32 1.0, %v3938_v58  ;;  %v4101_v52 = vld [vmem:[%s6269_s6 + $0xa0] ss:$16 sps:$4 sm:$0xff]  }
 0x70e   :  { %v2630_v40 = vpop.f32.mrf.mxu0  ;;  %v2671_v60 = vpop.f32.mrf.mxu1 }
 0x70f   :  { %v2678_v51 = vadd.f32 %v2630_v40, %v6671_v3  ;;  %v2680_v30 = vadd.f32 %v2671_v60, %v6675_v29  ;;  %v4103_v40 = vld [vmem:[%s6269_s6 + $0x84] ss:$16 sps:$4 sm:$0xff]   ;;  %v4104_v60 = vld [vmem:[%s6269_s6 + $0x8c] ss:$16 sps:$4 sm:$0xff]   ;;  %v4105_v3 = vld [vmem:[%s6269_s6 + $0x80] ss:$16 sps:$4 sm:$0xff]  }
 0x710   :  { %v3940_v15 = vpop.eup %3939  ;;  %v2632_v16 = vpop.f32.mrf.mxu0 }
 0x711   :  { %v2673_v46 = vpop.f32.mrf.mxu1  ;;  %v2577_v22 = vmul.f32 %v3940_v15, %v3936_v25  ;;  %v3457_v55 = vmul.f32 -1.442695, %v2678_v51  ;;  %v2679_v31 = vadd.f32 %v2632_v16, %v6672_v17  ;;  %v4102_v25 = vld [vmem:[%s6269_s6 + $0xa8] ss:$16 sps:$4 sm:$0xff]   ;;  %v4111_v17 = vld [vmem:[%s6269_s6 + $0x44] ss:$16 sps:$4 sm:$0xff]  }
 0x712   :  { %v3942_v50 = vpop.eup %3941  ;;  %v2634_v48 = vpop.f32.mrf.mxu0  ;;  %v2681_v7 = vadd.f32 %v2673_v46, %v6674_v5  ;;  %v4106_v51 = vld [vmem:[%s6269_s6 + $0x88] ss:$16 sps:$4 sm:$0xff]   ;;  %v4107_v46 = vld [vmem:[%s6269_s6 + $0x64] ss:$16 sps:$4 sm:$0xff]   ;;  %v4120_v5 = vld [vmem:[%s6269_s6 + $0xc] ss:$16 sps:$4 sm:$0xff]  }
 0x713   :  { %v2675_v45 = vpop.f32.mrf.mxu1  ;;  %v2576_v32 = vmul.f32 %v3942_v50, %v5832_v56  ;;  %3943 = vpow2.f32 %v3457_v55  ;;  %v3458_v26 = vmul.f32 -1.442695, %v2679_v31  ;;  %v4109_v55 = vld [vmem:[%s6269_s6 + $0x60] ss:$16 sps:$4 sm:$0xff]   ;;  %v4112_v31 = vld [vmem:[%s6269_s6 + $0x4c] ss:$16 sps:$4 sm:$0xff]  }
 0x714   :  { %v2635_v39 = vpop.f32.mrf.mxu0  ;;  %v3459_v49 = vmul.f32 -1.442695, %v2681_v7  ;;  %v4113_v50 = vld [vmem:[%s6269_s6 + $0x40] ss:$16 sps:$4 sm:$0xff]   ;;  %v4115_v48 = vld [vmem:[%s6269_s6 + $0x24] ss:$16 sps:$4 sm:$0xff]  }
 0x715   :  { %v2676_v38 = vpop.f32.mrf.mxu1  ;;  %v2578_v59 = vadd.f32 %v2577_v22, %v2576_v32  ;;  %3945 = vpow2.f32 %v3458_v26  ;;  %v4108_v22 = vld [vmem:[%s6269_s6 + $0x6c] ss:$16 sps:$4 sm:$0xff]   ;;  %v4117_v26 = vld [vmem:[%s6269_s6 + $0x20] ss:$16 sps:$4 sm:$0xff]   ;;  %v4118_v39 = vld [vmem:[%s6269_s6 + $0x28] ss:$16 sps:$4 sm:$0xff]  }
 0x716   :  { %3947 = vrcp.f32 %v2573_v34  ;;  %v4114_v34 = vld [vmem:[%s6269_s6 + $0x48] ss:$16 sps:$4 sm:$0xff]   ;;  %v4116_v45 = vld [vmem:[%s6269_s6 + $0x2c] ss:$16 sps:$4 sm:$0xff]  }
 0x717   :  { %3949 = vtanh.f32 %v2578_v59  ;;  %v6004_v14 = vsel %vm1431_vm14, %v2578_v59, %v5832_v56  ;;  %v4119_v59 = vld [vmem:[%s6269_s6 + $0x4] ss:$16 sps:$4 sm:$0xff]   ;;  %v3723_v7 = vld [vmem:[%s6273_s8 + $0x38] sm:$0xff]  }
 0x718   :  { %3951 = vtanh.f32 %v2680_v30  ;;  %v4121_v30 = vld [vmem:[%s6269_s6] ss:$16 sps:$4 sm:$0xff]  }
 0x719   :  { %3953 = vpow2.f32 %v3459_v49  ;;  %v4122_v49 = vld [vmem:[%s6269_s6 + $0x8] ss:$16 sps:$4 sm:$0xff]  }
 0x720   :  { %v3944_v18 = vpop.eup %3943 }
 0x721   :  { %v2685_v33 = vadd.f32 1.0, %v3944_v18 }
 0x722   :  { %v3946_v4 = vpop.eup %3945 }
 0x723   :  { %v3948_v13 = vpop.eup %3947  ;;  %3955 = vrcp.f32 %v2685_v33  ;;  %v2691_v35 = vadd.f32 1.0, %v3946_v4  ;;  %v3724_v4 = vld [vmem:[%s6273_s8 + $0x30] sm:$0xff]  }
 0x724   :  { %v3950_v9 = vpop.eup %3949 }
 0x725   :  { %3957 = vrcp.f32 %v2691_v35  ;;  %v6008_v6 = vmul.f32 %v3950_v9, %v3948_v13  ;;  %v3952_v62 = vpop.eup %3951  ;;  %v6677_v13 = vld [vmem:[#allocation97_spill] sm:$0xff]  ;;  %v6678_v35 = vld [vmem:[#allocation10_spill] sm:$0xff] }
 0x726   :  { %v3954_v23 = vpop.eup %3953  ;;  %v3524_v9 = vpack.c.bf16 %v6678_v35, %v6677_v13 }
 0x727   :  { %v2581_v56 = vsel %vm1431_vm14, %v6008_v6, %v5842_v19  ;;  %v4096_v19 = vld [vmem:[%s6269_s6 + $0xcc] ss:$16 sps:$4 sm:$0xff]   ;;  %v2698_v44 = vadd.f32 1.0, %v3954_v23  ;;  %v6682_v23 = vld [vmem:[#allocation92_spill] sm:$0xff] }
 0x728   :  { %v2720_v11 = vpack.c.bf16 %v2581_v56, %v2581_v56 }
 0x729   :  { %3959 = vrcp.f32 %v2698_v44 }
 0x72a   :  { %2754 = vmatmul.mubr.bf16.vlgmr.msra.gmra.mxu0 %v2720_v11  ;;  %2795 = vmatmul.mubr.bf16.vlgmr.msra.gmra.mxu1 %v2720_v11 }
 0x72b   :  { %2846 = vmatpush1.bf16.msra.mxu0 %v4093_v8  ;;  %2887 = vmatpush1.bf16.msra.mxu1 %v4094_v42  ;;  %v3726_v8 = vld [vmem:[%s6273_s8 + $0x20] sm:$0xff]   ;;  %v3727_v42 = vld [vmem:[%s6273_s8 + $0x18] sm:$0xff]  }
 0x72c   :  { %2847 = vmatprep.subr.bf16.mxu0 %v4095_v10  ;;  %2888 = vmatprep.subr.bf16.mxu1 %v4096_v19  ;;  %v3728_v10 = vld [vmem:[%s6273_s8 + $0x10] sm:$0xff]   ;;  %v3729_v19 = vld [vmem:[%s6273_s8 + $0x8] sm:$0xff]  }
 0x72d   :  { %2877 = vmatprep.mubr.bf16.mxu0 %v6429_v1  ;;  %2918 = vmatprep.mubr.bf16.mxu1 %v6429_v1  ;;  %v4100_v1 = vld [vmem:[%s6269_s6 + $0xac] ss:$16 sps:$4 sm:$0xff]  }
 0x72f   :  { %2848 = vmatpush1.bf16.msra.mxu0 %v4097_v24  ;;  %2889 = vmatpush1.bf16.msra.mxu1 %v4098_v47  ;;  %v6683_v24 = vld [vmem:[#allocation48_spill] sm:$0xff] }
 0x730   :  { %v3956_v54 = vpop.eup %3955  ;;  %2849 = vmatprep.subr.bf16.mxu0 %v4099_v61  ;;  %2890 = vmatprep.subr.bf16.mxu1 %v4100_v1  ;;  %v3527_v47 = vpack.c.bf16 %v6683_v24, %v6682_v23  ;;  %v3530_v61 = vpack.c.bf16 %v5836_v2, %v5718_v20  ;;  %v3732_v20 = vld [vmem:[%s6274_s9 + $0x30] sm:$0xff]   ;;  %v3735_v2 = vld [vmem:[%s6274_s9 + $0x18] sm:$0xff]  }
 0x731   :  { %v2702_v12 = vmul.f32 %v3956_v54, %v3952_v62  ;;  %v3730_v62 = vld [vmem:[%s6273_s8] sm:$0xff]  }
 0x732   :  { %v3958_v43 = vpop.eup %3957 }
 0x733   :  { %v2701_v21 = vmul.f32 %v3958_v43, %v5866_v53  ;;  %2850 = vmatpush1.bf16.msra.mxu0 %v4101_v52  ;;  %2891 = vmatpush1.bf16.msra.mxu1 %v4102_v25  ;;  %v3738_v43 = vld [vmem:[%s6274_s9] sm:$0xff]   ;;  %v6688_v52 = vld [vmem:[#allocation64_spill] sm:$0xff] }
 0x734   :  { %2851 = vmatprep.subr.bf16.mxu0 %v4103_v40  ;;  %2892 = vmatprep.subr.bf16.mxu1 %v4104_v60 }
 0x735   :  { %v2703_v58 = vadd.f32 %v2702_v12, %v2701_v21  ;;  %v3737_v12 = vld [vmem:[%s6274_s9 + $0x8] sm:$0xff]  }
 0x736   :  { %v3960_v32 = vpop.eup %3959 }
 0x737   :  { %3961 = vtanh.f32 %v2703_v58  ;;  %2852 = vmatpush1.bf16.msra.mxu0 %v4105_v3  ;;  %2893 = vmatpush1.bf16.msra.mxu1 %v4106_v51  ;;  %v6062_v16 = vsel %vm1300_vm13, %v2703_v58, %v5866_v53  ;;  %v4110_v53 = vld [vmem:[%s6269_s6 + $0x68] ss:$16 sps:$4 sm:$0xff]   ;;  %v6689_v3 = vld [vmem:[#allocation66_spill] sm:$0xff] }
 0x738   :  { %2853 = vmatprep.subr.bf16.mxu0 %v4107_v46  ;;  %2894 = vmatprep.subr.bf16.mxu1 %v4108_v22 }
 0x73b   :  { %2854 = vmatpush1.bf16.msra.mxu0 %v4109_v55  ;;  %2895 = vmatpush1.bf16.msra.mxu1 %v4110_v53 }
 0x73c   :  { %2855 = vmatprep.subr.bf16.mxu0 %v4111_v17  ;;  %2896 = vmatprep.subr.bf16.mxu1 %v4112_v31  ;;  %v6690_v17 = vld [vmem:[#allocation67_spill] sm:$0xff] }
 0x73f   :  { %2856 = vmatpush1.bf16.msra.mxu0 %v4113_v50  ;;  %2897 = vmatpush1.bf16.msra.mxu1 %v4114_v34  ;;  %v6691_v50 = vld [vmem:[#allocation65_spill] sm:$0xff] }
 0x740   :  { %2857 = vmatprep.subr.bf16.mxu0 %v4115_v48  ;;  %2898 = vmatprep.subr.bf16.mxu1 %v4116_v45 }
 0x743   :  { %2858 = vmatpush1.bf16.msra.mxu0 %v4117_v26  ;;  %2899 = vmatpush1.bf16.msra.mxu1 %v4118_v39 }
 0x744   :  { %v3962_v38 = vpop.eup %3961  ;;  %2859 = vmatprep.subr.bf16.mxu0 %v4119_v59  ;;  %2900 = vmatprep.subr.bf16.mxu1 %v4120_v5 }
 0x745   :  { %v6109_v29 = vmul.f32 %v3962_v38, %v3960_v32 }
 0x747   :  { %2860 = vmatpush1.bf16.msra.mxu0 %v4121_v30  ;;  %2901 = vmatpush1.bf16.msra.mxu1 %v4122_v49  ;;  %v2706_v18 = vsel %vm1300_vm13, %v6109_v29, %v5890_v37  ;;  %v3725_v37 = vld [vmem:[%s6273_s8 + $0x28] sm:$0xff]   ;;  %v6692_v30 = vld [vmem:[#allocation68_spill] sm:$0xff] }
 0x748   :  { %v2844_v33 = vpack.c.bf16 %v2706_v18, %v2706_v18  ;;  %3583 = vmatprep.subr.bf16.mxu1 %v3723_v7  ;;  %3559 = vmatprep.subr.bf16.mxu0 %v3731_v36 }
 0x74a   :  { %2878 = vmatmul.mubr.bf16.vlgmr.msra.gmra.mxu0 %v2844_v33  ;;  %2919 = vmatmul.mubr.bf16.vlgmr.msra.gmra.mxu1 %v2844_v33 }
 0x74b   :  { %3584 = vmatpush3.bf16.msra.mxu1 %v3723_v7  ;;  %3599 = vmatprep.mubr.msk.bf16.mxu1 %vm6130_vm3, %v3524_v9  ;;  %v6693_v9 = vld [vmem:[#allocation70_spill] sm:$0xff] }
 0x74c   :  { %3585 = vmatprep.subr.bf16.mxu1 %v3724_v4  ;;  %3560 = vmatpush3.bf16.msra.mxu0 %v3731_v36 }
 0x74d   :  { %3561 = vmatprep.subr.bf16.mxu0 %v3732_v20 }
 0x74f   :  { %3586 = vmatpush3.bf16.msra.mxu1 %v3724_v4 }
 0x750   :  { %3587 = vmatprep.subr.bf16.mxu1 %v3725_v37  ;;  %3562 = vmatpush3.bf16.msra.mxu0 %v3732_v20  ;;  %v6695_v20 = vld [vmem:[#allocation69_spill] sm:$0xff] }
 0x751   :  { %3563 = vmatprep.subr.bf16.mxu0 %v3733_v28 }
 0x753   :  { %3588 = vmatpush3.bf16.msra.mxu1 %v3725_v37 }
 0x754   :  { %3589 = vmatprep.subr.bf16.mxu1 %v3726_v8  ;;  %3564 = vmatpush3.bf16.msra.mxu0 %v3733_v28 }
 0x755   :  { %3565 = vmatprep.subr.bf16.mxu0 %v3734_v0 }
 0x757   :  { %3590 = vmatpush3.bf16.msra.mxu1 %v3726_v8 }
 0x758   :  { %3591 = vmatprep.subr.bf16.mxu1 %v3727_v42  ;;  %3566 = vmatpush3.bf16.msra.mxu0 %v3734_v0 }
 0x759   :  { %3567 = vmatprep.subr.bf16.mxu0 %v3735_v2 }
 0x75b   :  { %3592 = vmatpush3.bf16.msra.mxu1 %v3727_v42 }
 0x75c   :  { %3593 = vmatprep.subr.bf16.mxu1 %v3728_v10  ;;  %3568 = vmatpush3.bf16.msra.mxu0 %v3735_v2 }
 0x75d   :  { %3569 = vmatprep.subr.bf16.mxu0 %v3736_v41 }
 0x75f   :  { %3594 = vmatpush3.bf16.msra.mxu1 %v3728_v10 }
 0x760   :  { %3595 = vmatprep.subr.bf16.mxu1 %v3729_v19  ;;  %3570 = vmatpush3.bf16.msra.mxu0 %v3736_v41 }
 0x761   :  { %3571 = vmatprep.subr.bf16.mxu0 %v3737_v12 }
 0x763   :  { %3596 = vmatpush3.bf16.msra.mxu1 %v3729_v19 }
 0x764   :  { %3597 = vmatprep.subr.bf16.mxu1 %v3730_v62  ;;  %3572 = vmatpush3.bf16.msra.mxu0 %v3737_v12 }
 0x765   :  { %3573 = vmatprep.subr.bf16.mxu0 %v3738_v43 }
 0x767   :  { %3598 = vmatpush3.bf16.msra.mxu1 %v3730_v62 }
 0x768   :  { %3574 = vmatpush3.bf16.msra.mxu0 %v3738_v43 }
 0x76a   :  { %3600 = vmatmul.mubr.msk.bf16.vlgmr.msra.gmra.mxu1 %vm6160_vm4, %v3527_v47 }
 0x76b   :  { %3603 = vmatprep.mubr.msk.bf16.mxu1 %vm6172_vm5, %v3530_v61  ;;  %v6694_v61 = vld [vmem:[#allocation71_spill] sm:$0xff] }
 0x7ea   :  { %v2755_v44 = vpop.f32.mrf.mxu0  ;;  %v2796_v21 = vpop.f32.mrf.mxu1 }
 0x7eb   :  { %v2803_v25 = vadd.f32 %v2755_v44, %v6688_v52  ;;  %v2805_v34 = vadd.f32 %v2796_v21, %v6691_v50  ;;  %v6699_v50 = vld [vmem:[#allocation50_spill] sm:$0xff] }
 0x7ec   :  { %v2757_v40 = vpop.f32.mrf.mxu0  ;;  %v2798_v60 = vpop.f32.mrf.mxu1 }
 0x7ed   :  { %v3460_v58 = vmul.f32 -1.442695, %v2803_v25  ;;  %v2804_v51 = vadd.f32 %v2757_v40, %v6689_v3  ;;  %v2806_v31 = vadd.f32 %v2798_v60, %v6690_v17 }
 0x7ee   :  { %v2759_v15 = vpop.f32.mrf.mxu0  ;;  %v2800_v46 = vpop.f32.mrf.mxu1 }
 0x7ef   :  { %3963 = vpow2.f32 %v3460_v58  ;;  %v3461_v22 = vmul.f32 -1.442695, %v2804_v51  ;;  %v3462_v48 = vmul.f32 -1.442695, %v2806_v31  ;;  %v3515_v31 = vpack.c.bf16 %v5764_v27, %v5882_v57 }
 0x7f0   :  { %v2760_v55 = vpop.f32.mrf.mxu0  ;;  %v2801_v53 = vpop.f32.mrf.mxu1 }
 0x7f1   :  { %3965 = vpow2.f32 %v3461_v22 }
 0x7f2   :  { %3967 = vtanh.f32 %v2805_v34  ;;  %v6700_v34 = vld [vmem:[#allocation89_spill] sm:$0xff] }
 0x7f3   :  { %3969 = vpow2.f32 %v3462_v48  ;;  %v3518_v48 = vpack.c.bf16 %v6700_v34, %v6699_v50 }
 0x7fc   :  { %v3964_v45 = vpop.eup %3963 }
 0x7fd   :  { %v2810_v32 = vadd.f32 1.0, %v3964_v45  ;;  %v6702_v45 = vld [vmem:[#allocation38_spill] sm:$0xff] }
 0x7fe   :  { %v3966_v26 = vpop.eup %3965 }
 0x7ff   :  { %3971 = vrcp.f32 %v2810_v32  ;;  %v2816_v39 = vadd.f32 1.0, %v3966_v26  ;;  %v3968_v38 = vpop.eup %3967 }
 0x800   :  { %v3970_v7 = vpop.eup %3969 }
 0x801   :  { %3973 = vrcp.f32 %v2816_v39  ;;  %v2823_v8 = vadd.f32 1.0, %v3970_v7  ;;  %v3490_v39 = vld [vmem:[%s6275_s10] ss:$0 sm:$0xff] }
 0x80a   :  { %v2879_v59 = vpop.f32.mrf.mxu0  ;;  %v2920_v5 = vpop.f32.mrf.mxu1 }
 0x80b   :  { %v2927_v49 = vadd.f32 %v2879_v59, %v6692_v30  ;;  %v2929_v28 = vadd.f32 %v2920_v5, %v6695_v20 }
 0x80c   :  { %v3972_v18 = vpop.eup %3971  ;;  %v2881_v33 = vpop.f32.mrf.mxu0 }
 0x80d   :  { %v2922_v4 = vpop.f32.mrf.mxu1  ;;  %v2827_v13 = vmul.f32 %v3972_v18, %v3968_v38  ;;  %v3463_v35 = vmul.f32 -1.442695, %v2927_v49  ;;  %v2928_v56 = vadd.f32 %v2881_v33, %v6693_v9 }
 0x80e   :  { %v3974_v37 = vpop.eup %3973  ;;  %v2883_v42 = vpop.f32.mrf.mxu0  ;;  %v2930_v36 = vadd.f32 %v2922_v4, %v6694_v61 }
 0x80f   :  { %v2924_v10 = vpop.f32.mrf.mxu1  ;;  %v2826_v19 = vmul.f32 %v3974_v37, %v6004_v14  ;;  %3975 = vpow2.f32 %v3463_v35  ;;  %v3464_v62 = vmul.f32 -1.442695, %v2928_v56 }
 0x810   :  { %v2884_v23 = vpop.f32.mrf.mxu0  ;;  %v3465_v0 = vmul.f32 -1.442695, %v2930_v36 }
 0x811   :  { %v2925_v24 = vpop.f32.mrf.mxu1  ;;  %v2828_v47 = vadd.f32 %v2827_v13, %v2826_v19  ;;  %3977 = vpow2.f32 %v3464_v62 }
 0x812   :  { %3979 = vrcp.f32 %v2823_v8 }
 0x813   :  { %3981 = vtanh.f32 %v2828_v47 }
 0x814   :  { %3983 = vtanh.f32 %v2929_v28 }
 0x815   :  { %3985 = vpow2.f32 %v3465_v0 }
 0x81c   :  { %v3976_v2 = vpop.eup %3975 }
 0x81d   :  { %v2934_v41 = vadd.f32 1.0, %v3976_v2 }
 0x81e   :  { %v3978_v12 = vpop.eup %3977 }
 0x81f   :  { %v3980_v43 = vpop.eup %3979  ;;  %3987 = vrcp.f32 %v2934_v41  ;;  %v2940_v14 = vadd.f32 1.0, %v3978_v12 }
 0x820   :  { %v3982_v44 = vpop.eup %3981 }
 0x821   :  { %3989 = vrcp.f32 %v2940_v14  ;;  %v2830_v21 = vmul.f32 %v3982_v44, %v3980_v43  ;;  %v3984_v60 = vpop.eup %3983 }
 0x822   :  { %v3986_v58 = vpop.eup %3985 }
 0x823   :  { %v3533_v52 = vpack.c.bf16 %v2830_v21, %v6008_v6  ;;  %v2947_v46 = vadd.f32 1.0, %v3986_v58 }
 0x825   :  { %3604 = vmatmul.mubr.msk.bf16.gmra.mxu1 %vm6216_vm6, %v3533_v52  ;;  %3991 = vrcp.f32 %v2947_v46 }
 0x82c   :  { %v3988_v3 = vpop.eup %3987 }
 0x82d   :  { %v2951_v51 = vmul.f32 %v3988_v3, %v3984_v60 }
 0x82e   :  { %v3990_v15 = vpop.eup %3989 }
 0x82f   :  { %v2950_v22 = vmul.f32 %v3990_v15, %v6062_v16  ;;  %v6701_v16 = vld [vmem:[#allocation12_spill] sm:$0xff] }
 0x830   :  { %v3521_v32 = vpack.c.bf16 %v6702_v45, %v6701_v16 }
 0x831   :  { %v2952_v6 = vadd.f32 %v2951_v51, %v2950_v22 }
 0x832   :  { %v3992_v63 = vpop.eup %3991 }
 0x833   :  { %3993 = vtanh.f32 %v2952_v6 }
 0x840   :  { %v3994_v55 = vpop.eup %3993 }
 0x841   :  { %v2954_v53 = vmul.f32 %v3994_v55, %v3992_v63 }
 0x843   :  { %v3512_v17 = vpack.c.bf16 %v6109_v29, %v2954_v53  ;;  %v3601_v29 = vpop.f32.mrf.mxu1 }
 0x845   :  { %3575 = vmatprep.mubr.msk.bf16.mxu0 %vm6130_vm3, %v3512_v17  ;;  %v3268_v27 = vpop.f32.mrf.mxu1 }
 0x846   :  { %3576 = vmatmul.mubr.msk.bf16.vlgmr.msra.gmra.mxu0 %vm6160_vm4, %v3515_v31 }
 0x847   :  { %3579 = vmatprep.mubr.msk.bf16.mxu0 %vm6172_vm5, %v3518_v48  ;;  %v3602_v57 = vpop.f32.mrf.mxu1 }
 0x849   :  { %v3271_v11 = vpop.f32.mrf.mxu1 }
 0x84e   :  { %3580 = vmatmul.mubr.msk.bf16.gmra.mxu0 %vm6216_vm6, %v3521_v32 }
 0x8e5   :  { %v3605_v38 = vpop.f32.mrf.mxu1 }
 0x8e7   :  { %v3284_v18 = vpop.f32.mrf.mxu1 }
 0x8e9   :  { %v3606_v37 = vpop.f32.mrf.mxu1 }
 0x8eb   :  { %v3287_v24 = vpop.f32.mrf.mxu1 }
 0x906   :  { %v3577_v26 = vpop.f32.mrf.mxu0 }
 0x907   :  { %v3277_v54 = vadd.f32 %v3601_v29, %v3577_v26 }
 0x908   :  { %v3131_v59 = vpop.f32.mrf.mxu0 }
 0x909   :  { %v3308_v1 = vadd.f32 %v3490_v39, %v3277_v54  ;;  %v3269_v5 = vadd.f32 %v3268_v27, %v3131_v59 }
 0x90a   :  { %v3578_v7 = vpop.f32.mrf.mxu0 }
 0x90b   :  { %3316 = vst [vmem:[%s6276_s11 + $0x10] sm:$0xff] %v3308_v1  ;;  %v3306_v30 = vadd.f32 %v3490_v39, %v3269_v5  ;;  %v3280_v49 = vadd.f32 %v3602_v57, %v3578_v7 }
 0x90c   :  { %v3134_v33 = vpop.f32.mrf.mxu0 }
 0x90d   :  { %3314 = vst [vmem:[%s6276_s11] sm:$0xff] %v3306_v30  ;;  %v3309_v4 = vadd.f32 %v3490_v39, %v3280_v49  ;;  %v3272_v13 = vadd.f32 %v3271_v11, %v3134_v33 }
 0x90e   :  { %v3581_v35 = vpop.f32.mrf.mxu0 }
 0x90f   :  { %3317 = vst [vmem:[%s6276_s11 + $0x18] sm:$0xff] %v3309_v4  ;;  %v3307_v9 = vadd.f32 %v3490_v39, %v3272_v13  ;;  %v3293_v56 = vadd.f32 %v3605_v38, %v3581_v35 }
 0x910   :  { %v3147_v8 = vpop.f32.mrf.mxu0 }
 0x911   :  { %3315 = vst [vmem:[%s6276_s11 + $0x8] sm:$0xff] %v3307_v9  ;;  %v3312_v42 = vadd.f32 %v3490_v39, %v3293_v56  ;;  %v3285_v10 = vadd.f32 %v3284_v18, %v3147_v8 }
 0x912   :  { %v3582_v19 = vpop.f32.mrf.mxu0 }
 0x913   :  { %3320 = vst [vmem:[%s6276_s11 + $0x30] sm:$0xff] %v3312_v42  ;;  %v3310_v62 = vadd.f32 %v3490_v39, %v3285_v10  ;;  %v3296_v23 = vadd.f32 %v3606_v37, %v3582_v19 }
 0x914   :  { %v3150_v47 = vpop.f32.mrf.mxu0 }
 0x915   :  { %3318 = vst [vmem:[%s6276_s11 + $0x20] sm:$0xff] %v3310_v62  ;;  %v3313_v61 = vadd.f32 %v3490_v39, %v3296_v23  ;;  %v3288_v36 = vadd.f32 %v3287_v24, %v3150_v47 }
 0x917   :  { %3321 = vst [vmem:[%s6276_s11 + $0x38] sm:$0xff] %v3313_v61  ;;  %v3311_v20 = vadd.f32 %v3490_v39, %v3288_v36 }
 0x919   :  { %3319 = vst [vmem:[%s6276_s11 + $0x28] sm:$0xff] %v3311_v20 }

</bundles_post_ra>
